<compile_context>
chip_gen: v7x
topology: tpu7x:2x2x1
jax: 0.10.0
libtpu: 0.0.40
codegen_flags: <defaults>
</compile_context>

<pallas_src>
import math

import jax
import jax.numpy as jnp
from jax.experimental import pallas as pl
from jax.experimental.pallas import tpu as pltpu


def _round_up(n, m):
    return ((n + m - 1) // m) * m


def _cdiv(a, b):
    return (a + b - 1) // b


def _default_vmem_limit_bytes():
    # min(64 MiB, physical/2): 64 MiB on v5e/v6e (128 MiB VMEM), 32 MiB on
    # v7x (64 MiB/TC).  Conservative 32 MiB fallback if the query fails.
    try:
        cap = int(pltpu.get_tpu_info().vmem_capacity_bytes)
        return min(64 << 20, cap // 2)
    except Exception:
        return 32 << 20


def decoder_kernel(x_ref,
                   w1_ref, b1_ref,
                   w2_ref, b2_ref,
                   w3_ref, b3_ref,
                   w4_ref, b4_ref,
                   o_ref):
    # Fused 4-layer MLP on one batch tile.  Weights (~3 MB bf16) stay in VMEM
    # for the whole grid; only the x / out tiles stream per grid step.
    x = x_ref[...].astype(jnp.bfloat16)  # f32 tile -> bf16 MXU operand

    h = jnp.dot(x, w1_ref[...], preferred_element_type=jnp.float32) + b1_ref[...]
    h = jnp.maximum(h, 0.0).astype(jnp.bfloat16)

    h = jnp.dot(h, w2_ref[...], preferred_element_type=jnp.float32) + b2_ref[...]
    h = jnp.maximum(h, 0.0).astype(jnp.bfloat16)

    h = jnp.dot(h, w3_ref[...], preferred_element_type=jnp.float32) + b3_ref[...]
    h = jnp.maximum(h, 0.0).astype(jnp.bfloat16)

    h = jnp.dot(h, w4_ref[...], preferred_element_type=jnp.float32) + b4_ref[...]

    o_ref[...] = h.astype(o_ref.dtype)


def decoder_forward(x, params, input_dim, *, tile_b=512):
    """x: [B, feature_dim] float32.  Returns [B, input_dim] float32."""
    B, feat = x.shape
    F_pad = params["w1"].shape[0]   # feature_dim rounded to 16
    H1 = params["w1"].shape[1]
    H2 = params["w2"].shape[1]
    H3 = params["w3"].shape[1]
    O_pad = params["w4"].shape[1]

    # Rare path: if feature_dim is not 16-aligned, pad with *explicit* zeros
    # (never rely on garbage*0).  No-op (and no extra HBM pass) when aligned.
    if feat != F_pad:
        x = jnp.pad(x, ((0, 0), (0, F_pad - feat)))

    # Batch tile: multiple of 16 (bf16 sublane pair), never larger than the
    # batch needs.  Partial last tiles are handled by Pallas masked DMA.
    gran = 16 if B >= 16 else 8
    tile_b_eff = max(gran, min(tile_b, _round_up(B, gran)))
    # v7x megacore: make sure there are >= 2 batch tiles when B is large
    # enough so both TensorCores get work under dimension_semantics=parallel.
    if B >= 64 and _cdiv(B, tile_b_eff) < 2:
        tile_b_eff = _round_up(_cdiv(B, 2), 16)
    num_tiles = _cdiv(B, tile_b_eff)
    grid = (num_tiles,)

    # Weights/biases: constant index_map -> fetched once, VMEM-resident.
    def const_spec(shape):
        return pl.BlockSpec(shape, lambda i: (0, 0))

    param_keys = ("w1", "b1", "w2", "b2", "w3", "b3", "w4", "b4")
    operands = (x,) + tuple(params[k] for k in param_keys)
    in_specs = (
        [pl.BlockSpec((tile_b_eff, F_pad), lambda i: (i, 0))]
        + [const_spec(params[k].shape) for k in param_keys]
    )

    B_eff = num_tiles * tile_b_eff
    flops = 2 * B_eff * (F_pad * H1 + H1 * H2 + H2 * H3 + H3 * O_pad)
    bytes_accessed = int(
        B * F_pad * 4
        + B * O_pad * 4
        + sum(int(params[k].size) * params[k].dtype.itemsize for k in param_keys)
    )

    out = pl.pallas_call(
        decoder_kernel,
        out_shape=jax.ShapeDtypeStruct((B, O_pad), jnp.float32),
        grid=grid,
        in_specs=in_specs,
        out_specs=pl.BlockSpec((tile_b_eff, O_pad), lambda i: (i, 0)),
        compiler_params=pltpu.CompilerParams(
            dimension_semantics=("parallel",),
            vmem_limit_bytes=_default_vmem_limit_bytes(),
        ),
        cost_estimate=pl.CostEstimate(
            flops=flops, transcendentals=0, bytes_accessed=bytes_accessed),
    )(*operands)

    if O_pad == input_dim:
        return out
    return out[:, :input_dim]


def init_params(key, input_dim, feature_dim):
    """PyTorch-like Linear init (uniform +/- 1/sqrt(fan_in)), stored [in, out].
    Layer-1 K dim padded only to 16 (bf16 sublane); hidden/output dims padded
    to 128-multiples.  Weights bf16, biases f32 [1, out]."""
    dims = [feature_dim, 2000, 500, 500, input_dim]
    pdims = [_round_up(feature_dim, 16), 2048, 512, 512, _round_up(input_dim, 128)]
    params = {}
    for i in range(4):
        fan_in, fan_out = dims[i], dims[i + 1]
        pin, pout = pdims[i], pdims[i + 1]
        key, kw, kb = jax.random.split(key, 3)
        bound = 1.0 / math.sqrt(fan_in)
        w = jax.random.uniform(kw, (fan_in, fan_out), jnp.float32,
                               minval=-bound, maxval=bound)
        b = jax.random.uniform(kb, (fan_out,), jnp.float32,
                               minval=-bound, maxval=bound)
        w_pad = jnp.zeros((pin, pout), jnp.float32).at[:fan_in, :fan_out].set(w)
        b_pad = jnp.zeros((1, pout), jnp.float32).at[0, :fan_out].set(b)
        params[f"w{i+1}"] = w_pad.astype(jnp.bfloat16)
        params[f"b{i+1}"] = b_pad
    return params


def decoder_reference(x, params, input_dim):
    """Pure-JAX reference mirroring the kernel's bf16-operand / f32-accum math."""
    F_pad = params["w1"].shape[0]
    B, feat = x.shape
    h = jnp.zeros((B, F_pad), jnp.float32).at[:, :feat].set(x)
    h = h.astype(jnp.bfloat16).astype(jnp.float32)
    for i in (1, 2, 3):
        w = params[f"w{i}"].astype(jnp.float32)
        h = jnp.maximum(h @ w + params[f"b{i}"], 0.0)
        h = h.astype(jnp.bfloat16).astype(jnp.float32)
    h = h @ params["w4"].astype(jnp.float32) + params["b4"]
    return h[:, :input_dim]


if __name__ == "__main__":
    key = jax.random.PRNGKey(0)
    feature_dim = 32
    input_dim = 64
    batch = 8

    key, kx = jax.random.split(key)
    x = jax.random.normal(kx, (batch, feature_dim), jnp.float32)
    params = init_params(key, input_dim, feature_dim)

    out = decoder_forward(x, params, input_dim)
    out = jax.block_until_ready(out)

    ref = decoder_reference(x, params, input_dim)
    assert out.shape == (batch, input_dim), out.shape
    assert jnp.allclose(out, ref, atol=2e-2, rtol=2e-2), "mismatch vs reference"

    print("KERNEL_OK")
</pallas_src>

<mosaic_0001>
module attributes {stable_mosaic.version = 11 : i64} {
  func.func @decoder_kernel(%arg0: i32, %arg1: memref<8x32xf32, #tpu.memory_space<vmem>>, %arg2: memref<32x2048xbf16, #tpu.memory_space<vmem>>, %arg3: memref<1x2048xf32, #tpu.memory_space<vmem>>, %arg4: memref<2048x512xbf16, #tpu.memory_space<vmem>>, %arg5: memref<1x512xf32, #tpu.memory_space<vmem>>, %arg6: memref<512x512xbf16, #tpu.memory_space<vmem>>, %arg7: memref<1x512xf32, #tpu.memory_space<vmem>>, %arg8: memref<512x128xbf16, #tpu.memory_space<vmem>>, %arg9: memref<1x128xf32, #tpu.memory_space<vmem>>, %arg10: memref<8x128xf32, #tpu.memory_space<vmem>>) attributes {dimension_semantics = [#tpu.dimension_semantics<parallel>], iteration_bounds = array<i64: 1>, scalar_prefetch = 0 : i64, scratch_operands = 0 : i64, tpu.core_type = #tpu.core_type<tc>, window_params = [{transform_indices = @transform_0, window_bounds = array<i64: 8, 32>}, {pipeline_mode = #tpu.pipeline_mode<synchronous>, transform_indices = @transform_1, window_bounds = array<i64: 32, 2048>}, {pipeline_mode = #tpu.pipeline_mode<synchronous>, transform_indices = @transform_2, window_bounds = array<i64: 1, 2048>}, {pipeline_mode = #tpu.pipeline_mode<synchronous>, transform_indices = @transform_3, window_bounds = array<i64: 2048, 512>}, {pipeline_mode = #tpu.pipeline_mode<synchronous>, transform_indices = @transform_4, window_bounds = array<i64: 1, 512>}, {pipeline_mode = #tpu.pipeline_mode<synchronous>, transform_indices = @transform_5, window_bounds = array<i64: 512, 512>}, {pipeline_mode = #tpu.pipeline_mode<synchronous>, transform_indices = @transform_6, window_bounds = array<i64: 1, 512>}, {pipeline_mode = #tpu.pipeline_mode<synchronous>, transform_indices = @transform_7, window_bounds = array<i64: 512, 128>}, {pipeline_mode = #tpu.pipeline_mode<synchronous>, transform_indices = @transform_8, window_bounds = array<i64: 1, 128>}, {transform_indices = @transform_9, window_bounds = array<i64: 8, 128>}]} {
    %c0 = arith.constant 0 : index
    %c0_0 = arith.constant 0 : index
    %0 = vector.load %arg1[%c0, %c0_0] : memref<8x32xf32, #tpu.memory_space<vmem>>, vector<8x32xf32>
    %1 = arith.truncf %0 : vector<8x32xf32> to vector<8x32xbf16>
    %c0_1 = arith.constant 0 : index
    %c0_2 = arith.constant 0 : index
    %2 = vector.load %arg2[%c0_1, %c0_2] : memref<32x2048xbf16, #tpu.memory_space<vmem>>, vector<32x2048xbf16>
    %cst = arith.constant dense<0.000000e+00> : vector<8x2048xf32>
    %3 = tpu.matmul %1, %2, %cst {dimension_numbers = #tpu.dot_dimension_numbers<[1], [0], [0], [1], [0, 0, 1, 1], [], []>} : vector<8x32xbf16>, vector<32x2048xbf16>, vector<8x2048xf32> -> vector<8x2048xf32>
    %c0_3 = arith.constant 0 : index
    %c0_4 = arith.constant 0 : index
    %4 = vector.load %arg3[%c0_3, %c0_4] : memref<1x2048xf32, #tpu.memory_space<vmem>>, vector<1x2048xf32>
    %5 = vector.broadcast %4 : vector<1x2048xf32> to vector<8x2048xf32>
    %6 = arith.addf %3, %5 : vector<8x2048xf32>
    %cst_5 = arith.constant 0.000000e+00 : f32
    %7 = vector.broadcast %cst_5 : f32 to vector<8x2048xf32>
    %8 = arith.maximumf %6, %7 : vector<8x2048xf32>
    %9 = arith.truncf %8 : vector<8x2048xf32> to vector<8x2048xbf16>
    %c0_6 = arith.constant 0 : index
    %c0_7 = arith.constant 0 : index
    %10 = vector.load %arg4[%c0_6, %c0_7] : memref<2048x512xbf16, #tpu.memory_space<vmem>>, vector<2048x512xbf16>
    %cst_8 = arith.constant dense<0.000000e+00> : vector<8x512xf32>
    %11 = tpu.matmul %9, %10, %cst_8 {dimension_numbers = #tpu.dot_dimension_numbers<[1], [0], [0], [1], [0, 0, 1, 1], [], []>} : vector<8x2048xbf16>, vector<2048x512xbf16>, vector<8x512xf32> -> vector<8x512xf32>
    %c0_9 = arith.constant 0 : index
    %c0_10 = arith.constant 0 : index
    %12 = vector.load %arg5[%c0_9, %c0_10] : memref<1x512xf32, #tpu.memory_space<vmem>>, vector<1x512xf32>
    %13 = vector.broadcast %12 : vector<1x512xf32> to vector<8x512xf32>
    %14 = arith.addf %11, %13 : vector<8x512xf32>
    %cst_11 = arith.constant 0.000000e+00 : f32
    %15 = vector.broadcast %cst_11 : f32 to vector<8x512xf32>
    %16 = arith.maximumf %14, %15 : vector<8x512xf32>
    %17 = arith.truncf %16 : vector<8x512xf32> to vector<8x512xbf16>
    %c0_12 = arith.constant 0 : index
    %c0_13 = arith.constant 0 : index
    %18 = vector.load %arg6[%c0_12, %c0_13] : memref<512x512xbf16, #tpu.memory_space<vmem>>, vector<512x512xbf16>
    %cst_14 = arith.constant dense<0.000000e+00> : vector<8x512xf32>
    %19 = tpu.matmul %17, %18, %cst_14 {dimension_numbers = #tpu.dot_dimension_numbers<[1], [0], [0], [1], [0, 0, 1, 1], [], []>} : vector<8x512xbf16>, vector<512x512xbf16>, vector<8x512xf32> -> vector<8x512xf32>
    %c0_15 = arith.constant 0 : index
    %c0_16 = arith.constant 0 : index
    %20 = vector.load %arg7[%c0_15, %c0_16] : memref<1x512xf32, #tpu.memory_space<vmem>>, vector<1x512xf32>
    %21 = vector.broadcast %20 : vector<1x512xf32> to vector<8x512xf32>
    %22 = arith.addf %19, %21 : vector<8x512xf32>
    %cst_17 = arith.constant 0.000000e+00 : f32
    %23 = vector.broadcast %cst_17 : f32 to vector<8x512xf32>
    %24 = arith.maximumf %22, %23 : vector<8x512xf32>
    %25 = arith.truncf %24 : vector<8x512xf32> to vector<8x512xbf16>
    %c0_18 = arith.constant 0 : index
    %c0_19 = arith.constant 0 : index
    %26 = vector.load %arg8[%c0_18, %c0_19] : memref<512x128xbf16, #tpu.memory_space<vmem>>, vector<512x128xbf16>
    %cst_20 = arith.constant dense<0.000000e+00> : vector<8x128xf32>
    %27 = tpu.matmul %25, %26, %cst_20 {dimension_numbers = #tpu.dot_dimension_numbers<[1], [0], [0], [1], [0, 0, 1, 1], [], []>} : vector<8x512xbf16>, vector<512x128xbf16>, vector<8x128xf32> -> vector<8x128xf32>
    %c0_21 = arith.constant 0 : index
    %c0_22 = arith.constant 0 : index
    %28 = vector.load %arg9[%c0_21, %c0_22] : memref<1x128xf32, #tpu.memory_space<vmem>>, vector<1x128xf32>
    %29 = vector.broadcast %28 : vector<1x128xf32> to vector<8x128xf32>
    %30 = arith.addf %27, %29 : vector<8x128xf32>
    %c0_23 = arith.constant 0 : index
    %c0_24 = arith.constant 0 : index
    %31 = vector.load %arg10[%c0_23, %c0_24] : memref<8x128xf32, #tpu.memory_space<vmem>>, vector<8x128xf32>
    tpu.vector_store %arg10[%c0_23, %c0_24], %30 {strides = array<i32>} : memref<8x128xf32, #tpu.memory_space<vmem>>, vector<8x128xf32>,
    return
  }
  func.func @transform_0(%arg0: i32) -> (i32, i32) {
    %c0_i32 = arith.constant 0 : i32
    %c0_i32_0 = arith.constant 0 : i32
    return %arg0, %c0_i32 : i32, i32
  }
  func.func @transform_1(%arg0: i32) -> (i32, i32) {
    %c0_i32 = arith.constant 0 : i32
    %c0_i32_0 = arith.constant 0 : i32
    %c0_i32_1 = arith.constant 0 : i32
    return %c0_i32, %c0_i32_0 : i32, i32
  }
  func.func @transform_2(%arg0: i32) -> (i32, i32) {
    %c0_i32 = arith.constant 0 : i32
    %c0_i32_0 = arith.constant 0 : i32
    %c0_i32_1 = arith.constant 0 : i32
    return %c0_i32, %c0_i32_0 : i32, i32
  }
  func.func @transform_3(%arg0: i32) -> (i32, i32) {
    %c0_i32 = arith.constant 0 : i32
    %c0_i32_0 = arith.constant 0 : i32
    %c0_i32_1 = arith.constant 0 : i32
    return %c0_i32, %c0_i32_0 : i32, i32
  }
  func.func @transform_4(%arg0: i32) -> (i32, i32) {
    %c0_i32 = arith.constant 0 : i32
    %c0_i32_0 = arith.constant 0 : i32
    %c0_i32_1 = arith.constant 0 : i32
    return %c0_i32, %c0_i32_0 : i32, i32
  }
  func.func @transform_5(%arg0: i32) -> (i32, i32) {
    %c0_i32 = arith.constant 0 : i32
    %c0_i32_0 = arith.constant 0 : i32
    %c0_i32_1 = arith.constant 0 : i32
    return %c0_i32, %c0_i32_0 : i32, i32
  }
  func.func @transform_6(%arg0: i32) -> (i32, i32) {
    %c0_i32 = arith.constant 0 : i32
    %c0_i32_0 = arith.constant 0 : i32
    %c0_i32_1 = arith.constant 0 : i32
    return %c0_i32, %c0_i32_0 : i32, i32
  }
  func.func @transform_7(%arg0: i32) -> (i32, i32) {
    %c0_i32 = arith.constant 0 : i32
    %c0_i32_0 = arith.constant 0 : i32
    %c0_i32_1 = arith.constant 0 : i32
    return %c0_i32, %c0_i32_0 : i32, i32
  }
  func.func @transform_8(%arg0: i32) -> (i32, i32) {
    %c0_i32 = arith.constant 0 : i32
    %c0_i32_0 = arith.constant 0 : i32
    %c0_i32_1 = arith.constant 0 : i32
    return %c0_i32, %c0_i32_0 : i32, i32
  }
  func.func @transform_9(%arg0: i32) -> (i32, i32) {
    %c0_i32 = arith.constant 0 : i32
    %c0_i32_0 = arith.constant 0 : i32
    return %arg0, %c0_i32 : i32, i32
  }
}

</mosaic_0001>

<bundles_post_ra>
// kernel: tpu_custom_call.1
= control target key start
LH: loop header
LB: loop body
LE: loop exit
PB: predicated region body
PF: predicated region fallthrough
CT: control target
= control target key end

     0   :  { %14 = vsyncpa [#allocation3], 0  ;;  %s8286_s0 = inlined_call_operand.hbm [shape: f32[8,32], index: 0, kind: input, shape index: {}]   ;;  %s8287_s1 = inlined_call_operand.hbm [shape: bf16[32,2048], index: 1, kind: input, shape index: {}]   ;;  %s8288_s2 = inlined_call_operand.hbm [shape: f32[1,2048], index: 2, kind: input, shape index: {}]   ;;  %s8289_s3 = inlined_call_operand.hbm [shape: bf16[2048,512], index: 3, kind: input, shape index: {}]   ;;  %s8290_s4 = inlined_call_operand.hbm [shape: f32[1,512], index: 4, kind: input, shape index: {}]   ;;  %s8291_s5 = inlined_call_operand.hbm [shape: bf16[512,512], index: 5, kind: input, shape index: {}]   ;;  %s8292_s6 = inlined_call_operand.hbm [shape: f32[1,512], index: 6, kind: input, shape index: {}]   ;;  %s8293_s7 = inlined_call_operand.hbm [shape: bf16[512,128], index: 7, kind: input, shape index: {}]   ;;  %s8294_s8 = inlined_call_operand.hbm [shape: f32[1,128], index: 8, kind: input, shape index: {}]   ;;  %s8295_s9 = inlined_call_operand.hbm [shape: f32[8,128], index: 9, kind: output, shape index: {}]  }
   0x1   :  { %15 = vsyncpa [#allocation6], 0 }
   0x2   :  { %16 = vsyncpa [#allocation9], 0 }
   0x3   :  { %17 = vsyncpa [#allocation12], 0 }
   0x4   :  { %18 = vsyncpa [#allocation15], 0 }
   0x5   :  { %19 = vsyncpa [#allocation4], 0  ;;  %s7942_s30 = smov [#allocation5]   ;;  %s7710_s13 = scalar_lea.hbm %s8287_s1, 4096 }
   0x6   :  { %s35_s10 = sshll.u32 %s7942_s30, 4  ;;  %p7711_p0 = scmp.ne.s32.totalorder %s8287_s1, %s7710_s13  ;;  %s36_s10 = int_to_ptr.vmem [resolvable:$true] %s35_s10 }
   0x7   :  { %p7714_p1 = scmp.lt.u32.totalorder %s7710_s13, %s8287_s1 }
   0x9   :  { %p7716_p2 = pnand %p7714_p1, %p7711_p0 }
   0xb   :  { %7719 = shalt.err (!%p7716_p2)
}
   0xc   :  { %s7720_s18 = scalar_lea.vmem %s36_s10, 4096  ;;  %p7725_p4 = scmp.lt.s32.totalorder %s36_s10, %s36_s10 }
   0xd   :  { %p7721_p3 = scmp.ne.s32.totalorder %s36_s10, %s7720_s18  ;;  %p7726_p5 = scmp.lt.s32.totalorder %s7720_s18, %s7720_s18 }
   0xf   :  { %p7727_p6 = por %p7726_p5, %p7725_p4 }
  0x11   :  { %p7728_p7 = pnand %p7727_p6, %p7721_p3 }
  0x13   :  { %7731 = shalt.err (!%p7728_p7)
}
  0x14   :  { %s7943_s19 = smov 1024   ;;  %s7944_s20 = smov 64  }
  0x15   :  { %41 = dma.hbm_to_vmem [thread:$0]  %s8287_s1, 4096, %s36_s10, [#allocation6], %s7943_s19, %s7943_s19, %s7944_s20  }
  0x16   :  { %s7945_s23 = smov [#allocation8]   ;;  %s7732_s27 = scalar_lea.hbm %s8289_s3, 65536 }
  0x17   :  { %s57_s24 = sshll.u32 %s7945_s23, 4  ;;  %p7733_p8 = scmp.ne.s32.totalorder %s8289_s3, %s7732_s27  ;;  %s58_s24 = int_to_ptr.vmem [resolvable:$true] %s57_s24 }
  0x18   :  { %p7736_p9 = scmp.lt.u32.totalorder %s7732_s27, %s8289_s3 }
  0x1a   :  { %p7738_p10 = pnand %p7736_p9, %p7733_p8 }
  0x1c   :  { %7741 = shalt.err (!%p7738_p10)
}
  0x1d   :  { %s7742_s12 = scalar_lea.vmem %s58_s24, 65536  ;;  %p7747_p12 = scmp.lt.s32.totalorder %s58_s24, %s58_s24 }
  0x1e   :  { %p7743_p11 = scmp.ne.s32.totalorder %s58_s24, %s7742_s12  ;;  %p7748_p13 = scmp.lt.s32.totalorder %s7742_s12, %s7742_s12 }
  0x20   :  { %p7749_p0 = por %p7748_p13, %p7747_p12 }
  0x22   :  { %p7750_p1 = pnand %p7749_p0, %p7743_p11 }
  0x24   :  { %7753 = shalt.err (!%p7750_p1)
}
  0x25   :  { %s7946_s1 = smov 256   ;;  %s7947_s10 = smov 16  }
  0x26   :  { %63 = dma.hbm_to_vmem [thread:$0]  %s8289_s3, 65536, %s58_s24, [#allocation9], %s7946_s1, %s7946_s1, %s7947_s10  }
  0x27   :  { %s7948_s15 = smov [#allocation11]   ;;  %s7949_s17 = smov [#allocation14]  }
  0x28   :  { %s79_s16 = sshll.u32 %s7948_s15, 4  ;;  %s101_s18 = sshll.u32 %s7949_s17, 4  ;;  %s80_s16 = int_to_ptr.vmem [resolvable:$true] %s79_s16  ;;  %s8033_s18 = int_to_ptr.vmem [resolvable:$true] %s101_s18 }
  0x29   :  { %s7754_s22 = scalar_lea.hbm %s8291_s5, 16384 }
  0x2a   :  { %p7755_p2 = scmp.ne.s32.totalorder %s8291_s5, %s7754_s22  ;;  %p7758_p3 = scmp.lt.u32.totalorder %s7754_s22, %s8291_s5 }
  0x2c   :  { %p7760_p4 = pnand %p7758_p3, %p7755_p2 }
  0x2e   :  { %7763 = shalt.err (!%p7760_p4)
}
  0x2f   :  { %s7764_s3 = scalar_lea.vmem %s80_s16, 16384  ;;  %p7769_p6 = scmp.lt.s32.totalorder %s80_s16, %s80_s16 }
  0x30   :  { %p7765_p5 = scmp.ne.s32.totalorder %s80_s16, %s7764_s3  ;;  %p7770_p7 = scmp.lt.s32.totalorder %s7764_s3, %s7764_s3 }
  0x32   :  { %p7771_p8 = por %p7770_p7, %p7769_p6 }
  0x34   :  { %p7772_p9 = pnand %p7771_p8, %p7765_p5 }
  0x36   :  { %7775 = shalt.err (!%p7772_p9)
}
  0x37   :  { %85 = dma.hbm_to_vmem [thread:$0]  %s8291_s5, 16384, %s80_s16, [#allocation12], %s7946_s1, %s7946_s1, %s7947_s10  }
  0x38   :  { %s7776_s11 = scalar_lea.hbm %s8293_s7, 4096 }
  0x39   :  { %p7777_p10 = scmp.ne.s32.totalorder %s8293_s7, %s7776_s11  ;;  %p7780_p11 = scmp.lt.u32.totalorder %s7776_s11, %s8293_s7 }
  0x3b   :  { %p7782_p12 = pnand %p7780_p11, %p7777_p10 }
  0x3d   :  { %7785 = shalt.err (!%p7782_p12)
}
  0x3e   :  { %s7786_s17 = scalar_lea.vmem %s8033_s18, 4096  ;;  %p7791_p0 = scmp.lt.s32.totalorder %s8033_s18, %s8033_s18 }
  0x3f   :  { %p7787_p13 = scmp.ne.s32.totalorder %s8033_s18, %s7786_s17  ;;  %p7792_p1 = scmp.lt.s32.totalorder %s7786_s17, %s7786_s17 }
  0x41   :  { %p7793_p2 = por %p7792_p1, %p7791_p0 }
  0x43   :  { %p7794_p3 = pnand %p7793_p2, %p7787_p13 }
  0x45   :  { %7797 = shalt.err (!%p7794_p3)
}
  0x46   :  { %s7950_s5 = smov 4   ;;  %s7951_s16 = smov [#allocation2]  }
  0x47   :  { %107 = dma.hbm_to_vmem [thread:$0]  %s8293_s7, 4096, %s8033_s18, [#allocation15], %s7944_s20, %s7944_s20, %s7950_s5  }
  0x48   :  { %s26_s19 = sshll.u32 %s7951_s16, 4  ;;  %s7952_s21 = smov [#allocation7]   ;;  %s27_s19 = int_to_ptr.vmem [resolvable:$true] %s26_s19 }
  0x49   :  { %s48_s22 = sshll.u32 %s7952_s21, 4  ;;  %s7798_s26 = scalar_lea.hbm %s8286_s0, 128  ;;  %s49_s22 = int_to_ptr.vmem [resolvable:$true] %s48_s22 }
  0x4a   :  { %p7799_p4 = scmp.ne.s32.totalorder %s8286_s0, %s7798_s26  ;;  %p7802_p5 = scmp.lt.u32.totalorder %s7798_s26, %s8286_s0 }
  0x4c   :  { %p7804_p6 = pnand %p7802_p5, %p7799_p4 }
  0x4e   :  { %7807 = shalt.err (!%p7804_p6)
}
  0x4f   :  { %s7808_s7 = scalar_lea.vmem %s27_s19, 128  ;;  %p7813_p8 = scmp.lt.s32.totalorder %s27_s19, %s27_s19 }
  0x50   :  { %p7809_p7 = scmp.ne.s32.totalorder %s27_s19, %s7808_s7  ;;  %p7814_p9 = scmp.lt.s32.totalorder %s7808_s7, %s7808_s7 }
  0x52   :  { %p7815_p10 = por %p7814_p9, %p7813_p8 }
  0x54   :  { %p7816_p11 = pnand %p7815_p10, %p7809_p7 }
  0x56   :  { %7819 = shalt.err (!%p7816_p11)
}
  0x57   :  { %29 = dma.hbm_to_vmem [thread:$0]  %s8286_s0, 128, %s27_s19, [#allocation3]  }
  0x58   :  { %s7820_s11 = scalar_lea.hbm %s8288_s2, 256 }
  0x59   :  { %p7821_p12 = scmp.ne.s32.totalorder %s8288_s2, %s7820_s11  ;;  %p7824_p13 = scmp.lt.u32.totalorder %s7820_s11, %s8288_s2 }
  0x5b   :  { %p7826_p0 = pnand %p7824_p13, %p7821_p12 }
  0x5d   :  { %7829 = shalt.err (!%p7826_p0)
}
  0x5e   :  { %s7830_s17 = scalar_lea.vmem %s49_s22, 256  ;;  %p7835_p2 = scmp.lt.s32.totalorder %s49_s22, %s49_s22 }
  0x5f   :  { %p7831_p1 = scmp.ne.s32.totalorder %s49_s22, %s7830_s17  ;;  %p7836_p3 = scmp.lt.s32.totalorder %s7830_s17, %s7830_s17 }
  0x61   :  { %p7837_p4 = por %p7836_p3, %p7835_p2 }
  0x63   :  { %p7838_p5 = pnand %p7837_p4, %p7831_p1 }
  0x65   :  { %7841 = shalt.err (!%p7838_p5)
}
  0x66   :  { %51 = dma.hbm_to_vmem [thread:$0]  %s8288_s2, 256, %s49_s22, [#allocation6]  }
  0x67   :  { %s7953_s1 = smov [#allocation10]   ;;  %s7954_s16 = smov [#allocation13]  }
  0x68   :  { %s70_s10 = sshll.u32 %s7953_s1, 4  ;;  %s92_s19 = sshll.u32 %s7954_s16, 4  ;;  %s71_s10 = int_to_ptr.vmem [resolvable:$true] %s70_s10  ;;  %s93_s19 = int_to_ptr.vmem [resolvable:$true] %s92_s19 }
  0x69   :  { %s7842_s25 = scalar_lea.hbm %s8290_s4, 64 }
  0x6a   :  { %p7843_p6 = scmp.ne.s32.totalorder %s8290_s4, %s7842_s25  ;;  %p7846_p7 = scmp.lt.u32.totalorder %s7842_s25, %s8290_s4 }
  0x6c   :  { %p7848_p8 = pnand %p7846_p7, %p7843_p6 }
  0x6e   :  { %7851 = shalt.err (!%p7848_p8)
}
  0x6f   :  { %s7852_s2 = scalar_lea.vmem %s71_s10, 64  ;;  %p7857_p10 = scmp.lt.s32.totalorder %s71_s10, %s71_s10 }
  0x70   :  { %p7853_p9 = scmp.ne.s32.totalorder %s71_s10, %s7852_s2  ;;  %p7858_p11 = scmp.lt.s32.totalorder %s7852_s2, %s7852_s2 }
  0x72   :  { %p7859_p12 = por %p7858_p11, %p7857_p10 }
  0x74   :  { %p7860_p13 = pnand %p7859_p12, %p7853_p9 }
  0x76   :  { %7863 = shalt.err (!%p7860_p13)
}
  0x77   :  { %73 = dma.hbm_to_vmem [thread:$0]  %s8290_s4, 64, %s71_s10, [#allocation9]  }
  0x78   :  { %s7864_s18 = scalar_lea.hbm %s8292_s6, 64 }
  0x79   :  { %p7865_p0 = scmp.ne.s32.totalorder %s8292_s6, %s7864_s18  ;;  %p7868_p1 = scmp.lt.u32.totalorder %s7864_s18, %s8292_s6 }
  0x7b   :  { %p7870_p2 = pnand %p7868_p1, %p7865_p0 }
  0x7d   :  { %7873 = shalt.err (!%p7870_p2)
}
  0x7e   :  { %s7874_s13 = scalar_lea.vmem %s93_s19, 64  ;;  %p7879_p4 = scmp.lt.s32.totalorder %s93_s19, %s93_s19 }
  0x7f   :  { %p7875_p3 = scmp.ne.s32.totalorder %s93_s19, %s7874_s13  ;;  %p7880_p5 = scmp.lt.s32.totalorder %s7874_s13, %s7874_s13 }
  0x81   :  { %p7881_p6 = por %p7880_p5, %p7879_p4 }
  0x83   :  { %p7882_p7 = pnand %p7881_p6, %p7875_p3 }
  0x85   :  { %7885 = shalt.err (!%p7882_p7)
}
  0x86   :  { %95 = dma.hbm_to_vmem [thread:$0]  %s8292_s6, 64, %s93_s19, [#allocation12]  }
  0x87   :  { %s7955_s15 = smov [#allocation16]   ;;  %s7886_s1 = scalar_lea.hbm %s8294_s8, 16 }
  0x88   :  { %s114_s17 = sshll.u32 %s7955_s15, 4  ;;  %p7887_p8 = scmp.ne.s32.totalorder %s8294_s8, %s7886_s1  ;;  %s115_s17 = int_to_ptr.vmem [resolvable:$true] %s114_s17 }
  0x89   :  { %p7890_p9 = scmp.lt.u32.totalorder %s7886_s1, %s8294_s8 }
  0x8b   :  { %p7892_p10 = pnand %p7890_p9, %p7887_p8 }
  0x8d   :  { %7895 = shalt.err (!%p7892_p10)
}
  0x8e   :  { %s7896_s25 = scalar_lea.vmem %s115_s17, 16  ;;  %s7900_s6 = scalar_lea.vmem %s115_s17, 32 }
  0x8f   :  { %p7897_p11 = scmp.ne.s32.totalorder %s115_s17, %s7896_s25  ;;  %p7901_p12 = scmp.lt.s32.totalorder %s115_s17, %s115_s17 }
  0x90   :  { %p7902_p13 = scmp.lt.s32.totalorder %s7900_s6, %s7896_s25 }
  0x92   :  { %p7903_p0 = por %p7902_p13, %p7901_p12 }
  0x94   :  { %p7904_p1 = pnand %p7903_p0, %p7897_p11 }
  0x96   :  { %7907 = shalt.err (!%p7904_p1)
}
  0x97   :  { %117 = dma.hbm_to_vmem [thread:$0]  %s8294_s8, 16, %s115_s17, [#allocation15]  }
  0x98   :  { %7930 = dma.done.wait [#allocation3], 128  }
  0x99   :  { %7931 = vsyncadd [#allocation3], 4294967168 }
  0x9a   :  { %7932 = dma.done.wait [#allocation6], 4352  }
  0x9b   :  { %7933 = vsyncadd [#allocation6], 4294962944 }
  0x9c   :  { %7934 = dma.done.wait [#allocation9], 65600  }
  0x9d   :  { %7935 = vsyncadd [#allocation9], 4294901696 }
  0x9e   :  { %7936 = dma.done.wait [#allocation12], 16448  }
  0x9f   :  { %7937 = vsyncadd [#allocation12], 4294950848 }
  0xa0   :  { %7938 = dma.done.wait [#allocation15], 4112  }
  0xa1   :  { %7939 = vsyncadd [#allocation15], 4294963184  ;;  %v7956_v0 = vmov 0   ;;  %v148_v1 = vld [vmem:[#allocation5] sm:$0xff]  ;;  %v149_v7 = vld [vmem:[#allocation5 + $0x8] sm:$0xff]  ;;  %vm424_vm0 = vcmask 261120  }
  0xa2   :  { %460 = vmatprep.mubr.bf16.mxu0 %v7956_v0  ;;  %501 = vmatprep.mubr.bf16.mxu1 %v7956_v0  ;;  %v156_v2 = vld [vmem:[#allocation5 + $0x40] sm:$0xff]  ;;  %v157_v9 = vld [vmem:[#allocation5 + $0x48] sm:$0xff]  ;;  %v150_v15 = vld [vmem:[#allocation5 + $0x10] sm:$0xff]  ;;  %s7957_s8 = smov [#allocation17]  }
  0xa3   :  { %v164_v3 = vld [vmem:[#allocation5 + $0x80] sm:$0xff]  ;;  %v5872_v4 = vcombine.high %v148_v1, %v156_v2  ;;  %v5871_v5 = vcombine.low %v148_v1, %v156_v2  ;;  %v165_v10 = vld [vmem:[#allocation5 + $0x88] sm:$0xff]  ;;  %v5874_v12 = vcombine.high %v149_v7, %v157_v9  ;;  %v5873_v13 = vcombine.low %v149_v7, %v157_v9  ;;  %v158_v16 = vld [vmem:[#allocation5 + $0x50] sm:$0xff]  ;;  %s5858_s27 = sshll.u32 %s7957_s8, 4  ;;  %s5859_s27 = int_to_ptr.vmem [resolvable:$true] %s5858_s27 }
  0xa4   :  { %v172_v6 = vld [vmem:[#allocation5 + $0xc0] sm:$0xff]  ;;  %v173_v11 = vld [vmem:[#allocation5 + $0xc8] sm:$0xff]  ;;  %v146_v18 = vld [vmem:[#allocation2] sm:$0xff]  ;;  %v5876_v21 = vcombine.high %v150_v15, %v158_v16  ;;  %v5875_v27 = vcombine.low %v150_v15, %v158_v16  ;;  %s7908_s3 = scalar_lea.vmem %s5859_s27, 128  ;;  %p7913_p3 = scmp.lt.s32.totalorder %s5859_s27, %s5859_s27 }
  0xa5   :  { %v5888_v8 = vcombine.high %v164_v3, %v172_v6  ;;  %428 = vmatprep.subr.bf16.mxu0 %v5872_v4  ;;  %v5890_v14 = vcombine.high %v165_v10, %v173_v11  ;;  %v5887_v17 = vcombine.low %v164_v3, %v172_v6  ;;  %v151_v19 = vld [vmem:[#allocation5 + $0x18] sm:$0xff]  ;;  %469 = vmatprep.subr.bf16.mxu1 %v5874_v12  ;;  %v166_v23 = vld [vmem:[#allocation5 + $0x90] sm:$0xff]  ;;  %v152_v32 = vld [vmem:[#allocation5 + $0x20] sm:$0xff]  ;;  %p7909_p2 = scmp.ne.s32.totalorder %s5859_s27, %s7908_s3  ;;  %p7914_p4 = scmp.lt.s32.totalorder %s7908_s3, %s7908_s3 }
  0xa6   :  { %429 = vmatpush1.bf16.msra.mxu0 %v5871_v5  ;;  %v159_v20 = vld [vmem:[#allocation5 + $0x58] sm:$0xff]  ;;  %470 = vmatpush1.bf16.msra.mxu1 %v5873_v13  ;;  %v5889_v22 = vcombine.low %v165_v10, %v173_v11  ;;  %v174_v24 = vld [vmem:[#allocation5 + $0xd0] sm:$0xff]  ;;  %v8128_v25 = vpack.c.bf16 %v146_v18, %v146_v18  ;;  %v160_v33 = vld [vmem:[#allocation5 + $0x60] sm:$0xff] }
  0xa7   :  { %430 = vmatprep.subr.bf16.mxu0 %v5888_v8  ;;  %471 = vmatprep.subr.bf16.mxu1 %v5890_v14  ;;  %v5878_v26 = vcombine.high %v151_v19, %v159_v20  ;;  %v167_v28 = vld [vmem:[#allocation5 + $0x98] sm:$0xff]  ;;  %v5892_v30 = vcombine.high %v166_v23, %v174_v24  ;;  %v5877_v31 = vcombine.low %v151_v19, %v159_v20  ;;  %v153_v35 = vld [vmem:[#allocation5 + $0x28] sm:$0xff]  ;;  %v168_v40 = vld [vmem:[#allocation5 + $0xa0] sm:$0xff]  ;;  %p7915_p5 = por %p7914_p4, %p7913_p3 }
  0xa8   :  { %v175_v29 = vld [vmem:[#allocation5 + $0xd8] sm:$0xff]  ;;  %v5891_v36 = vcombine.low %v166_v23, %v174_v24  ;;  %v161_v37 = vld [vmem:[#allocation5 + $0x68] sm:$0xff]  ;;  %v5880_v38 = vcombine.high %v152_v32, %v160_v33  ;;  %v176_v41 = vld [vmem:[#allocation5 + $0xe0] sm:$0xff]  ;;  %v5879_v44 = vcombine.low %v152_v32, %v160_v33 }
  0xa9   :  { %v5894_v34 = vcombine.high %v167_v28, %v175_v29  ;;  %v5893_v39 = vcombine.low %v167_v28, %v175_v29  ;;  %v5882_v42 = vcombine.high %v153_v35, %v161_v37  ;;  %v169_v43 = vld [vmem:[#allocation5 + $0xa8] sm:$0xff]  ;;  %v5896_v46 = vcombine.high %v168_v40, %v176_v41  ;;  %v154_v48 = vld [vmem:[#allocation5 + $0x30] sm:$0xff]  ;;  %v155_v51 = vld [vmem:[#allocation5 + $0x38] sm:$0xff]  ;;  %p7916_p6 = pnand %p7915_p5, %p7909_p2 }
  0xaa   :  { %431 = vmatpush1.bf16.msra.mxu0 %v5887_v17  ;;  %472 = vmatpush1.bf16.msra.mxu1 %v5889_v22  ;;  %v177_v45 = vld [vmem:[#allocation5 + $0xe8] sm:$0xff]  ;;  %v5881_v47 = vcombine.low %v153_v35, %v161_v37  ;;  %v162_v49 = vld [vmem:[#allocation5 + $0x70] sm:$0xff]  ;;  %v5895_v52 = vcombine.low %v168_v40, %v176_v41  ;;  %v163_v53 = vld [vmem:[#allocation5 + $0x78] sm:$0xff] }
  0xab   :  { %510 = vmatprep.subr.bf16.mxu0 %v5876_v21  ;;  %551 = vmatprep.subr.bf16.mxu1 %v5878_v26  ;;  %v5898_v50 = vcombine.high %v169_v43, %v177_v45  ;;  %v5884_v54 = vcombine.high %v154_v48, %v162_v49  ;;  %v5897_v55 = vcombine.low %v169_v43, %v177_v45  ;;  %v170_v56 = vld [vmem:[#allocation5 + $0xb0] sm:$0xff]  ;;  %v171_v59 = vld [vmem:[#allocation5 + $0xb8] sm:$0xff] }
  0xac   :  { %v178_v57 = vld [vmem:[#allocation5 + $0xf0] sm:$0xff]  ;;  %v5886_v58 = vcombine.high %v155_v51, %v163_v53  ;;  %v5883_v60 = vcombine.low %v154_v48, %v162_v49  ;;  %v179_v61 = vld [vmem:[#allocation5 + $0xf8] sm:$0xff]  ;;  %v5885_v63 = vcombine.low %v155_v51, %v163_v53 }
  0xad   :  { %5903 = vmatmul.mubr.msk.bf16.vlgmr.msra.gmra.mrb[0].mxu0 %vm424_vm0, %v8128_v25  ;;  %5904 = vmatmul.mubr.msk.bf16.vlgmr.msra.gmra.mrb[0].mxu1 %vm424_vm0, %v8128_v25  ;;  %v5900_v62 = vcombine.high %v170_v56, %v178_v57  ;;  %v5902_v1 = vcombine.high %v171_v59, %v179_v61  ;;  %v5899_v2 = vcombine.low %v170_v56, %v178_v57  ;;  %v6718_v3 = vld [vmem:[#allocation8 + $0x4] ss:$16 sps:$4 sm:$0xff]   ;;  %v6721_v5 = vld [vmem:[#allocation8 + $0xc] ss:$16 sps:$4 sm:$0xff]   ;;  %v6716_v6 = vld [vmem:[#allocation8] ss:$16 sps:$4 sm:$0xff]  }
  0xae   :  { %511 = vmatpush1.bf16.msra.mxu0 %v5875_v27  ;;  %542 = vmatprep.mubr.bf16.mxu0 %v7956_v0  ;;  %v5901_v4 = vcombine.low %v171_v59, %v179_v61  ;;  %v6724_v7 = vld [vmem:[#allocation8 + $0x24] ss:$16 sps:$4 sm:$0xff]   ;;  %v6719_v8 = vld [vmem:[#allocation8 + $0x8] ss:$16 sps:$4 sm:$0xff]   ;;  %v6727_v9 = vld [vmem:[#allocation8 + $0x2c] ss:$16 sps:$4 sm:$0xff]  }
  0xaf   :  { %512 = vmatprep.subr.bf16.mxu0 %v5892_v30  ;;  %552 = vmatpush1.bf16.msra.mxu1 %v5877_v31  ;;  %v6722_v10 = vld [vmem:[#allocation8 + $0x20] ss:$16 sps:$4 sm:$0xff]   ;;  %v6725_v11 = vld [vmem:[#allocation8 + $0x28] ss:$16 sps:$4 sm:$0xff]   ;;  %v6733_v12 = vld [vmem:[#allocation8 + $0x4c] ss:$16 sps:$4 sm:$0xff]  }
  0xb0   :  { %583 = vmatprep.mubr.bf16.mxu1 %v7956_v0  ;;  %553 = vmatprep.subr.bf16.mxu1 %v5894_v34  ;;  %v6728_v13 = vld [vmem:[#allocation8 + $0x40] ss:$16 sps:$4 sm:$0xff]   ;;  %v6736_v14 = vld [vmem:[#allocation8 + $0x64] ss:$16 sps:$4 sm:$0xff]   ;;  %v6731_v15 = vld [vmem:[#allocation8 + $0x48] ss:$16 sps:$4 sm:$0xff]  }
  0xb1   :  { %v6739_v16 = vld [vmem:[#allocation8 + $0x6c] ss:$16 sps:$4 sm:$0xff]   ;;  %v6734_v17 = vld [vmem:[#allocation8 + $0x60] ss:$16 sps:$4 sm:$0xff]   ;;  %v6742_v18 = vld [vmem:[#allocation8 + $0x84] ss:$16 sps:$4 sm:$0xff]  }
  0xb2   :  { %513 = vmatpush1.bf16.msra.mxu0 %v5891_v36  ;;  %v6737_v19 = vld [vmem:[#allocation8 + $0x68] ss:$16 sps:$4 sm:$0xff]   ;;  %v6740_v20 = vld [vmem:[#allocation8 + $0x80] ss:$16 sps:$4 sm:$0xff]   ;;  %v6745_v21 = vld [vmem:[#allocation8 + $0x8c] ss:$16 sps:$4 sm:$0xff]  }
  0xb3   :  { %592 = vmatprep.subr.bf16.mxu0 %v5880_v38  ;;  %554 = vmatpush1.bf16.msra.mxu1 %v5893_v39  ;;  %v6743_v22 = vld [vmem:[#allocation8 + $0x88] ss:$16 sps:$4 sm:$0xff]   ;;  %v6748_v23 = vld [vmem:[#allocation8 + $0xa4] ss:$16 sps:$4 sm:$0xff]   ;;  %v6751_v24 = vld [vmem:[#allocation8 + $0xac] ss:$16 sps:$4 sm:$0xff]  }
  0xb4   :  { %633 = vmatprep.subr.bf16.mxu1 %v5882_v42  ;;  %v6754_v26 = vld [vmem:[#allocation8 + $0xc4] ss:$16 sps:$4 sm:$0xff]   ;;  %v6749_v27 = vld [vmem:[#allocation8 + $0xa8] ss:$16 sps:$4 sm:$0xff]   ;;  %v6757_v28 = vld [vmem:[#allocation8 + $0xcc] ss:$16 sps:$4 sm:$0xff]  }
  0xb5   :  { %5905 = vmatmul.mubr.msk.bf16.vlgmr.msra.gmra.mrb[4].mxu0 %vm424_vm0, %v8128_v25  ;;  %v6752_v29 = vld [vmem:[#allocation8 + $0xc0] ss:$16 sps:$4 sm:$0xff]   ;;  %v6760_v30 = vld [vmem:[#allocation8 + $0xe4] ss:$16 sps:$4 sm:$0xff]   ;;  %v6755_v31 = vld [vmem:[#allocation8 + $0xc8] ss:$16 sps:$4 sm:$0xff]  }
  0xb6   :  { %593 = vmatpush1.bf16.msra.mxu0 %v5879_v44  ;;  %624 = vmatprep.mubr.bf16.mxu0 %v7956_v0  ;;  %v6763_v32 = vld [vmem:[#allocation8 + $0xec] ss:$16 sps:$4 sm:$0xff]   ;;  %v6758_v33 = vld [vmem:[#allocation8 + $0xe0] ss:$16 sps:$4 sm:$0xff]   ;;  %v6766_v34 = vld [vmem:[#allocation8 + $0x104] ss:$16 sps:$4 sm:$0xff]  }
  0xb7   :  { %5906 = vmatmul.mubr.msk.bf16.vlgmr.msra.gmra.mrb[4].mxu1 %vm424_vm0, %v8128_v25  ;;  %594 = vmatprep.subr.bf16.mxu0 %v5896_v46  ;;  %v6761_v35 = vld [vmem:[#allocation8 + $0xe8] ss:$16 sps:$4 sm:$0xff]   ;;  %v6769_v36 = vld [vmem:[#allocation8 + $0x10c] ss:$16 sps:$4 sm:$0xff]   ;;  %v6764_v37 = vld [vmem:[#allocation8 + $0x100] ss:$16 sps:$4 sm:$0xff]  }
  0xb8   :  { %634 = vmatpush1.bf16.msra.mxu1 %v5881_v47  ;;  %665 = vmatprep.mubr.bf16.mxu1 %v7956_v0  ;;  %v6772_v38 = vld [vmem:[#allocation8 + $0x124] ss:$16 sps:$4 sm:$0xff]   ;;  %v6767_v39 = vld [vmem:[#allocation8 + $0x108] ss:$16 sps:$4 sm:$0xff]   ;;  %v6775_v40 = vld [vmem:[#allocation8 + $0x12c] ss:$16 sps:$4 sm:$0xff]  }
  0xb9   :  { %635 = vmatprep.subr.bf16.mxu1 %v5898_v50  ;;  %v6770_v41 = vld [vmem:[#allocation8 + $0x120] ss:$16 sps:$4 sm:$0xff]   ;;  %v6778_v42 = vld [vmem:[#allocation8 + $0x144] ss:$16 sps:$4 sm:$0xff]   ;;  %v6773_v43 = vld [vmem:[#allocation8 + $0x128] ss:$16 sps:$4 sm:$0xff]  }
  0xba   :  { %595 = vmatpush1.bf16.msra.mxu0 %v5895_v52  ;;  %v6781_v44 = vld [vmem:[#allocation8 + $0x14c] ss:$16 sps:$4 sm:$0xff]   ;;  %v6776_v45 = vld [vmem:[#allocation8 + $0x140] ss:$16 sps:$4 sm:$0xff]   ;;  %v6784_v46 = vld [vmem:[#allocation8 + $0x164] ss:$16 sps:$4 sm:$0xff]  }
  0xbb   :  { %674 = vmatprep.subr.bf16.mxu0 %v5884_v54  ;;  %v6779_v47 = vld [vmem:[#allocation8 + $0x148] ss:$16 sps:$4 sm:$0xff]   ;;  %v6787_v48 = vld [vmem:[#allocation8 + $0x16c] ss:$16 sps:$4 sm:$0xff]   ;;  %v6782_v49 = vld [vmem:[#allocation8 + $0x160] ss:$16 sps:$4 sm:$0xff]  }
  0xbc   :  { %636 = vmatpush1.bf16.msra.mxu1 %v5897_v55  ;;  %v6790_v50 = vld [vmem:[#allocation8 + $0x184] ss:$16 sps:$4 sm:$0xff]   ;;  %v6785_v51 = vld [vmem:[#allocation8 + $0x168] ss:$16 sps:$4 sm:$0xff]   ;;  %v6793_v52 = vld [vmem:[#allocation8 + $0x18c] ss:$16 sps:$4 sm:$0xff]  }
  0xbd   :  { %5907 = vmatmul.mubr.msk.bf16.vlgmr.msra.gmra.mrb[8].mxu0 %vm424_vm0, %v8128_v25  ;;  %715 = vmatprep.subr.bf16.mxu1 %v5886_v58  ;;  %v6788_v53 = vld [vmem:[#allocation8 + $0x180] ss:$16 sps:$4 sm:$0xff]   ;;  %v6796_v54 = vld [vmem:[#allocation8 + $0x1a4] ss:$16 sps:$4 sm:$0xff]   ;;  %v6791_v55 = vld [vmem:[#allocation8 + $0x188] ss:$16 sps:$4 sm:$0xff]  }
  0xbe   :  { %675 = vmatpush1.bf16.msra.mxu0 %v5883_v60  ;;  %706 = vmatprep.mubr.bf16.mxu0 %v7956_v0  ;;  %v6799_v56 = vld [vmem:[#allocation8 + $0x1ac] ss:$16 sps:$4 sm:$0xff]   ;;  %v6794_v57 = vld [vmem:[#allocation8 + $0x1a0] ss:$16 sps:$4 sm:$0xff]   ;;  %v6797_v58 = vld [vmem:[#allocation8 + $0x1a8] ss:$16 sps:$4 sm:$0xff]  }
  0xbf   :  { %5908 = vmatmul.mubr.msk.bf16.vlgmr.msra.gmra.mrb[8].mxu1 %vm424_vm0, %v8128_v25  ;;  %676 = vmatprep.subr.bf16.mxu0 %v5900_v62  ;;  %v6802_v59 = vld [vmem:[#allocation8 + $0x1c4] ss:$16 sps:$4 sm:$0xff]   ;;  %v6805_v60 = vld [vmem:[#allocation8 + $0x1cc] ss:$16 sps:$4 sm:$0xff]   ;;  %v6800_v61 = vld [vmem:[#allocation8 + $0x1c0] ss:$16 sps:$4 sm:$0xff]  }
  0xc0   :  { %716 = vmatpush1.bf16.msra.mxu1 %v5885_v63  ;;  %747 = vmatprep.mubr.bf16.mxu1 %v7956_v0  ;;  %v6730_v0 = vld [vmem:[#allocation8 + $0x44] ss:$16 sps:$4 sm:$0xff]   ;;  %v6803_v62 = vld [vmem:[#allocation8 + $0x1c8] ss:$16 sps:$4 sm:$0xff]  }
  0xc1   :  { %717 = vmatprep.subr.bf16.mxu1 %v5902_v1  ;;  %v6808_v63 = vld [vmem:[#allocation8 + $0x1e4] ss:$16 sps:$4 sm:$0xff]   ;;  %v6811_v1 = vld [vmem:[#allocation8 + $0x1ec] ss:$16 sps:$4 sm:$0xff]  }
  0xc2   :  { %677 = vmatpush1.bf16.msra.mxu0 %v5899_v2  ;;  %v6806_v2 = vld [vmem:[#allocation8 + $0x1e0] ss:$16 sps:$4 sm:$0xff]  }
  0xc3   :  { %3882 = vmatprep.subr.bf16.mxu0 %v6718_v3  ;;  %v6809_v3 = vld [vmem:[#allocation8 + $0x1e8] ss:$16 sps:$4 sm:$0xff]  }
  0xc4   :  { %718 = vmatpush1.bf16.msra.mxu1 %v5901_v4  ;;  %v6814_v4 = vld [vmem:[#allocation8 + $0x204] ss:$16 sps:$4 sm:$0xff]  }
  0xc5   :  { %5909 = vmatmul.mubr.msk.bf16.vlgmr.msra.gmra.mrb[12].mxu0 %vm424_vm0, %v8128_v25  ;;  %4210 = vmatprep.subr.bf16.mxu1 %v6721_v5  ;;  %v6817_v5 = vld [vmem:[#allocation8 + $0x20c] ss:$16 sps:$4 sm:$0xff]  }
  0xc6   :  { %3883 = vmatpush1.bf16.msra.mxu0 %v6716_v6  ;;  %v184_v6 = vlaneseq }
  0xc7   :  { %5910 = vmatmul.mubr.msk.bf16.vlgmr.msra.gmra.mrb[12].mxu1 %vm424_vm0, %v8128_v25  ;;  %3884 = vmatprep.subr.bf16.mxu0 %v6724_v7  ;;  %v6746_v25 = vld [vmem:[#allocation8 + $0xa0] ss:$16 sps:$4 sm:$0xff]  }
  0xc8   :  { %4211 = vmatpush1.bf16.msra.mxu1 %v6719_v8  ;;  %v8152_v7 = vshrl.u32 %v184_v6, 7  ;;  %v6850_v6 = vld [vmem:[#allocation8 + $0x2c4] ss:$16 sps:$4 sm:$0xff]  }
  0xc9   :  { %4212 = vmatprep.subr.bf16.mxu1 %v6727_v9  ;;  %v8157_v9 = vld [vmem:[#allocation7] sm:$0xff] }
  0xca   :  { %3885 = vmatpush1.bf16.msra.mxu0 %v6722_v10  ;;  %v8155_v8 = vsub.s32 0, %v8152_v7  ;;  %v8160_v10 = vsub.s32 1, %v8152_v7 }
  0xcb   :  { %3886 = vmatprep.subr.bf16.mxu0 %v6730_v0  ;;  %v8163_v0 = vsub.s32 3, %v8152_v7 }
  0xcc   :  { %4213 = vmatpush1.bf16.msra.mxu1 %v6725_v11  ;;  %v187_v11 = vrot.slane %v8157_v9, %v8155_v8 }
  0xcd   :  { %4214 = vmatprep.subr.bf16.mxu1 %v6733_v12  ;;  %v191_v12 = vrot.slane %v8157_v9, %v8160_v10 }
  0xce   :  { %3887 = vmatpush1.bf16.msra.mxu0 %v6728_v13 }
  0xcf   :  { %3888 = vmatprep.subr.bf16.mxu0 %v6736_v14  ;;  %v199_v14 = vrot.slane %v8157_v9, %v8163_v0 }
  0xd0   :  { %4215 = vmatpush1.bf16.msra.mxu1 %v6731_v15 }
  0xd1   :  { %4216 = vmatprep.subr.bf16.mxu1 %v6739_v16 }
  0xd2   :  { %3889 = vmatpush1.bf16.msra.mxu0 %v6734_v17 }
  0xd3   :  { %3890 = vmatprep.subr.bf16.mxu0 %v6742_v18 }
  0xd4   :  { %4217 = vmatpush1.bf16.msra.mxu1 %v6737_v19 }
  0xd5   :  { %4218 = vmatprep.subr.bf16.mxu1 %v6745_v21 }
  0xd6   :  { %3891 = vmatpush1.bf16.msra.mxu0 %v6740_v20 }
  0xd7   :  { %3892 = vmatprep.subr.bf16.mxu0 %v6748_v23 }
  0xd8   :  { %4219 = vmatpush1.bf16.msra.mxu1 %v6743_v22 }
  0xd9   :  { %4220 = vmatprep.subr.bf16.mxu1 %v6751_v24  ;;  %v6812_v24 = vld [vmem:[#allocation8 + $0x200] ss:$16 sps:$4 sm:$0xff]  }
  0xda   :  { %3893 = vmatpush1.bf16.msra.mxu0 %v6746_v25  ;;  %v6815_v25 = vld [vmem:[#allocation8 + $0x208] ss:$16 sps:$4 sm:$0xff]  }
  0xdb   :  { %3894 = vmatprep.subr.bf16.mxu0 %v6754_v26 }
  0xdc   :  { %4221 = vmatpush1.bf16.msra.mxu1 %v6749_v27 }
  0xdd   :  { %4222 = vmatprep.subr.bf16.mxu1 %v6757_v28 }
  0xde   :  { %3895 = vmatpush1.bf16.msra.mxu0 %v6752_v29 }
  0xdf   :  { %3896 = vmatprep.subr.bf16.mxu0 %v6760_v30 }
  0xe0   :  { %4223 = vmatpush1.bf16.msra.mxu1 %v6755_v31 }
  0xe1   :  { %4224 = vmatprep.subr.bf16.mxu1 %v6763_v32  ;;  %v6820_v32 = vld [vmem:[#allocation8 + $0x224] ss:$16 sps:$4 sm:$0xff]  }
  0xe2   :  { %3897 = vmatpush1.bf16.msra.mxu0 %v6758_v33  ;;  %v6823_v33 = vld [vmem:[#allocation8 + $0x22c] ss:$16 sps:$4 sm:$0xff]  }
  0xe3   :  { %3898 = vmatprep.subr.bf16.mxu0 %v6766_v34 }
  0xe4   :  { %4225 = vmatpush1.bf16.msra.mxu1 %v6761_v35 }
  0xe5   :  { %4226 = vmatprep.subr.bf16.mxu1 %v6769_v36 }
  0xe6   :  { %3899 = vmatpush1.bf16.msra.mxu0 %v6764_v37  ;;  %v6818_v37 = vld [vmem:[#allocation8 + $0x220] ss:$16 sps:$4 sm:$0xff]  }
  0xe7   :  { %3900 = vmatprep.subr.bf16.mxu0 %v6772_v38  ;;  %v6821_v38 = vld [vmem:[#allocation8 + $0x228] ss:$16 sps:$4 sm:$0xff]  }
  0xe8   :  { %4227 = vmatpush1.bf16.msra.mxu1 %v6767_v39 }
  0xe9   :  { %4228 = vmatprep.subr.bf16.mxu1 %v6775_v40  ;;  %v6826_v40 = vld [vmem:[#allocation8 + $0x244] ss:$16 sps:$4 sm:$0xff]  }
  0xea   :  { %3901 = vmatpush1.bf16.msra.mxu0 %v6770_v41  ;;  %v6829_v41 = vld [vmem:[#allocation8 + $0x24c] ss:$16 sps:$4 sm:$0xff]  }
  0xeb   :  { %3902 = vmatprep.subr.bf16.mxu0 %v6778_v42 }
  0xec   :  { %4229 = vmatpush1.bf16.msra.mxu1 %v6773_v43  ;;  %v6824_v43 = vld [vmem:[#allocation8 + $0x240] ss:$16 sps:$4 sm:$0xff]  }
  0xed   :  { %4230 = vmatprep.subr.bf16.mxu1 %v6781_v44  ;;  %v6827_v44 = vld [vmem:[#allocation8 + $0x248] ss:$16 sps:$4 sm:$0xff]  }
  0xee   :  { %3903 = vmatpush1.bf16.msra.mxu0 %v6776_v45  ;;  %v6832_v45 = vld [vmem:[#allocation8 + $0x264] ss:$16 sps:$4 sm:$0xff]  }
  0xef   :  { %3904 = vmatprep.subr.bf16.mxu0 %v6784_v46  ;;  %v6835_v46 = vld [vmem:[#allocation8 + $0x26c] ss:$16 sps:$4 sm:$0xff]  }
  0xf0   :  { %4231 = vmatpush1.bf16.msra.mxu1 %v6779_v47 }
  0xf1   :  { %4232 = vmatprep.subr.bf16.mxu1 %v6787_v48  ;;  %v6830_v48 = vld [vmem:[#allocation8 + $0x260] ss:$16 sps:$4 sm:$0xff]  }
  0xf2   :  { %3905 = vmatpush1.bf16.msra.mxu0 %v6782_v49  ;;  %v6833_v49 = vld [vmem:[#allocation8 + $0x268] ss:$16 sps:$4 sm:$0xff]  }
  0xf3   :  { %3906 = vmatprep.subr.bf16.mxu0 %v6790_v50 }
  0xf4   :  { %4233 = vmatpush1.bf16.msra.mxu1 %v6785_v51  ;;  %v6838_v51 = vld [vmem:[#allocation8 + $0x284] ss:$16 sps:$4 sm:$0xff]  }
  0xf5   :  { %4234 = vmatprep.subr.bf16.mxu1 %v6793_v52  ;;  %v6841_v52 = vld [vmem:[#allocation8 + $0x28c] ss:$16 sps:$4 sm:$0xff]  }
  0xf6   :  { %3907 = vmatpush1.bf16.msra.mxu0 %v6788_v53 }
  0xf7   :  { %3908 = vmatprep.subr.bf16.mxu0 %v6796_v54  ;;  %v6836_v54 = vld [vmem:[#allocation8 + $0x280] ss:$16 sps:$4 sm:$0xff]  }
  0xf8   :  { %4235 = vmatpush1.bf16.msra.mxu1 %v6791_v55 }
  0xf9   :  { %4236 = vmatprep.subr.bf16.mxu1 %v6799_v56  ;;  %v202_v56 = vsub.s32 4, %v8152_v7 }
  0xfa   :  { %3909 = vmatpush1.bf16.msra.mxu0 %v6794_v57  ;;  %v6839_v57 = vld [vmem:[#allocation8 + $0x288] ss:$16 sps:$4 sm:$0xff]  }
  0xfb   :  { %3910 = vmatprep.subr.bf16.mxu0 %v6802_v59  ;;  %v6844_v59 = vld [vmem:[#allocation8 + $0x2a4] ss:$16 sps:$4 sm:$0xff]  }
  0xfc   :  { %4237 = vmatpush1.bf16.msra.mxu1 %v6797_v58  ;;  %v8182_v58 = vld [vmem:[#allocation7 + $0x8] sm:$0xff] }
  0xfd   :  { %4238 = vmatprep.subr.bf16.mxu1 %v6805_v60  ;;  %v6847_v60 = vld [vmem:[#allocation8 + $0x2ac] ss:$16 sps:$4 sm:$0xff]  }
  0xfe   :  { %3911 = vmatpush1.bf16.msra.mxu0 %v6800_v61  ;;  %v235_v61 = vrot.slane %v8182_v58, %v202_v56 }
  0xff   :  { %3912 = vmatprep.subr.bf16.mxu0 %v6808_v63 }
 0x100   :  { %4239 = vmatpush1.bf16.msra.mxu1 %v6803_v62  ;;  %v206_v62 = vsub.s32 5, %v8152_v7 }
 0x101   :  { %4240 = vmatprep.subr.bf16.mxu1 %v6811_v1 }
 0x102   :  { %3913 = vmatpush1.bf16.msra.mxu0 %v6806_v2  ;;  %v6842_v2 = vld [vmem:[#allocation8 + $0x2a0] ss:$16 sps:$4 sm:$0xff]  }
 0x103   :  { %3923 = vmatprep.subr.bf16.mxu0 %v6814_v4  ;;  %v239_v4 = vrot.slane %v8182_v58, %v206_v62 }
 0x104   :  { %4241 = vmatpush1.bf16.msra.mxu1 %v6809_v3  ;;  %v6845_v3 = vld [vmem:[#allocation8 + $0x2a8] ss:$16 sps:$4 sm:$0xff]  }
 0x105   :  { %4251 = vmatprep.subr.bf16.mxu1 %v6817_v5 }
 0x180   :  { %v462_v13 = vpop.f32.mrb[0].mxu0  ;;  %v8171_v19 = vpop.f32.mrb[0].mxu1 }
 0x181   :  { %v463_v15 = vadd.f32 %v462_v13, %v187_v11  ;;  %v464_v16 = vpop.f32.mrb[1].mxu0  ;;  %v505_v22 = vpop.f32.mrb[1].mxu1  ;;  %v6853_v11 = vld [vmem:[#allocation8 + $0x2cc] ss:$16 sps:$4 sm:$0xff]  }
 0x182   :  { %v465_v17 = vadd.f32 %v464_v16, %v191_v12  ;;  %v466_v18 = vpop.f32.mrb[2].mxu0  ;;  %v506_v26 = vadd.f32 %v505_v22, %v199_v14  ;;  %v507_v27 = vpop.f32.mrb[2].mxu1  ;;  %v6851_v16 = vld [vmem:[#allocation8 + $0x2c8] ss:$16 sps:$4 sm:$0xff]   ;;  %v6862_v22 = vld [vmem:[#allocation8 + $0x304] ss:$16 sps:$4 sm:$0xff]  }
 0x183   :  { %v756_v20 = vmax.f32 %v463_v15, 0.0  ;;  %v467_v21 = vpop.f32.mrb[3].mxu0  ;;  %v508_v28 = vpop.f32.mrb[3].mxu1  ;;  %v6848_v15 = vld [vmem:[#allocation8 + $0x2c0] ss:$16 sps:$4 sm:$0xff]  }
 0x184   :  { %v757_v23 = vmax.f32 %v465_v17, 0.0  ;;  %v759_v30 = vmax.f32 %v506_v26, 0.0  ;;  %v6856_v17 = vld [vmem:[#allocation8 + $0x2e4] ss:$16 sps:$4 sm:$0xff]   ;;  %v6859_v18 = vld [vmem:[#allocation8 + $0x2ec] ss:$16 sps:$4 sm:$0xff]  }
 0x185   :  { %v772_v31 = vpack.c.bf16 %v756_v20, %v756_v20  ;;  %v6854_v20 = vld [vmem:[#allocation8 + $0x2e0] ss:$16 sps:$4 sm:$0xff]   ;;  %v6857_v21 = vld [vmem:[#allocation8 + $0x2e8] ss:$16 sps:$4 sm:$0xff]   ;;  %v6868_v26 = vld [vmem:[#allocation8 + $0x324] ss:$16 sps:$4 sm:$0xff]  }
 0x186   :  { %v773_v29 = vpack.c.bf16 %v757_v23, %v757_v23  ;;  %v775_v34 = vpack.c.bf16 %v759_v30, %v759_v30  ;;  %v6865_v23 = vld [vmem:[#allocation8 + $0x30c] ss:$16 sps:$4 sm:$0xff]   ;;  %v6866_v28 = vld [vmem:[#allocation8 + $0x320] ss:$16 sps:$4 sm:$0xff]   ;;  %v6874_v30 = vld [vmem:[#allocation8 + $0x344] ss:$16 sps:$4 sm:$0xff]  }
 0x187   :  { %v6871_v27 = vld [vmem:[#allocation8 + $0x32c] ss:$16 sps:$4 sm:$0xff]  }
 0x188   :  { %3914 = vmatprep.mubr.bf16.mxu0 %v773_v29  ;;  %4242 = vmatprep.mubr.bf16.mxu1 %v773_v29  ;;  %v8173_v35 = vpop.f32.mrb[4].mxu0  ;;  %v6869_v29 = vld [vmem:[#allocation8 + $0x328] ss:$16 sps:$4 sm:$0xff]  }
 0x189   :  { %3915 = vmatmul.mubr.bf16.vlgmr.msra.gmra.mrb[16].mxu0 %v772_v31  ;;  %4243 = vmatmul.mubr.bf16.vlgmr.msra.gmra.mrb[16].mxu1 %v772_v31  ;;  %v8175_v36 = vpop.f32.mrb[5].mxu0  ;;  %v6877_v31 = vld [vmem:[#allocation8 + $0x34c] ss:$16 sps:$4 sm:$0xff]  }
 0x18a   :  { %3924 = vmatpush1.bf16.msra.mxu0 %v6812_v24  ;;  %4252 = vmatpush1.bf16.msra.mxu1 %v6815_v25  ;;  %v548_v39 = vpop.f32.mrb[6].mxu0  ;;  %v6860_v24 = vld [vmem:[#allocation8 + $0x300] ss:$16 sps:$4 sm:$0xff]   ;;  %v6863_v25 = vld [vmem:[#allocation8 + $0x308] ss:$16 sps:$4 sm:$0xff]  }
 0x18b   :  { %3925 = vmatprep.subr.bf16.mxu0 %v6820_v32  ;;  %4253 = vmatprep.subr.bf16.mxu1 %v6823_v33  ;;  %v549_v42 = vpop.f32.mrb[7].mxu0  ;;  %v6872_v32 = vld [vmem:[#allocation8 + $0x340] ss:$16 sps:$4 sm:$0xff]   ;;  %v6875_v33 = vld [vmem:[#allocation8 + $0x348] ss:$16 sps:$4 sm:$0xff]  }
 0x18c   :  { %3955 = vmatprep.mubr.bf16.mxu0 %v775_v34  ;;  %4283 = vmatprep.mubr.bf16.mxu1 %v775_v34  ;;  %v6880_v34 = vld [vmem:[#allocation8 + $0x364] ss:$16 sps:$4 sm:$0xff]   ;;  %v6881_v39 = vld [vmem:[#allocation8 + $0x368] ss:$16 sps:$4 sm:$0xff]   ;;  %v8196_v42 = vsub.s32 2, %v8152_v7 }
 0x18e   :  { %3926 = vmatpush1.bf16.msra.mxu0 %v6818_v37  ;;  %4254 = vmatpush1.bf16.msra.mxu1 %v6821_v38  ;;  %v6883_v37 = vld [vmem:[#allocation8 + $0x36c] ss:$16 sps:$4 sm:$0xff]   ;;  %v6878_v38 = vld [vmem:[#allocation8 + $0x360] ss:$16 sps:$4 sm:$0xff]  }
 0x18f   :  { %3927 = vmatprep.subr.bf16.mxu0 %v6826_v40  ;;  %4255 = vmatprep.subr.bf16.mxu1 %v6829_v41  ;;  %v6886_v40 = vld [vmem:[#allocation8 + $0x384] ss:$16 sps:$4 sm:$0xff]   ;;  %v6889_v41 = vld [vmem:[#allocation8 + $0x38c] ss:$16 sps:$4 sm:$0xff]  }
 0x190   :  { %v8177_v47 = vpop.f32.mrb[8].mxu0 }
 0x191   :  { %v8179_v50 = vpop.f32.mrb[9].mxu0 }
 0x192   :  { %3928 = vmatpush1.bf16.msra.mxu0 %v6824_v43  ;;  %4256 = vmatpush1.bf16.msra.mxu1 %v6827_v44  ;;  %v630_v53 = vpop.f32.mrb[10].mxu0  ;;  %v6884_v43 = vld [vmem:[#allocation8 + $0x380] ss:$16 sps:$4 sm:$0xff]   ;;  %v6887_v44 = vld [vmem:[#allocation8 + $0x388] ss:$16 sps:$4 sm:$0xff]  }
 0x193   :  { %3929 = vmatprep.subr.bf16.mxu0 %v6832_v45  ;;  %4257 = vmatprep.subr.bf16.mxu1 %v6835_v46  ;;  %v631_v55 = vpop.f32.mrb[11].mxu0  ;;  %v6892_v45 = vld [vmem:[#allocation8 + $0x3a4] ss:$16 sps:$4 sm:$0xff]   ;;  %v6895_v46 = vld [vmem:[#allocation8 + $0x3ac] ss:$16 sps:$4 sm:$0xff]  }
 0x194   :  { %v6901_v53 = vld [vmem:[#allocation8 + $0x3cc] ss:$16 sps:$4 sm:$0xff]   ;;  %v207_v55 = vrot.slane %v8157_v9, %v206_v62  ;;  %v6905_v62 = vld [vmem:[#allocation8 + $0x3e8] ss:$16 sps:$4 sm:$0xff]  }
 0x196   :  { %3930 = vmatpush1.bf16.msra.mxu0 %v6830_v48  ;;  %4258 = vmatpush1.bf16.msra.mxu1 %v6833_v49  ;;  %v195_v48 = vrot.slane %v8157_v9, %v8196_v42  ;;  %v6890_v49 = vld [vmem:[#allocation8 + $0x3a0] ss:$16 sps:$4 sm:$0xff]  }
 0x197   :  { %3931 = vmatprep.subr.bf16.mxu0 %v6838_v51  ;;  %4259 = vmatprep.subr.bf16.mxu1 %v6841_v52  ;;  %v6893_v51 = vld [vmem:[#allocation8 + $0x3a8] ss:$16 sps:$4 sm:$0xff]   ;;  %v6898_v52 = vld [vmem:[#allocation8 + $0x3c4] ss:$16 sps:$4 sm:$0xff]   ;;  %v6902_v9 = vld [vmem:[#allocation8 + $0x3e0] ss:$16 sps:$4 sm:$0xff]  }
 0x198   :  { %v708_v63 = vpop.f32.mrb[12].mxu0 }
 0x199   :  { %v8188_v1 = vadd.f32 %v708_v63, %v235_v61  ;;  %v710_v5 = vpop.f32.mrb[13].mxu0  ;;  %v6904_v63 = vld [vmem:[#allocation8 + $0x3e4] ss:$16 sps:$4 sm:$0xff]  }
 0x19a   :  { %3932 = vmatpush1.bf16.msra.mxu0 %v6836_v54  ;;  %4260 = vmatpush1.bf16.msra.mxu1 %v6839_v57  ;;  %v712_v12 = vpop.f32.mrb[14].mxu0  ;;  %v8193_v13 = vadd.f32 %v710_v5, %v239_v4  ;;  %v8200_v54 = vpop.f32.mrb[4].mxu1  ;;  %v504_v57 = vadd.f32 %v8171_v19, %v195_v48  ;;  %v547_v4 = vadd.f32 %v8175_v36, %v207_v55  ;;  %v6910_v19 = vld [vmem:[#allocation8 + $0x404] ss:$16 sps:$4 sm:$0xff]   ;;  %v6919_v36 = vld [vmem:[#allocation8 + $0x42c] ss:$16 sps:$4 sm:$0xff]  }
 0x19b   :  { %3933 = vmatprep.subr.bf16.mxu0 %v6844_v59  ;;  %4261 = vmatprep.subr.bf16.mxu1 %v6847_v60  ;;  %v713_v14 = vpop.f32.mrb[15].mxu0  ;;  %v6896_v59 = vld [vmem:[#allocation8 + $0x3c0] ss:$16 sps:$4 sm:$0xff]   ;;  %v6899_v60 = vld [vmem:[#allocation8 + $0x3c8] ss:$16 sps:$4 sm:$0xff]   ;;  %v8206_v61 = vpop.f32.mrb[5].mxu1 }
 0x19c   :  { %v6908_v12 = vld [vmem:[#allocation8 + $0x400] ss:$16 sps:$4 sm:$0xff]   ;;  %v6911_v14 = vld [vmem:[#allocation8 + $0x408] ss:$16 sps:$4 sm:$0xff]  }
 0x19d   :  { %v6938_v48 = vld [vmem:[#allocation8 + $0x4a0] ss:$16 sps:$4 sm:$0xff]  }
 0x19e   :  { %3934 = vmatpush1.bf16.msra.mxu0 %v6842_v2  ;;  %4262 = vmatpush1.bf16.msra.mxu1 %v6845_v3  ;;  %v6907_v2 = vld [vmem:[#allocation8 + $0x3ec] ss:$16 sps:$4 sm:$0xff]   ;;  %v589_v3 = vpop.f32.mrb[6].mxu1 }
 0x19f   :  { %3935 = vmatprep.subr.bf16.mxu0 %v6850_v6  ;;  %4263 = vmatprep.subr.bf16.mxu1 %v6853_v11  ;;  %v590_v5 = vpop.f32.mrb[7].mxu1  ;;  %v758_v6 = vmax.f32 %v504_v57, 0.0  ;;  %v6913_v11 = vld [vmem:[#allocation8 + $0x40c] ss:$16 sps:$4 sm:$0xff]   ;;  %v6947_v3 = vld [vmem:[#allocation8 + $0x4c8] ss:$16 sps:$4 sm:$0xff]  }
 0x1a0   :  { %v6950_v5 = vld [vmem:[#allocation8 + $0x4e0] ss:$16 sps:$4 sm:$0xff]  }
 0x1a2   :  { %3936 = vmatpush1.bf16.msra.mxu0 %v6848_v15  ;;  %4264 = vmatpush1.bf16.msra.mxu1 %v6851_v16  ;;  %v761_v15 = vmax.f32 %v547_v4, 0.0  ;;  %v774_v16 = vpack.c.bf16 %v758_v6, %v758_v6  ;;  %v6955_v4 = vld [vmem:[#allocation8 + $0x4ec] ss:$16 sps:$4 sm:$0xff]   ;;  %v6953_v6 = vld [vmem:[#allocation8 + $0x4e8] ss:$16 sps:$4 sm:$0xff]  }
 0x1a3   :  { %3937 = vmatprep.subr.bf16.mxu0 %v6856_v17  ;;  %4265 = vmatprep.subr.bf16.mxu1 %v6859_v18  ;;  %v6916_v17 = vld [vmem:[#allocation8 + $0x424] ss:$16 sps:$4 sm:$0xff]   ;;  %v6914_v18 = vld [vmem:[#allocation8 + $0x420] ss:$16 sps:$4 sm:$0xff]  }
 0x1a6   :  { %3938 = vmatpush1.bf16.msra.mxu0 %v6854_v20  ;;  %4266 = vmatpush1.bf16.msra.mxu1 %v6857_v21  ;;  %v6917_v20 = vld [vmem:[#allocation8 + $0x428] ss:$16 sps:$4 sm:$0xff]   ;;  %v777_v21 = vpack.c.bf16 %v761_v15, %v761_v15  ;;  %v6962_v15 = vld [vmem:[#allocation8 + $0x520] ss:$16 sps:$4 sm:$0xff]  }
 0x1a7   :  { %3939 = vmatprep.subr.bf16.mxu0 %v6862_v22  ;;  %4267 = vmatprep.subr.bf16.mxu1 %v6865_v23  ;;  %v6922_v22 = vld [vmem:[#allocation8 + $0x444] ss:$16 sps:$4 sm:$0xff]   ;;  %v6925_v23 = vld [vmem:[#allocation8 + $0x44c] ss:$16 sps:$4 sm:$0xff]  }
 0x1aa   :  { %3940 = vmatpush1.bf16.msra.mxu0 %v6860_v24  ;;  %4268 = vmatpush1.bf16.msra.mxu1 %v6863_v25  ;;  %v6920_v24 = vld [vmem:[#allocation8 + $0x440] ss:$16 sps:$4 sm:$0xff]   ;;  %v6923_v25 = vld [vmem:[#allocation8 + $0x448] ss:$16 sps:$4 sm:$0xff]  }
 0x1ab   :  { %3941 = vmatprep.subr.bf16.mxu0 %v6868_v26  ;;  %4269 = vmatprep.subr.bf16.mxu1 %v6871_v27  ;;  %v6928_v26 = vld [vmem:[#allocation8 + $0x464] ss:$16 sps:$4 sm:$0xff]   ;;  %v6931_v27 = vld [vmem:[#allocation8 + $0x46c] ss:$16 sps:$4 sm:$0xff]  }
 0x1ae   :  { %3942 = vmatpush1.bf16.msra.mxu0 %v6866_v28  ;;  %4270 = vmatpush1.bf16.msra.mxu1 %v6869_v29  ;;  %v8209_v28 = vpop.f32.mrb[8].mxu1  ;;  %v6926_v29 = vld [vmem:[#allocation8 + $0x460] ss:$16 sps:$4 sm:$0xff]  }
 0x1af   :  { %3943 = vmatprep.subr.bf16.mxu0 %v6874_v30  ;;  %4271 = vmatprep.subr.bf16.mxu1 %v6877_v31  ;;  %v6929_v30 = vld [vmem:[#allocation8 + $0x468] ss:$16 sps:$4 sm:$0xff]   ;;  %v8211_v31 = vpop.f32.mrb[9].mxu1 }
 0x1b2   :  { %3944 = vmatpush1.bf16.msra.mxu0 %v6872_v32  ;;  %4272 = vmatpush1.bf16.msra.mxu1 %v6875_v33  ;;  %v671_v32 = vpop.f32.mrb[10].mxu1 }
 0x1b3   :  { %3945 = vmatprep.subr.bf16.mxu0 %v6880_v34  ;;  %4273 = vmatprep.subr.bf16.mxu1 %v6883_v37  ;;  %v672_v33 = vpop.f32.mrb[11].mxu1  ;;  %v6934_v34 = vld [vmem:[#allocation8 + $0x484] ss:$16 sps:$4 sm:$0xff]   ;;  %v6937_v37 = vld [vmem:[#allocation8 + $0x48c] ss:$16 sps:$4 sm:$0xff]  }
 0x1b4   :  { %v6991_v32 = vld [vmem:[#allocation8 + $0x5ac] ss:$16 sps:$4 sm:$0xff]   ;;  %v6986_v33 = vld [vmem:[#allocation8 + $0x5a0] ss:$16 sps:$4 sm:$0xff]  }
 0x1b6   :  { %3946 = vmatpush1.bf16.msra.mxu0 %v6878_v38  ;;  %4274 = vmatpush1.bf16.msra.mxu1 %v6881_v39  ;;  %v6932_v38 = vld [vmem:[#allocation8 + $0x480] ss:$16 sps:$4 sm:$0xff]   ;;  %v6935_v39 = vld [vmem:[#allocation8 + $0x488] ss:$16 sps:$4 sm:$0xff]  }
 0x1b7   :  { %3947 = vmatprep.subr.bf16.mxu0 %v6886_v40  ;;  %4275 = vmatprep.subr.bf16.mxu1 %v6889_v41  ;;  %v210_v40 = vsub.s32 6, %v8152_v7  ;;  %v214_v41 = vsub.s32 7, %v8152_v7  ;;  %v7088_v7 = vld [vmem:[#allocation8 + $0x7c0] ss:$16 sps:$4 sm:$0xff]  }
 0x1ba   :  { %3948 = vmatpush1.bf16.msra.mxu0 %v6884_v43  ;;  %4276 = vmatpush1.bf16.msra.mxu1 %v6887_v44  ;;  %v6940_v43 = vld [vmem:[#allocation8 + $0x4a4] ss:$16 sps:$4 sm:$0xff]   ;;  %v6943_v44 = vld [vmem:[#allocation8 + $0x4ac] ss:$16 sps:$4 sm:$0xff]  }
 0x1bb   :  { %3949 = vmatprep.subr.bf16.mxu0 %v6892_v45  ;;  %4277 = vmatprep.subr.bf16.mxu1 %v6895_v46  ;;  %v243_v45 = vrot.slane %v8182_v58, %v210_v40  ;;  %v749_v46 = vpop.f32.mrb[12].mxu1 }
 0x1be   :  { %3950 = vmatpush1.bf16.msra.mxu0 %v6890_v49  ;;  %4278 = vmatpush1.bf16.msra.mxu1 %v6893_v51  ;;  %v6941_v49 = vld [vmem:[#allocation8 + $0x4a8] ss:$16 sps:$4 sm:$0xff]   ;;  %v247_v51 = vrot.slane %v8182_v58, %v214_v41  ;;  %v6952_v58 = vld [vmem:[#allocation8 + $0x4e4] ss:$16 sps:$4 sm:$0xff]  }
 0x1bf   :  { %3951 = vmatprep.subr.bf16.mxu0 %v6898_v52  ;;  %4279 = vmatprep.subr.bf16.mxu1 %v6901_v53  ;;  %v751_v52 = vpop.f32.mrb[13].mxu1  ;;  %v8221_v53 = vadd.f32 %v749_v46, %v243_v45  ;;  %v6992_v45 = vld [vmem:[#allocation8 + $0x5c0] ss:$16 sps:$4 sm:$0xff]   ;;  %v6995_v46 = vld [vmem:[#allocation8 + $0x5c8] ss:$16 sps:$4 sm:$0xff]  }
 0x1c0   :  { %v753_v55 = vpop.f32.mrb[14].mxu1  ;;  %v8223_v57 = vadd.f32 %v751_v52, %v247_v51  ;;  %v6998_v52 = vld [vmem:[#allocation8 + $0x5e0] ss:$16 sps:$4 sm:$0xff]  }
 0x1c1   :  { %v7001_v55 = vld [vmem:[#allocation8 + $0x5e8] ss:$16 sps:$4 sm:$0xff]  }
 0x1c2   :  { %3952 = vmatpush1.bf16.msra.mxu0 %v6896_v59  ;;  %4280 = vmatpush1.bf16.msra.mxu1 %v6899_v60  ;;  %v754_v59 = vpop.f32.mrb[15].mxu1  ;;  %v6946_v60 = vld [vmem:[#allocation8 + $0x4c4] ss:$16 sps:$4 sm:$0xff]  }
 0x1c3   :  { %3953 = vmatprep.subr.bf16.mxu0 %v6904_v63  ;;  %4281 = vmatprep.subr.bf16.mxu1 %v6907_v2  ;;  %v6949_v63 = vld [vmem:[#allocation8 + $0x4cc] ss:$16 sps:$4 sm:$0xff]   ;;  %v6944_v2 = vld [vmem:[#allocation8 + $0x4c0] ss:$16 sps:$4 sm:$0xff]  }
 0x1c6   :  { %3954 = vmatpush1.bf16.msra.mxu0 %v6902_v9  ;;  %4282 = vmatpush1.bf16.msra.mxu1 %v6905_v62  ;;  %v6958_v9 = vld [vmem:[#allocation8 + $0x504] ss:$16 sps:$4 sm:$0xff]   ;;  %v6961_v62 = vld [vmem:[#allocation8 + $0x50c] ss:$16 sps:$4 sm:$0xff]  }
 0x1c7   :  { %3964 = vmatprep.subr.bf16.mxu0 %v6910_v19  ;;  %4292 = vmatprep.subr.bf16.mxu1 %v6913_v11  ;;  %v6956_v19 = vld [vmem:[#allocation8 + $0x500] ss:$16 sps:$4 sm:$0xff]   ;;  %v6959_v11 = vld [vmem:[#allocation8 + $0x508] ss:$16 sps:$4 sm:$0xff]  }
 0x1c9   :  { %3956 = vmatmul.mubr.bf16.vlgmr.msra.gmra.mrb[16].mxu0 %v774_v16  ;;  %4284 = vmatmul.mubr.bf16.vlgmr.msra.gmra.mrb[16].mxu1 %v774_v16  ;;  %v6965_v16 = vld [vmem:[#allocation8 + $0x528] ss:$16 sps:$4 sm:$0xff]  }
 0x1ca   :  { %3965 = vmatpush1.bf16.msra.mxu0 %v6908_v12  ;;  %4293 = vmatpush1.bf16.msra.mxu1 %v6911_v14  ;;  %v6964_v12 = vld [vmem:[#allocation8 + $0x524] ss:$16 sps:$4 sm:$0xff]   ;;  %v6967_v14 = vld [vmem:[#allocation8 + $0x52c] ss:$16 sps:$4 sm:$0xff]  }
 0x1cb   :  { %3966 = vmatprep.subr.bf16.mxu0 %v6916_v17  ;;  %4294 = vmatprep.subr.bf16.mxu1 %v6919_v36  ;;  %v6970_v17 = vld [vmem:[#allocation8 + $0x544] ss:$16 sps:$4 sm:$0xff]   ;;  %v6973_v36 = vld [vmem:[#allocation8 + $0x54c] ss:$16 sps:$4 sm:$0xff]  }
 0x1cc   :  { %3996 = vmatprep.mubr.bf16.mxu0 %v777_v21  ;;  %4324 = vmatprep.mubr.bf16.mxu1 %v777_v21  ;;  %v6976_v21 = vld [vmem:[#allocation8 + $0x564] ss:$16 sps:$4 sm:$0xff]  }
 0x1ce   :  { %3967 = vmatpush1.bf16.msra.mxu0 %v6914_v18  ;;  %4295 = vmatpush1.bf16.msra.mxu1 %v6917_v20  ;;  %v6968_v18 = vld [vmem:[#allocation8 + $0x540] ss:$16 sps:$4 sm:$0xff]   ;;  %v6971_v20 = vld [vmem:[#allocation8 + $0x548] ss:$16 sps:$4 sm:$0xff]  }
 0x1cf   :  { %3968 = vmatprep.subr.bf16.mxu0 %v6922_v22  ;;  %4296 = vmatprep.subr.bf16.mxu1 %v6925_v23  ;;  %v6979_v22 = vld [vmem:[#allocation8 + $0x56c] ss:$16 sps:$4 sm:$0xff]   ;;  %v6974_v23 = vld [vmem:[#allocation8 + $0x560] ss:$16 sps:$4 sm:$0xff]  }
 0x1d2   :  { %3969 = vmatpush1.bf16.msra.mxu0 %v6920_v24  ;;  %4297 = vmatpush1.bf16.msra.mxu1 %v6923_v25  ;;  %v6977_v24 = vld [vmem:[#allocation8 + $0x568] ss:$16 sps:$4 sm:$0xff]   ;;  %v6982_v25 = vld [vmem:[#allocation8 + $0x584] ss:$16 sps:$4 sm:$0xff]  }
 0x1d3   :  { %3970 = vmatprep.subr.bf16.mxu0 %v6928_v26  ;;  %4298 = vmatprep.subr.bf16.mxu1 %v6931_v27  ;;  %v6985_v26 = vld [vmem:[#allocation8 + $0x58c] ss:$16 sps:$4 sm:$0xff]   ;;  %v6980_v27 = vld [vmem:[#allocation8 + $0x580] ss:$16 sps:$4 sm:$0xff]  }
 0x1d6   :  { %3971 = vmatpush1.bf16.msra.mxu0 %v6926_v29  ;;  %4299 = vmatpush1.bf16.msra.mxu1 %v6929_v30  ;;  %v6983_v29 = vld [vmem:[#allocation8 + $0x588] ss:$16 sps:$4 sm:$0xff]   ;;  %v6988_v30 = vld [vmem:[#allocation8 + $0x5a4] ss:$16 sps:$4 sm:$0xff]  }
 0x1d7   :  { %3972 = vmatprep.subr.bf16.mxu0 %v6934_v34  ;;  %4300 = vmatprep.subr.bf16.mxu1 %v6937_v37  ;;  %v6989_v34 = vld [vmem:[#allocation8 + $0x5a8] ss:$16 sps:$4 sm:$0xff]   ;;  %v8225_v37 = vld [vmem:[#allocation7] sm:$0xff] }
 0x1da   :  { %3973 = vmatpush1.bf16.msra.mxu0 %v6932_v38  ;;  %4301 = vmatpush1.bf16.msra.mxu1 %v6935_v39  ;;  %v203_v38 = vrot.slane %v8225_v37, %v202_v56  ;;  %v6994_v39 = vld [vmem:[#allocation8 + $0x5c4] ss:$16 sps:$4 sm:$0xff]   ;;  %v7003_v56 = vld [vmem:[#allocation8 + $0x5ec] ss:$16 sps:$4 sm:$0xff]  }
 0x1db   :  { %3974 = vmatprep.subr.bf16.mxu0 %v6940_v43  ;;  %4302 = vmatprep.subr.bf16.mxu1 %v6943_v44  ;;  %v6997_v43 = vld [vmem:[#allocation8 + $0x5cc] ss:$16 sps:$4 sm:$0xff]  }
 0x1dc   :  { %v545_v44 = vadd.f32 %v8173_v35, %v203_v38  ;;  %v7006_v35 = vld [vmem:[#allocation8 + $0x604] ss:$16 sps:$4 sm:$0xff]  }
 0x1dd   :  { %v7054_v38 = vld [vmem:[#allocation8 + $0x704] ss:$16 sps:$4 sm:$0xff]  }
 0x1de   :  { %3975 = vmatpush1.bf16.msra.mxu0 %v6938_v48  ;;  %4303 = vmatpush1.bf16.msra.mxu1 %v6941_v49  ;;  %v215_v48 = vrot.slane %v8225_v37, %v214_v41  ;;  %v7000_v49 = vld [vmem:[#allocation8 + $0x5e4] ss:$16 sps:$4 sm:$0xff]   ;;  %v760_v51 = vmax.f32 %v545_v44, 0.0  ;;  %v7004_v41 = vld [vmem:[#allocation8 + $0x600] ss:$16 sps:$4 sm:$0xff]  }
 0x1df   :  { %3976 = vmatprep.subr.bf16.mxu0 %v6946_v60  ;;  %4304 = vmatprep.subr.bf16.mxu1 %v6949_v63  ;;  %v7009_v60 = vld [vmem:[#allocation8 + $0x60c] ss:$16 sps:$4 sm:$0xff]   ;;  %v7055_v44 = vld [vmem:[#allocation8 + $0x708] ss:$16 sps:$4 sm:$0xff]  }
 0x1e0   :  { %v588_v59 = vadd.f32 %v8206_v61, %v215_v48  ;;  %v7010_v61 = vld [vmem:[#allocation8 + $0x620] ss:$16 sps:$4 sm:$0xff]  }
 0x1e1   :  { %v7058_v48 = vld [vmem:[#allocation8 + $0x720] ss:$16 sps:$4 sm:$0xff]  }
 0x1e2   :  { %3977 = vmatpush1.bf16.msra.mxu0 %v6944_v2  ;;  %4305 = vmatpush1.bf16.msra.mxu1 %v6947_v3  ;;  %v763_v63 = vmax.f32 %v588_v59, 0.0  ;;  %v776_v2 = vpack.c.bf16 %v760_v51, %v760_v51  ;;  %v7007_v3 = vld [vmem:[#allocation8 + $0x608] ss:$16 sps:$4 sm:$0xff]   ;;  %v7069_v51 = vld [vmem:[#allocation8 + $0x74c] ss:$16 sps:$4 sm:$0xff]  }
 0x1e3   :  { %3978 = vmatprep.subr.bf16.mxu0 %v6952_v58  ;;  %4306 = vmatprep.subr.bf16.mxu1 %v6955_v4  ;;  %v7012_v58 = vld [vmem:[#allocation8 + $0x624] ss:$16 sps:$4 sm:$0xff]   ;;  %v7015_v4 = vld [vmem:[#allocation8 + $0x62c] ss:$16 sps:$4 sm:$0xff]  }
 0x1e4   :  { %v7072_v59 = vld [vmem:[#allocation8 + $0x764] ss:$16 sps:$4 sm:$0xff]  }
 0x1e6   :  { %3979 = vmatpush1.bf16.msra.mxu0 %v6950_v5  ;;  %4307 = vmatpush1.bf16.msra.mxu1 %v6953_v6  ;;  %v779_v5 = vpack.c.bf16 %v763_v63, %v763_v63  ;;  %v7013_v6 = vld [vmem:[#allocation8 + $0x628] ss:$16 sps:$4 sm:$0xff]  }
 0x1e7   :  { %3980 = vmatprep.subr.bf16.mxu0 %v6958_v9  ;;  %4308 = vmatprep.subr.bf16.mxu1 %v6961_v62  ;;  %v7018_v9 = vld [vmem:[#allocation8 + $0x644] ss:$16 sps:$4 sm:$0xff]   ;;  %v7021_v62 = vld [vmem:[#allocation8 + $0x64c] ss:$16 sps:$4 sm:$0xff]   ;;  %v7073_v63 = vld [vmem:[#allocation8 + $0x768] ss:$16 sps:$4 sm:$0xff]  }
 0x1ea   :  { %3981 = vmatpush1.bf16.msra.mxu0 %v6956_v19  ;;  %4309 = vmatpush1.bf16.msra.mxu1 %v6959_v11  ;;  %v7016_v19 = vld [vmem:[#allocation8 + $0x640] ss:$16 sps:$4 sm:$0xff]   ;;  %v7019_v11 = vld [vmem:[#allocation8 + $0x648] ss:$16 sps:$4 sm:$0xff]  }
 0x1eb   :  { %3982 = vmatprep.subr.bf16.mxu0 %v6964_v12  ;;  %4310 = vmatprep.subr.bf16.mxu1 %v6967_v14  ;;  %v7024_v12 = vld [vmem:[#allocation8 + $0x664] ss:$16 sps:$4 sm:$0xff]   ;;  %v7027_v14 = vld [vmem:[#allocation8 + $0x66c] ss:$16 sps:$4 sm:$0xff]  }
 0x1ee   :  { %3983 = vmatpush1.bf16.msra.mxu0 %v6962_v15  ;;  %4311 = vmatpush1.bf16.msra.mxu1 %v6965_v16  ;;  %v7022_v15 = vld [vmem:[#allocation8 + $0x660] ss:$16 sps:$4 sm:$0xff]   ;;  %v7025_v16 = vld [vmem:[#allocation8 + $0x668] ss:$16 sps:$4 sm:$0xff]  }
 0x1ef   :  { %3984 = vmatprep.subr.bf16.mxu0 %v6970_v17  ;;  %4312 = vmatprep.subr.bf16.mxu1 %v6973_v36  ;;  %v7030_v17 = vld [vmem:[#allocation8 + $0x684] ss:$16 sps:$4 sm:$0xff]   ;;  %v7033_v36 = vld [vmem:[#allocation8 + $0x68c] ss:$16 sps:$4 sm:$0xff]  }
 0x1f2   :  { %3985 = vmatpush1.bf16.msra.mxu0 %v6968_v18  ;;  %4313 = vmatpush1.bf16.msra.mxu1 %v6971_v20  ;;  %v7028_v18 = vld [vmem:[#allocation8 + $0x680] ss:$16 sps:$4 sm:$0xff]   ;;  %v7031_v20 = vld [vmem:[#allocation8 + $0x688] ss:$16 sps:$4 sm:$0xff]  }
 0x1f3   :  { %3986 = vmatprep.subr.bf16.mxu0 %v6976_v21  ;;  %4314 = vmatprep.subr.bf16.mxu1 %v6979_v22  ;;  %v7036_v21 = vld [vmem:[#allocation8 + $0x6a4] ss:$16 sps:$4 sm:$0xff]   ;;  %v7039_v22 = vld [vmem:[#allocation8 + $0x6ac] ss:$16 sps:$4 sm:$0xff]  }
 0x1f6   :  { %3987 = vmatpush1.bf16.msra.mxu0 %v6974_v23  ;;  %4315 = vmatpush1.bf16.msra.mxu1 %v6977_v24  ;;  %v7034_v23 = vld [vmem:[#allocation8 + $0x6a0] ss:$16 sps:$4 sm:$0xff]   ;;  %v7037_v24 = vld [vmem:[#allocation8 + $0x6a8] ss:$16 sps:$4 sm:$0xff]  }
 0x1f7   :  { %3988 = vmatprep.subr.bf16.mxu0 %v6982_v25  ;;  %4316 = vmatprep.subr.bf16.mxu1 %v6985_v26  ;;  %v7042_v25 = vld [vmem:[#allocation8 + $0x6c4] ss:$16 sps:$4 sm:$0xff]   ;;  %v7045_v26 = vld [vmem:[#allocation8 + $0x6cc] ss:$16 sps:$4 sm:$0xff]  }
 0x1fa   :  { %3989 = vmatpush1.bf16.msra.mxu0 %v6980_v27  ;;  %4317 = vmatpush1.bf16.msra.mxu1 %v6983_v29  ;;  %v7040_v27 = vld [vmem:[#allocation8 + $0x6c0] ss:$16 sps:$4 sm:$0xff]   ;;  %v7043_v29 = vld [vmem:[#allocation8 + $0x6c8] ss:$16 sps:$4 sm:$0xff]  }
 0x1fb   :  { %3990 = vmatprep.subr.bf16.mxu0 %v6988_v30  ;;  %4318 = vmatprep.subr.bf16.mxu1 %v6991_v32  ;;  %v7048_v30 = vld [vmem:[#allocation8 + $0x6e4] ss:$16 sps:$4 sm:$0xff]   ;;  %v7051_v32 = vld [vmem:[#allocation8 + $0x6ec] ss:$16 sps:$4 sm:$0xff]  }
 0x1fe   :  { %3991 = vmatpush1.bf16.msra.mxu0 %v6986_v33  ;;  %4319 = vmatpush1.bf16.msra.mxu1 %v6989_v34  ;;  %v7046_v33 = vld [vmem:[#allocation8 + $0x6e0] ss:$16 sps:$4 sm:$0xff]   ;;  %v7049_v34 = vld [vmem:[#allocation8 + $0x6e8] ss:$16 sps:$4 sm:$0xff]  }
 0x1ff   :  { %3992 = vmatprep.subr.bf16.mxu0 %v6994_v39  ;;  %4320 = vmatprep.subr.bf16.mxu1 %v6997_v43  ;;  %v7057_v39 = vld [vmem:[#allocation8 + $0x70c] ss:$16 sps:$4 sm:$0xff]   ;;  %v7052_v43 = vld [vmem:[#allocation8 + $0x700] ss:$16 sps:$4 sm:$0xff]  }
 0x202   :  { %3993 = vmatpush1.bf16.msra.mxu0 %v6992_v45  ;;  %4321 = vmatpush1.bf16.msra.mxu1 %v6995_v46  ;;  %v7060_v45 = vld [vmem:[#allocation8 + $0x724] ss:$16 sps:$4 sm:$0xff]   ;;  %v7063_v46 = vld [vmem:[#allocation8 + $0x72c] ss:$16 sps:$4 sm:$0xff]  }
 0x203   :  { %3994 = vmatprep.subr.bf16.mxu0 %v7000_v49  ;;  %4322 = vmatprep.subr.bf16.mxu1 %v7003_v56  ;;  %v7061_v49 = vld [vmem:[#allocation8 + $0x728] ss:$16 sps:$4 sm:$0xff]   ;;  %v7066_v56 = vld [vmem:[#allocation8 + $0x744] ss:$16 sps:$4 sm:$0xff]  }
 0x206   :  { %3995 = vmatpush1.bf16.msra.mxu0 %v6998_v52  ;;  %4323 = vmatpush1.bf16.msra.mxu1 %v7001_v55  ;;  %v7064_v52 = vld [vmem:[#allocation8 + $0x740] ss:$16 sps:$4 sm:$0xff]   ;;  %v7067_v55 = vld [vmem:[#allocation8 + $0x748] ss:$16 sps:$4 sm:$0xff]  }
 0x207   :  { %4005 = vmatprep.subr.bf16.mxu0 %v7006_v35  ;;  %4333 = vmatprep.subr.bf16.mxu1 %v7009_v60  ;;  %v7075_v35 = vld [vmem:[#allocation8 + $0x76c] ss:$16 sps:$4 sm:$0xff]   ;;  %v7070_v60 = vld [vmem:[#allocation8 + $0x760] ss:$16 sps:$4 sm:$0xff]  }
 0x209   :  { %3997 = vmatmul.mubr.bf16.vlgmr.msra.gmra.mrb[16].mxu0 %v776_v2  ;;  %4325 = vmatmul.mubr.bf16.vlgmr.msra.gmra.mrb[16].mxu1 %v776_v2  ;;  %v7078_v2 = vld [vmem:[#allocation8 + $0x784] ss:$16 sps:$4 sm:$0xff]  }
 0x20a   :  { %4006 = vmatpush1.bf16.msra.mxu0 %v7004_v41  ;;  %4334 = vmatpush1.bf16.msra.mxu1 %v7007_v3  ;;  %v7081_v41 = vld [vmem:[#allocation8 + $0x78c] ss:$16 sps:$4 sm:$0xff]   ;;  %v7076_v3 = vld [vmem:[#allocation8 + $0x780] ss:$16 sps:$4 sm:$0xff]  }
 0x20b   :  { %4007 = vmatprep.subr.bf16.mxu0 %v7012_v58  ;;  %4335 = vmatprep.subr.bf16.mxu1 %v7015_v4  ;;  %v7079_v58 = vld [vmem:[#allocation8 + $0x788] ss:$16 sps:$4 sm:$0xff]   ;;  %v7084_v4 = vld [vmem:[#allocation8 + $0x7a4] ss:$16 sps:$4 sm:$0xff]  }
 0x20c   :  { %4037 = vmatprep.mubr.bf16.mxu0 %v779_v5  ;;  %4365 = vmatprep.mubr.bf16.mxu1 %v779_v5  ;;  %v7087_v5 = vld [vmem:[#allocation8 + $0x7ac] ss:$16 sps:$4 sm:$0xff]  }
 0x20e   :  { %4008 = vmatpush1.bf16.msra.mxu0 %v7010_v61  ;;  %4336 = vmatpush1.bf16.msra.mxu1 %v7013_v6  ;;  %v211_v61 = vrot.slane %v8225_v37, %v210_v40  ;;  %v7082_v6 = vld [vmem:[#allocation8 + $0x7a0] ss:$16 sps:$4 sm:$0xff]   ;;  %v7096_v40 = vld [vmem:[#allocation8 + $0x7e4] ss:$16 sps:$4 sm:$0xff]   ;;  %v7099_v37 = vld [vmem:[#allocation8 + $0x7ec] ss:$16 sps:$4 sm:$0xff]  }
 0x20f   :  { %4009 = vmatprep.subr.bf16.mxu0 %v7018_v9  ;;  %4337 = vmatprep.subr.bf16.mxu1 %v7021_v62  ;;  %v7085_v9 = vld [vmem:[#allocation8 + $0x7a8] ss:$16 sps:$4 sm:$0xff]   ;;  %v7090_v62 = vld [vmem:[#allocation8 + $0x7c4] ss:$16 sps:$4 sm:$0xff]  }
 0x212   :  { %4010 = vmatpush1.bf16.msra.mxu0 %v7016_v19  ;;  %4338 = vmatpush1.bf16.msra.mxu1 %v7019_v11  ;;  %v7093_v19 = vld [vmem:[#allocation8 + $0x7cc] ss:$16 sps:$4 sm:$0xff]  }
 0x213   :  { %4011 = vmatprep.subr.bf16.mxu0 %v7024_v12  ;;  %4339 = vmatprep.subr.bf16.mxu1 %v7027_v14  ;;  %v8238_v11 = vld [vmem:[#allocation7 + $0x8] sm:$0xff]  ;;  %v586_v14 = vadd.f32 %v8200_v54, %v211_v61  ;;  %v7148_v61 = vld [vmem:[#allocation8 + $0x900] ss:$16 sps:$4 sm:$0xff]  }
 0x214   :  { %v223_v12 = vrot.slane %v8238_v11, %v8160_v10 }
 0x216   :  { %4012 = vmatpush1.bf16.msra.mxu0 %v7022_v15  ;;  %4340 = vmatpush1.bf16.msra.mxu1 %v7025_v16  ;;  %v7091_v15 = vld [vmem:[#allocation8 + $0x7c8] ss:$16 sps:$4 sm:$0xff]   ;;  %v629_v16 = vadd.f32 %v8179_v50, %v223_v12  ;;  %v7111_v50 = vld [vmem:[#allocation8 + $0x82c] ss:$16 sps:$4 sm:$0xff]  }
 0x217   :  { %4013 = vmatprep.subr.bf16.mxu0 %v7030_v17  ;;  %4341 = vmatprep.subr.bf16.mxu1 %v7033_v36  ;;  %v762_v17 = vmax.f32 %v586_v14, 0.0  ;;  %v7094_v36 = vld [vmem:[#allocation8 + $0x7e0] ss:$16 sps:$4 sm:$0xff]   ;;  %v7157_v12 = vld [vmem:[#allocation8 + $0x928] ss:$16 sps:$4 sm:$0xff]  }
 0x218   :  { %v765_v54 = vmax.f32 %v629_v16, 0.0  ;;  %v7162_v14 = vld [vmem:[#allocation8 + $0x944] ss:$16 sps:$4 sm:$0xff]   ;;  %v7171_v16 = vld [vmem:[#allocation8 + $0x96c] ss:$16 sps:$4 sm:$0xff]  }
 0x21a   :  { %4014 = vmatpush1.bf16.msra.mxu0 %v7028_v18  ;;  %4342 = vmatpush1.bf16.msra.mxu1 %v7031_v20  ;;  %v7097_v18 = vld [vmem:[#allocation8 + $0x7e8] ss:$16 sps:$4 sm:$0xff]   ;;  %v7102_v20 = vld [vmem:[#allocation8 + $0x804] ss:$16 sps:$4 sm:$0xff]  }
 0x21b   :  { %4015 = vmatprep.subr.bf16.mxu0 %v7036_v21  ;;  %4343 = vmatprep.subr.bf16.mxu1 %v7039_v22  ;;  %v7105_v21 = vld [vmem:[#allocation8 + $0x80c] ss:$16 sps:$4 sm:$0xff]   ;;  %v778_v22 = vpack.c.bf16 %v762_v17, %v762_v17  ;;  %v7166_v17 = vld [vmem:[#allocation8 + $0x960] ss:$16 sps:$4 sm:$0xff]  }
 0x21e   :  { %4016 = vmatpush1.bf16.msra.mxu0 %v7034_v23  ;;  %4344 = vmatpush1.bf16.msra.mxu1 %v7037_v24  ;;  %v7100_v23 = vld [vmem:[#allocation8 + $0x800] ss:$16 sps:$4 sm:$0xff]   ;;  %v7103_v24 = vld [vmem:[#allocation8 + $0x808] ss:$16 sps:$4 sm:$0xff]  }
 0x21f   :  { %4017 = vmatprep.subr.bf16.mxu0 %v7042_v25  ;;  %4345 = vmatprep.subr.bf16.mxu1 %v7045_v26  ;;  %v781_v25 = vpack.c.bf16 %v765_v54, %v765_v54  ;;  %v7108_v26 = vld [vmem:[#allocation8 + $0x824] ss:$16 sps:$4 sm:$0xff]   ;;  %v7175_v54 = vld [vmem:[#allocation8 + $0x988] ss:$16 sps:$4 sm:$0xff]  }
 0x222   :  { %4018 = vmatpush1.bf16.msra.mxu0 %v7040_v27  ;;  %4346 = vmatpush1.bf16.msra.mxu1 %v7043_v29  ;;  %v7106_v27 = vld [vmem:[#allocation8 + $0x820] ss:$16 sps:$4 sm:$0xff]   ;;  %v7109_v29 = vld [vmem:[#allocation8 + $0x828] ss:$16 sps:$4 sm:$0xff]  }
 0x223   :  { %4019 = vmatprep.subr.bf16.mxu0 %v7048_v30  ;;  %4347 = vmatprep.subr.bf16.mxu1 %v7051_v32  ;;  %v7114_v30 = vld [vmem:[#allocation8 + $0x844] ss:$16 sps:$4 sm:$0xff]   ;;  %v7117_v32 = vld [vmem:[#allocation8 + $0x84c] ss:$16 sps:$4 sm:$0xff]  }
 0x226   :  { %4020 = vmatpush1.bf16.msra.mxu0 %v7046_v33  ;;  %4348 = vmatpush1.bf16.msra.mxu1 %v7049_v34  ;;  %v7112_v33 = vld [vmem:[#allocation8 + $0x840] ss:$16 sps:$4 sm:$0xff]   ;;  %v7115_v34 = vld [vmem:[#allocation8 + $0x848] ss:$16 sps:$4 sm:$0xff]  }
 0x227   :  { %4021 = vmatprep.subr.bf16.mxu0 %v7054_v38  ;;  %4349 = vmatprep.subr.bf16.mxu1 %v7057_v39  ;;  %v7120_v38 = vld [vmem:[#allocation8 + $0x864] ss:$16 sps:$4 sm:$0xff]   ;;  %v7123_v39 = vld [vmem:[#allocation8 + $0x86c] ss:$16 sps:$4 sm:$0xff]  }
 0x22a   :  { %4022 = vmatpush1.bf16.msra.mxu0 %v7052_v43  ;;  %4350 = vmatpush1.bf16.msra.mxu1 %v7055_v44  ;;  %v7118_v43 = vld [vmem:[#allocation8 + $0x860] ss:$16 sps:$4 sm:$0xff]   ;;  %v7121_v44 = vld [vmem:[#allocation8 + $0x868] ss:$16 sps:$4 sm:$0xff]  }
 0x22b   :  { %4023 = vmatprep.subr.bf16.mxu0 %v7060_v45  ;;  %4351 = vmatprep.subr.bf16.mxu1 %v7063_v46  ;;  %v7126_v45 = vld [vmem:[#allocation8 + $0x884] ss:$16 sps:$4 sm:$0xff]   ;;  %v7129_v46 = vld [vmem:[#allocation8 + $0x88c] ss:$16 sps:$4 sm:$0xff]  }
 0x22e   :  { %4024 = vmatpush1.bf16.msra.mxu0 %v7058_v48  ;;  %4352 = vmatpush1.bf16.msra.mxu1 %v7061_v49  ;;  %v7124_v48 = vld [vmem:[#allocation8 + $0x880] ss:$16 sps:$4 sm:$0xff]   ;;  %v7127_v49 = vld [vmem:[#allocation8 + $0x888] ss:$16 sps:$4 sm:$0xff]  }
 0x22f   :  { %4025 = vmatprep.subr.bf16.mxu0 %v7066_v56  ;;  %4353 = vmatprep.subr.bf16.mxu1 %v7069_v51  ;;  %v7132_v56 = vld [vmem:[#allocation8 + $0x8a4] ss:$16 sps:$4 sm:$0xff]   ;;  %v7135_v51 = vld [vmem:[#allocation8 + $0x8ac] ss:$16 sps:$4 sm:$0xff]  }
 0x232   :  { %4026 = vmatpush1.bf16.msra.mxu0 %v7064_v52  ;;  %4354 = vmatpush1.bf16.msra.mxu1 %v7067_v55  ;;  %v7130_v52 = vld [vmem:[#allocation8 + $0x8a0] ss:$16 sps:$4 sm:$0xff]   ;;  %v7133_v55 = vld [vmem:[#allocation8 + $0x8a8] ss:$16 sps:$4 sm:$0xff]  }
 0x233   :  { %4027 = vmatprep.subr.bf16.mxu0 %v7072_v59  ;;  %4355 = vmatprep.subr.bf16.mxu1 %v7075_v35  ;;  %v7138_v59 = vld [vmem:[#allocation8 + $0x8c4] ss:$16 sps:$4 sm:$0xff]   ;;  %v7141_v35 = vld [vmem:[#allocation8 + $0x8cc] ss:$16 sps:$4 sm:$0xff]  }
 0x236   :  { %4028 = vmatpush1.bf16.msra.mxu0 %v7070_v60  ;;  %4356 = vmatpush1.bf16.msra.mxu1 %v7073_v63  ;;  %v7136_v60 = vld [vmem:[#allocation8 + $0x8c0] ss:$16 sps:$4 sm:$0xff]   ;;  %v7139_v63 = vld [vmem:[#allocation8 + $0x8c8] ss:$16 sps:$4 sm:$0xff]  }
 0x237   :  { %4029 = vmatprep.subr.bf16.mxu0 %v7078_v2  ;;  %4357 = vmatprep.subr.bf16.mxu1 %v7081_v41  ;;  %v7144_v2 = vld [vmem:[#allocation8 + $0x8e4] ss:$16 sps:$4 sm:$0xff]   ;;  %v7147_v41 = vld [vmem:[#allocation8 + $0x8ec] ss:$16 sps:$4 sm:$0xff]  }
 0x23a   :  { %4030 = vmatpush1.bf16.msra.mxu0 %v7076_v3  ;;  %4358 = vmatpush1.bf16.msra.mxu1 %v7079_v58  ;;  %v7142_v3 = vld [vmem:[#allocation8 + $0x8e0] ss:$16 sps:$4 sm:$0xff]   ;;  %v7145_v58 = vld [vmem:[#allocation8 + $0x8e8] ss:$16 sps:$4 sm:$0xff]  }
 0x23b   :  { %4031 = vmatprep.subr.bf16.mxu0 %v7084_v4  ;;  %4359 = vmatprep.subr.bf16.mxu1 %v7087_v5  ;;  %v7150_v4 = vld [vmem:[#allocation8 + $0x904] ss:$16 sps:$4 sm:$0xff]   ;;  %v7153_v5 = vld [vmem:[#allocation8 + $0x90c] ss:$16 sps:$4 sm:$0xff]  }
 0x23e   :  { %4032 = vmatpush1.bf16.msra.mxu0 %v7082_v6  ;;  %4360 = vmatpush1.bf16.msra.mxu1 %v7085_v9  ;;  %v7151_v6 = vld [vmem:[#allocation8 + $0x908] ss:$16 sps:$4 sm:$0xff]   ;;  %v7156_v9 = vld [vmem:[#allocation8 + $0x924] ss:$16 sps:$4 sm:$0xff]  }
 0x23f   :  { %4033 = vmatprep.subr.bf16.mxu0 %v7090_v62  ;;  %4361 = vmatprep.subr.bf16.mxu1 %v7093_v19  ;;  %v7159_v62 = vld [vmem:[#allocation8 + $0x92c] ss:$16 sps:$4 sm:$0xff]   ;;  %v7154_v19 = vld [vmem:[#allocation8 + $0x920] ss:$16 sps:$4 sm:$0xff]  }
 0x242   :  { %4034 = vmatpush1.bf16.msra.mxu0 %v7088_v7  ;;  %4362 = vmatpush1.bf16.msra.mxu1 %v7091_v15  ;;  %v7165_v7 = vld [vmem:[#allocation8 + $0x94c] ss:$16 sps:$4 sm:$0xff]   ;;  %v7160_v15 = vld [vmem:[#allocation8 + $0x940] ss:$16 sps:$4 sm:$0xff]  }
 0x243   :  { %4035 = vmatprep.subr.bf16.mxu0 %v7096_v40  ;;  %4363 = vmatprep.subr.bf16.mxu1 %v7099_v37  ;;  %v7163_v40 = vld [vmem:[#allocation8 + $0x948] ss:$16 sps:$4 sm:$0xff]   ;;  %v7168_v37 = vld [vmem:[#allocation8 + $0x964] ss:$16 sps:$4 sm:$0xff]  }
 0x246   :  { %4036 = vmatpush1.bf16.msra.mxu0 %v7094_v36  ;;  %4364 = vmatpush1.bf16.msra.mxu1 %v7097_v18  ;;  %v7169_v36 = vld [vmem:[#allocation8 + $0x968] ss:$16 sps:$4 sm:$0xff]   ;;  %v7174_v18 = vld [vmem:[#allocation8 + $0x984] ss:$16 sps:$4 sm:$0xff]  }
 0x247   :  { %4046 = vmatprep.subr.bf16.mxu0 %v7102_v20  ;;  %4374 = vmatprep.subr.bf16.mxu1 %v7105_v21  ;;  %v7177_v20 = vld [vmem:[#allocation8 + $0x98c] ss:$16 sps:$4 sm:$0xff]   ;;  %v7172_v21 = vld [vmem:[#allocation8 + $0x980] ss:$16 sps:$4 sm:$0xff]  }
 0x249   :  { %4038 = vmatmul.mubr.bf16.vlgmr.msra.gmra.mrb[16].mxu0 %v778_v22  ;;  %4366 = vmatmul.mubr.bf16.vlgmr.msra.gmra.mrb[16].mxu1 %v778_v22  ;;  %v7180_v22 = vld [vmem:[#allocation8 + $0x9a4] ss:$16 sps:$4 sm:$0xff]  }
 0x24a   :  { %4047 = vmatpush1.bf16.msra.mxu0 %v7100_v23  ;;  %4078 = vmatprep.mubr.bf16.mxu0 %v781_v25  ;;  %v7183_v23 = vld [vmem:[#allocation8 + $0x9ac] ss:$16 sps:$4 sm:$0xff]  }
 0x24b   :  { %4375 = vmatpush1.bf16.msra.mxu1 %v7103_v24  ;;  %4406 = vmatprep.mubr.bf16.mxu1 %v781_v25  ;;  %v7178_v24 = vld [vmem:[#allocation8 + $0x9a0] ss:$16 sps:$4 sm:$0xff]   ;;  %v219_v25 = vrot.slane %v8238_v11, %v8155_v8 }
 0x24c   :  { %4048 = vmatprep.subr.bf16.mxu0 %v7108_v26  ;;  %4376 = vmatprep.subr.bf16.mxu1 %v7111_v50  ;;  %v7181_v26 = vld [vmem:[#allocation8 + $0x9a8] ss:$16 sps:$4 sm:$0xff]   ;;  %v7186_v50 = vld [vmem:[#allocation8 + $0x9c4] ss:$16 sps:$4 sm:$0xff]  }
 0x24e   :  { %4049 = vmatpush1.bf16.msra.mxu0 %v7106_v27  ;;  %v7189_v27 = vld [vmem:[#allocation8 + $0x9cc] ss:$16 sps:$4 sm:$0xff]  }
 0x24f   :  { %4377 = vmatpush1.bf16.msra.mxu1 %v7109_v29  ;;  %4050 = vmatprep.subr.bf16.mxu0 %v7114_v30  ;;  %v231_v29 = vrot.slane %v8238_v11, %v8163_v0  ;;  %v7184_v30 = vld [vmem:[#allocation8 + $0x9c0] ss:$16 sps:$4 sm:$0xff]  }
 0x250   :  { %4378 = vmatprep.subr.bf16.mxu1 %v7117_v32  ;;  %v627_v32 = vadd.f32 %v8177_v47, %v219_v25  ;;  %v7196_v47 = vld [vmem:[#allocation8 + $0xa00] ss:$16 sps:$4 sm:$0xff]   ;;  %v7255_v25 = vld [vmem:[#allocation8 + $0xb2c] ss:$16 sps:$4 sm:$0xff]  }
 0x252   :  { %4051 = vmatpush1.bf16.msra.mxu0 %v7112_v33  ;;  %v7187_v33 = vld [vmem:[#allocation8 + $0x9c8] ss:$16 sps:$4 sm:$0xff]  }
 0x253   :  { %4379 = vmatpush1.bf16.msra.mxu1 %v7115_v34  ;;  %4052 = vmatprep.subr.bf16.mxu0 %v7120_v38  ;;  %v7192_v34 = vld [vmem:[#allocation8 + $0x9e4] ss:$16 sps:$4 sm:$0xff]   ;;  %v7195_v38 = vld [vmem:[#allocation8 + $0x9ec] ss:$16 sps:$4 sm:$0xff]  }
 0x254   :  { %4380 = vmatprep.subr.bf16.mxu1 %v7123_v39  ;;  %v670_v39 = vadd.f32 %v8211_v31, %v231_v29  ;;  %v7207_v31 = vld [vmem:[#allocation8 + $0xa2c] ss:$16 sps:$4 sm:$0xff]  }
 0x255   :  { %v7261_v29 = vld [vmem:[#allocation8 + $0xb4c] ss:$16 sps:$4 sm:$0xff]  }
 0x256   :  { %4053 = vmatpush1.bf16.msra.mxu0 %v7118_v43  ;;  %v7190_v43 = vld [vmem:[#allocation8 + $0x9e0] ss:$16 sps:$4 sm:$0xff]  }
 0x257   :  { %4381 = vmatpush1.bf16.msra.mxu1 %v7121_v44  ;;  %4054 = vmatprep.subr.bf16.mxu0 %v7126_v45  ;;  %v764_v44 = vmax.f32 %v627_v32, 0.0  ;;  %v7193_v45 = vld [vmem:[#allocation8 + $0x9e8] ss:$16 sps:$4 sm:$0xff]  }
 0x258   :  { %4382 = vmatprep.subr.bf16.mxu1 %v7129_v46  ;;  %v7198_v46 = vld [vmem:[#allocation8 + $0xa04] ss:$16 sps:$4 sm:$0xff]   ;;  %v7259_v32 = vld [vmem:[#allocation8 + $0xb48] ss:$16 sps:$4 sm:$0xff]  }
 0x25a   :  { %4055 = vmatpush1.bf16.msra.mxu0 %v7124_v48  ;;  %v7201_v48 = vld [vmem:[#allocation8 + $0xa0c] ss:$16 sps:$4 sm:$0xff]  }
 0x25b   :  { %4383 = vmatpush1.bf16.msra.mxu1 %v7127_v49  ;;  %4056 = vmatprep.subr.bf16.mxu0 %v7132_v56  ;;  %v767_v49 = vmax.f32 %v670_v39, 0.0  ;;  %v780_v56 = vpack.c.bf16 %v764_v44, %v764_v44  ;;  %v7265_v39 = vld [vmem:[#allocation8 + $0xb68] ss:$16 sps:$4 sm:$0xff]   ;;  %v7273_v44 = vld [vmem:[#allocation8 + $0xb8c] ss:$16 sps:$4 sm:$0xff]  }
 0x25c   :  { %4384 = vmatprep.subr.bf16.mxu1 %v7135_v51  ;;  %v7199_v51 = vld [vmem:[#allocation8 + $0xa08] ss:$16 sps:$4 sm:$0xff]  }
 0x25e   :  { %4057 = vmatpush1.bf16.msra.mxu0 %v7130_v52  ;;  %v7204_v52 = vld [vmem:[#allocation8 + $0xa24] ss:$16 sps:$4 sm:$0xff]  }
 0x25f   :  { %4385 = vmatpush1.bf16.msra.mxu1 %v7133_v55  ;;  %4058 = vmatprep.subr.bf16.mxu0 %v7138_v59  ;;  %v783_v55 = vpack.c.bf16 %v767_v49, %v767_v49  ;;  %v7202_v59 = vld [vmem:[#allocation8 + $0xa20] ss:$16 sps:$4 sm:$0xff]   ;;  %v7279_v49 = vld [vmem:[#allocation8 + $0xbac] ss:$16 sps:$4 sm:$0xff]  }
 0x260   :  { %4386 = vmatprep.subr.bf16.mxu1 %v7141_v35  ;;  %v7205_v35 = vld [vmem:[#allocation8 + $0xa28] ss:$16 sps:$4 sm:$0xff]  }
 0x262   :  { %4059 = vmatpush1.bf16.msra.mxu0 %v7136_v60  ;;  %v7210_v60 = vld [vmem:[#allocation8 + $0xa44] ss:$16 sps:$4 sm:$0xff]  }
 0x263   :  { %4387 = vmatpush1.bf16.msra.mxu1 %v7139_v63  ;;  %4060 = vmatprep.subr.bf16.mxu0 %v7144_v2  ;;  %v7213_v63 = vld [vmem:[#allocation8 + $0xa4c] ss:$16 sps:$4 sm:$0xff]   ;;  %v7208_v2 = vld [vmem:[#allocation8 + $0xa40] ss:$16 sps:$4 sm:$0xff]  }
 0x264   :  { %4388 = vmatprep.subr.bf16.mxu1 %v7147_v41  ;;  %v7211_v41 = vld [vmem:[#allocation8 + $0xa48] ss:$16 sps:$4 sm:$0xff]  }
 0x266   :  { %4061 = vmatpush1.bf16.msra.mxu0 %v7142_v3  ;;  %v7216_v3 = vld [vmem:[#allocation8 + $0xa64] ss:$16 sps:$4 sm:$0xff]  }
 0x267   :  { %4389 = vmatpush1.bf16.msra.mxu1 %v7145_v58  ;;  %4062 = vmatprep.subr.bf16.mxu0 %v7150_v4  ;;  %v7219_v58 = vld [vmem:[#allocation8 + $0xa6c] ss:$16 sps:$4 sm:$0xff]   ;;  %v7214_v4 = vld [vmem:[#allocation8 + $0xa60] ss:$16 sps:$4 sm:$0xff]  }
 0x268   :  { %4390 = vmatprep.subr.bf16.mxu1 %v7153_v5  ;;  %v7217_v5 = vld [vmem:[#allocation8 + $0xa68] ss:$16 sps:$4 sm:$0xff]  }
 0x26a   :  { %4063 = vmatpush1.bf16.msra.mxu0 %v7148_v61  ;;  %v7222_v61 = vld [vmem:[#allocation8 + $0xa84] ss:$16 sps:$4 sm:$0xff]  }
 0x26b   :  { %4391 = vmatpush1.bf16.msra.mxu1 %v7151_v6  ;;  %4064 = vmatprep.subr.bf16.mxu0 %v7156_v9  ;;  %v7225_v6 = vld [vmem:[#allocation8 + $0xa8c] ss:$16 sps:$4 sm:$0xff]   ;;  %v7220_v9 = vld [vmem:[#allocation8 + $0xa80] ss:$16 sps:$4 sm:$0xff]  }
 0x26c   :  { %4392 = vmatprep.subr.bf16.mxu1 %v7159_v62  ;;  %v7223_v62 = vld [vmem:[#allocation8 + $0xa88] ss:$16 sps:$4 sm:$0xff]  }
 0x26e   :  { %4065 = vmatpush1.bf16.msra.mxu0 %v7154_v19  ;;  %v7228_v19 = vld [vmem:[#allocation8 + $0xaa4] ss:$16 sps:$4 sm:$0xff]  }
 0x26f   :  { %4393 = vmatpush1.bf16.msra.mxu1 %v7157_v12  ;;  %4066 = vmatprep.subr.bf16.mxu0 %v7162_v14  ;;  %v7231_v12 = vld [vmem:[#allocation8 + $0xaac] ss:$16 sps:$4 sm:$0xff]   ;;  %v7226_v14 = vld [vmem:[#allocation8 + $0xaa0] ss:$16 sps:$4 sm:$0xff]  }
 0x270   :  { %4394 = vmatprep.subr.bf16.mxu1 %v7165_v7  ;;  %v7229_v7 = vld [vmem:[#allocation8 + $0xaa8] ss:$16 sps:$4 sm:$0xff]  }
 0x272   :  { %4067 = vmatpush1.bf16.msra.mxu0 %v7160_v15  ;;  %v7234_v15 = vld [vmem:[#allocation8 + $0xac4] ss:$16 sps:$4 sm:$0xff]  }
 0x273   :  { %4395 = vmatpush1.bf16.msra.mxu1 %v7163_v40  ;;  %4068 = vmatprep.subr.bf16.mxu0 %v7168_v37  ;;  %v7237_v40 = vld [vmem:[#allocation8 + $0xacc] ss:$16 sps:$4 sm:$0xff]   ;;  %v7232_v37 = vld [vmem:[#allocation8 + $0xac0] ss:$16 sps:$4 sm:$0xff]  }
 0x274   :  { %4396 = vmatprep.subr.bf16.mxu1 %v7171_v16  ;;  %v7235_v16 = vld [vmem:[#allocation8 + $0xac8] ss:$16 sps:$4 sm:$0xff]  }
 0x276   :  { %4069 = vmatpush1.bf16.msra.mxu0 %v7166_v17  ;;  %v7240_v17 = vld [vmem:[#allocation8 + $0xae4] ss:$16 sps:$4 sm:$0xff]  }
 0x277   :  { %4397 = vmatpush1.bf16.msra.mxu1 %v7169_v36  ;;  %4070 = vmatprep.subr.bf16.mxu0 %v7174_v18  ;;  %v7243_v36 = vld [vmem:[#allocation8 + $0xaec] ss:$16 sps:$4 sm:$0xff]   ;;  %v7238_v18 = vld [vmem:[#allocation8 + $0xae0] ss:$16 sps:$4 sm:$0xff]  }
 0x278   :  { %4398 = vmatprep.subr.bf16.mxu1 %v7177_v20  ;;  %v7241_v20 = vld [vmem:[#allocation8 + $0xae8] ss:$16 sps:$4 sm:$0xff]  }
 0x27a   :  { %4071 = vmatpush1.bf16.msra.mxu0 %v7172_v21  ;;  %v7246_v21 = vld [vmem:[#allocation8 + $0xb04] ss:$16 sps:$4 sm:$0xff]  }
 0x27b   :  { %4399 = vmatpush1.bf16.msra.mxu1 %v7175_v54  ;;  %4072 = vmatprep.subr.bf16.mxu0 %v7180_v22  ;;  %v7249_v54 = vld [vmem:[#allocation8 + $0xb0c] ss:$16 sps:$4 sm:$0xff]   ;;  %v7244_v22 = vld [vmem:[#allocation8 + $0xb00] ss:$16 sps:$4 sm:$0xff]  }
 0x27c   :  { %4400 = vmatprep.subr.bf16.mxu1 %v7183_v23  ;;  %v7247_v23 = vld [vmem:[#allocation8 + $0xb08] ss:$16 sps:$4 sm:$0xff]  }
 0x27e   :  { %4073 = vmatpush1.bf16.msra.mxu0 %v7178_v24  ;;  %v7252_v24 = vld [vmem:[#allocation8 + $0xb24] ss:$16 sps:$4 sm:$0xff]  }
 0x27f   :  { %4401 = vmatpush1.bf16.msra.mxu1 %v7181_v26  ;;  %4074 = vmatprep.subr.bf16.mxu0 %v7186_v50  ;;  %v7250_v26 = vld [vmem:[#allocation8 + $0xb20] ss:$16 sps:$4 sm:$0xff]   ;;  %v7253_v50 = vld [vmem:[#allocation8 + $0xb28] ss:$16 sps:$4 sm:$0xff]  }
 0x280   :  { %4402 = vmatprep.subr.bf16.mxu1 %v7189_v27  ;;  %v7258_v27 = vld [vmem:[#allocation8 + $0xb44] ss:$16 sps:$4 sm:$0xff]  }
 0x282   :  { %4075 = vmatpush1.bf16.msra.mxu0 %v7184_v30  ;;  %v7256_v30 = vld [vmem:[#allocation8 + $0xb40] ss:$16 sps:$4 sm:$0xff]  }
 0x283   :  { %4403 = vmatpush1.bf16.msra.mxu1 %v7187_v33  ;;  %4076 = vmatprep.subr.bf16.mxu0 %v7192_v34  ;;  %v7264_v33 = vld [vmem:[#allocation8 + $0xb64] ss:$16 sps:$4 sm:$0xff]   ;;  %v7267_v34 = vld [vmem:[#allocation8 + $0xb6c] ss:$16 sps:$4 sm:$0xff]  }
 0x284   :  { %4404 = vmatprep.subr.bf16.mxu1 %v7195_v38  ;;  %v7262_v38 = vld [vmem:[#allocation8 + $0xb60] ss:$16 sps:$4 sm:$0xff]  }
 0x286   :  { %4077 = vmatpush1.bf16.msra.mxu0 %v7190_v43  ;;  %v7270_v43 = vld [vmem:[#allocation8 + $0xb84] ss:$16 sps:$4 sm:$0xff]  }
 0x287   :  { %4405 = vmatpush1.bf16.msra.mxu1 %v7193_v45  ;;  %4087 = vmatprep.subr.bf16.mxu0 %v7198_v46  ;;  %v7268_v45 = vld [vmem:[#allocation8 + $0xb80] ss:$16 sps:$4 sm:$0xff]   ;;  %v7271_v46 = vld [vmem:[#allocation8 + $0xb88] ss:$16 sps:$4 sm:$0xff]  }
 0x288   :  { %4415 = vmatprep.subr.bf16.mxu1 %v7201_v48  ;;  %v7276_v48 = vld [vmem:[#allocation8 + $0xba4] ss:$16 sps:$4 sm:$0xff]  }
 0x289   :  { %4079 = vmatmul.mubr.bf16.vlgmr.msra.gmra.mrb[16].mxu0 %v780_v56 }
 0x28a   :  { %4407 = vmatmul.mubr.bf16.vlgmr.msra.gmra.mrb[16].mxu1 %v780_v56  ;;  %4088 = vmatpush1.bf16.msra.mxu0 %v7196_v47  ;;  %v7274_v47 = vld [vmem:[#allocation8 + $0xba0] ss:$16 sps:$4 sm:$0xff]   ;;  %v227_v56 = vrot.slane %v8238_v11, %v8196_v42  ;;  %v7289_v11 = vld [vmem:[#allocation8 + $0xbe8] ss:$16 sps:$4 sm:$0xff]  }
 0x28b   :  { %4119 = vmatprep.mubr.bf16.mxu0 %v783_v55  ;;  %4416 = vmatpush1.bf16.msra.mxu1 %v7199_v51  ;;  %v7277_v51 = vld [vmem:[#allocation8 + $0xba8] ss:$16 sps:$4 sm:$0xff]  }
 0x28c   :  { %4447 = vmatprep.mubr.bf16.mxu1 %v783_v55  ;;  %4089 = vmatprep.subr.bf16.mxu0 %v7204_v52  ;;  %v7282_v52 = vld [vmem:[#allocation8 + $0xbc4] ss:$16 sps:$4 sm:$0xff]   ;;  %v7285_v55 = vld [vmem:[#allocation8 + $0xbcc] ss:$16 sps:$4 sm:$0xff]  }
 0x28d   :  { %4417 = vmatprep.subr.bf16.mxu1 %v7207_v31  ;;  %v7280_v31 = vld [vmem:[#allocation8 + $0xbc0] ss:$16 sps:$4 sm:$0xff]  }
 0x28e   :  { %4090 = vmatpush1.bf16.msra.mxu0 %v7202_v59  ;;  %v668_v59 = vadd.f32 %v8209_v28, %v227_v56  ;;  %v7352_v56 = vld [vmem:[#allocation8 + $0xd40] ss:$16 sps:$4 sm:$0xff]  }
 0x28f   :  { %4418 = vmatpush1.bf16.msra.mxu1 %v7205_v35  ;;  %4091 = vmatprep.subr.bf16.mxu0 %v7210_v60  ;;  %v7283_v35 = vld [vmem:[#allocation8 + $0xbc8] ss:$16 sps:$4 sm:$0xff]   ;;  %v7288_v60 = vld [vmem:[#allocation8 + $0xbe4] ss:$16 sps:$4 sm:$0xff]  }
 0x290   :  { %4419 = vmatprep.subr.bf16.mxu1 %v7213_v63  ;;  %v7291_v63 = vld [vmem:[#allocation8 + $0xbec] ss:$16 sps:$4 sm:$0xff]  }
 0x292   :  { %4092 = vmatpush1.bf16.msra.mxu0 %v7208_v2  ;;  %v7286_v2 = vld [vmem:[#allocation8 + $0xbe0] ss:$16 sps:$4 sm:$0xff]  }
 0x293   :  { %4420 = vmatpush1.bf16.msra.mxu1 %v7211_v41  ;;  %4093 = vmatprep.subr.bf16.mxu0 %v7216_v3  ;;  %v766_v41 = vmax.f32 %v668_v59, 0.0  ;;  %v7294_v3 = vld [vmem:[#allocation8 + $0xc04] ss:$16 sps:$4 sm:$0xff]   ;;  %v7361_v59 = vld [vmem:[#allocation8 + $0xd68] ss:$16 sps:$4 sm:$0xff]  }
 0x294   :  { %4421 = vmatprep.subr.bf16.mxu1 %v7219_v58  ;;  %v7297_v58 = vld [vmem:[#allocation8 + $0xc0c] ss:$16 sps:$4 sm:$0xff]  }
 0x295   :  { %v782_v28 = vpack.c.bf16 %v766_v41, %v766_v41  ;;  %v7372_v41 = vld [vmem:[#allocation8 + $0xda4] ss:$16 sps:$4 sm:$0xff]  }
 0x296   :  { %4094 = vmatpush1.bf16.msra.mxu0 %v7214_v4  ;;  %v769_v4 = vmax.f32 %v8193_v13, 0.0  ;;  %v7309_v13 = vld [vmem:[#allocation8 + $0xc4c] ss:$16 sps:$4 sm:$0xff]  }
 0x297   :  { %4422 = vmatpush1.bf16.msra.mxu1 %v7217_v5  ;;  %4095 = vmatprep.subr.bf16.mxu0 %v7222_v61  ;;  %v7292_v5 = vld [vmem:[#allocation8 + $0xc00] ss:$16 sps:$4 sm:$0xff]   ;;  %v7295_v61 = vld [vmem:[#allocation8 + $0xc08] ss:$16 sps:$4 sm:$0xff]  }
 0x298   :  { %4423 = vmatprep.subr.bf16.mxu1 %v7225_v6  ;;  %v7300_v6 = vld [vmem:[#allocation8 + $0xc24] ss:$16 sps:$4 sm:$0xff]  }
 0x29a   :  { %4096 = vmatpush1.bf16.msra.mxu0 %v7220_v9  ;;  %v785_v9 = vpack.c.bf16 %v769_v4, %v769_v4  ;;  %v7378_v4 = vld [vmem:[#allocation8 + $0xdc4] ss:$16 sps:$4 sm:$0xff]  }
 0x29b   :  { %4424 = vmatpush1.bf16.msra.mxu1 %v7223_v62  ;;  %4097 = vmatprep.subr.bf16.mxu0 %v7228_v19  ;;  %v7303_v62 = vld [vmem:[#allocation8 + $0xc2c] ss:$16 sps:$4 sm:$0xff]   ;;  %v7298_v19 = vld [vmem:[#allocation8 + $0xc20] ss:$16 sps:$4 sm:$0xff]  }
 0x29c   :  { %4425 = vmatprep.subr.bf16.mxu1 %v7231_v12  ;;  %v7301_v12 = vld [vmem:[#allocation8 + $0xc28] ss:$16 sps:$4 sm:$0xff]  }
 0x29e   :  { %4098 = vmatpush1.bf16.msra.mxu0 %v7226_v14  ;;  %v7306_v14 = vld [vmem:[#allocation8 + $0xc44] ss:$16 sps:$4 sm:$0xff]  }
 0x29f   :  { %4426 = vmatpush1.bf16.msra.mxu1 %v7229_v7  ;;  %4099 = vmatprep.subr.bf16.mxu0 %v7234_v15  ;;  %v7304_v7 = vld [vmem:[#allocation8 + $0xc40] ss:$16 sps:$4 sm:$0xff]   ;;  %v7307_v15 = vld [vmem:[#allocation8 + $0xc48] ss:$16 sps:$4 sm:$0xff]  }
 0x2a0   :  { %4427 = vmatprep.subr.bf16.mxu1 %v7237_v40  ;;  %v7312_v40 = vld [vmem:[#allocation8 + $0xc64] ss:$16 sps:$4 sm:$0xff]  }
 0x2a2   :  { %4100 = vmatpush1.bf16.msra.mxu0 %v7232_v37  ;;  %v7315_v37 = vld [vmem:[#allocation8 + $0xc6c] ss:$16 sps:$4 sm:$0xff]  }
 0x2a3   :  { %4428 = vmatpush1.bf16.msra.mxu1 %v7235_v16  ;;  %4101 = vmatprep.subr.bf16.mxu0 %v7240_v17  ;;  %v7310_v16 = vld [vmem:[#allocation8 + $0xc60] ss:$16 sps:$4 sm:$0xff]   ;;  %v7313_v17 = vld [vmem:[#allocation8 + $0xc68] ss:$16 sps:$4 sm:$0xff]  }
 0x2a4   :  { %4429 = vmatprep.subr.bf16.mxu1 %v7243_v36  ;;  %v7318_v36 = vld [vmem:[#allocation8 + $0xc84] ss:$16 sps:$4 sm:$0xff]  }
 0x2a6   :  { %4102 = vmatpush1.bf16.msra.mxu0 %v7238_v18  ;;  %v7321_v18 = vld [vmem:[#allocation8 + $0xc8c] ss:$16 sps:$4 sm:$0xff]  }
 0x2a7   :  { %4430 = vmatpush1.bf16.msra.mxu1 %v7241_v20  ;;  %4103 = vmatprep.subr.bf16.mxu0 %v7246_v21  ;;  %v7316_v20 = vld [vmem:[#allocation8 + $0xc80] ss:$16 sps:$4 sm:$0xff]   ;;  %v7319_v21 = vld [vmem:[#allocation8 + $0xc88] ss:$16 sps:$4 sm:$0xff]  }
 0x2a8   :  { %4431 = vmatprep.subr.bf16.mxu1 %v7249_v54  ;;  %v7324_v54 = vld [vmem:[#allocation8 + $0xca4] ss:$16 sps:$4 sm:$0xff]  }
 0x2aa   :  { %4104 = vmatpush1.bf16.msra.mxu0 %v7244_v22  ;;  %v7327_v22 = vld [vmem:[#allocation8 + $0xcac] ss:$16 sps:$4 sm:$0xff]  }
 0x2ab   :  { %4432 = vmatpush1.bf16.msra.mxu1 %v7247_v23  ;;  %4105 = vmatprep.subr.bf16.mxu0 %v7252_v24  ;;  %v7322_v23 = vld [vmem:[#allocation8 + $0xca0] ss:$16 sps:$4 sm:$0xff]   ;;  %v7325_v24 = vld [vmem:[#allocation8 + $0xca8] ss:$16 sps:$4 sm:$0xff]  }
 0x2ac   :  { %4433 = vmatprep.subr.bf16.mxu1 %v7255_v25  ;;  %v7330_v25 = vld [vmem:[#allocation8 + $0xcc4] ss:$16 sps:$4 sm:$0xff]  }
 0x2ae   :  { %4106 = vmatpush1.bf16.msra.mxu0 %v7250_v26  ;;  %v7333_v26 = vld [vmem:[#allocation8 + $0xccc] ss:$16 sps:$4 sm:$0xff]  }
 0x2af   :  { %4434 = vmatpush1.bf16.msra.mxu1 %v7253_v50  ;;  %4107 = vmatprep.subr.bf16.mxu0 %v7258_v27  ;;  %v7328_v50 = vld [vmem:[#allocation8 + $0xcc0] ss:$16 sps:$4 sm:$0xff]   ;;  %v7331_v27 = vld [vmem:[#allocation8 + $0xcc8] ss:$16 sps:$4 sm:$0xff]  }
 0x2b0   :  { %4435 = vmatprep.subr.bf16.mxu1 %v7261_v29  ;;  %v7336_v29 = vld [vmem:[#allocation8 + $0xce4] ss:$16 sps:$4 sm:$0xff]  }
 0x2b2   :  { %4108 = vmatpush1.bf16.msra.mxu0 %v7256_v30  ;;  %v7339_v30 = vld [vmem:[#allocation8 + $0xcec] ss:$16 sps:$4 sm:$0xff]  }
 0x2b3   :  { %4436 = vmatpush1.bf16.msra.mxu1 %v7259_v32  ;;  %4109 = vmatprep.subr.bf16.mxu0 %v7264_v33  ;;  %v7334_v32 = vld [vmem:[#allocation8 + $0xce0] ss:$16 sps:$4 sm:$0xff]   ;;  %v7337_v33 = vld [vmem:[#allocation8 + $0xce8] ss:$16 sps:$4 sm:$0xff]  }
 0x2b4   :  { %4437 = vmatprep.subr.bf16.mxu1 %v7267_v34  ;;  %v7342_v34 = vld [vmem:[#allocation8 + $0xd04] ss:$16 sps:$4 sm:$0xff]  }
 0x2b6   :  { %4110 = vmatpush1.bf16.msra.mxu0 %v7262_v38  ;;  %v7345_v38 = vld [vmem:[#allocation8 + $0xd0c] ss:$16 sps:$4 sm:$0xff]  }
 0x2b7   :  { %4438 = vmatpush1.bf16.msra.mxu1 %v7265_v39  ;;  %4111 = vmatprep.subr.bf16.mxu0 %v7270_v43  ;;  %v7340_v39 = vld [vmem:[#allocation8 + $0xd00] ss:$16 sps:$4 sm:$0xff]   ;;  %v7343_v43 = vld [vmem:[#allocation8 + $0xd08] ss:$16 sps:$4 sm:$0xff]  }
 0x2b8   :  { %4439 = vmatprep.subr.bf16.mxu1 %v7273_v44  ;;  %v7348_v44 = vld [vmem:[#allocation8 + $0xd24] ss:$16 sps:$4 sm:$0xff]  }
 0x2ba   :  { %4112 = vmatpush1.bf16.msra.mxu0 %v7268_v45  ;;  %v7351_v45 = vld [vmem:[#allocation8 + $0xd2c] ss:$16 sps:$4 sm:$0xff]  }
 0x2bb   :  { %4440 = vmatpush1.bf16.msra.mxu1 %v7271_v46  ;;  %4113 = vmatprep.subr.bf16.mxu0 %v7276_v48  ;;  %v7346_v46 = vld [vmem:[#allocation8 + $0xd20] ss:$16 sps:$4 sm:$0xff]   ;;  %v7349_v48 = vld [vmem:[#allocation8 + $0xd28] ss:$16 sps:$4 sm:$0xff]  }
 0x2bc   :  { %4441 = vmatprep.subr.bf16.mxu1 %v7279_v49  ;;  %v7354_v49 = vld [vmem:[#allocation8 + $0xd44] ss:$16 sps:$4 sm:$0xff]  }
 0x2be   :  { %4114 = vmatpush1.bf16.msra.mxu0 %v7274_v47  ;;  %v7357_v47 = vld [vmem:[#allocation8 + $0xd4c] ss:$16 sps:$4 sm:$0xff]  }
 0x2bf   :  { %4442 = vmatpush1.bf16.msra.mxu1 %v7277_v51  ;;  %4115 = vmatprep.subr.bf16.mxu0 %v7282_v52  ;;  %v7355_v51 = vld [vmem:[#allocation8 + $0xd48] ss:$16 sps:$4 sm:$0xff]   ;;  %v7360_v52 = vld [vmem:[#allocation8 + $0xd64] ss:$16 sps:$4 sm:$0xff]  }
 0x2c0   :  { %4443 = vmatprep.subr.bf16.mxu1 %v7285_v55  ;;  %v7363_v55 = vld [vmem:[#allocation8 + $0xd6c] ss:$16 sps:$4 sm:$0xff]  }
 0x2c2   :  { %4116 = vmatpush1.bf16.msra.mxu0 %v7280_v31  ;;  %v7358_v31 = vld [vmem:[#allocation8 + $0xd60] ss:$16 sps:$4 sm:$0xff]  }
 0x2c3   :  { %4444 = vmatpush1.bf16.msra.mxu1 %v7283_v35  ;;  %4117 = vmatprep.subr.bf16.mxu0 %v7288_v60  ;;  %v7366_v35 = vld [vmem:[#allocation8 + $0xd84] ss:$16 sps:$4 sm:$0xff]   ;;  %v7369_v60 = vld [vmem:[#allocation8 + $0xd8c] ss:$16 sps:$4 sm:$0xff]  }
 0x2c4   :  { %4445 = vmatprep.subr.bf16.mxu1 %v7291_v63  ;;  %v7364_v63 = vld [vmem:[#allocation8 + $0xd80] ss:$16 sps:$4 sm:$0xff]  }
 0x2c6   :  { %4118 = vmatpush1.bf16.msra.mxu0 %v7286_v2  ;;  %v7367_v2 = vld [vmem:[#allocation8 + $0xd88] ss:$16 sps:$4 sm:$0xff]  }
 0x2c7   :  { %4446 = vmatpush1.bf16.msra.mxu1 %v7289_v11  ;;  %4128 = vmatprep.subr.bf16.mxu0 %v7294_v3  ;;  %v7375_v11 = vld [vmem:[#allocation8 + $0xdac] ss:$16 sps:$4 sm:$0xff]   ;;  %v7370_v3 = vld [vmem:[#allocation8 + $0xda0] ss:$16 sps:$4 sm:$0xff]  }
 0x2c8   :  { %4456 = vmatprep.subr.bf16.mxu1 %v7297_v58  ;;  %v7373_v58 = vld [vmem:[#allocation8 + $0xda8] ss:$16 sps:$4 sm:$0xff]  }
 0x2c9   :  { %4120 = vmatmul.mubr.bf16.vlgmr.msra.gmra.mrb[16].mxu0 %v782_v28 }
 0x2ca   :  { %4448 = vmatmul.mubr.bf16.vlgmr.msra.gmra.mrb[16].mxu1 %v782_v28  ;;  %4129 = vmatpush1.bf16.msra.mxu0 %v7292_v5  ;;  %v7381_v5 = vld [vmem:[#allocation8 + $0xdcc] ss:$16 sps:$4 sm:$0xff]   ;;  %v7376_v28 = vld [vmem:[#allocation8 + $0xdc0] ss:$16 sps:$4 sm:$0xff]  }
 0x2cb   :  { %4160 = vmatprep.mubr.bf16.mxu0 %v785_v9  ;;  %4457 = vmatpush1.bf16.msra.mxu1 %v7295_v61  ;;  %v7379_v61 = vld [vmem:[#allocation8 + $0xdc8] ss:$16 sps:$4 sm:$0xff]  }
 0x2cc   :  { %4488 = vmatprep.mubr.bf16.mxu1 %v785_v9  ;;  %4130 = vmatprep.subr.bf16.mxu0 %v7300_v6  ;;  %v7384_v6 = vld [vmem:[#allocation8 + $0xde4] ss:$16 sps:$4 sm:$0xff]   ;;  %v7387_v9 = vld [vmem:[#allocation8 + $0xdec] ss:$16 sps:$4 sm:$0xff]  }
 0x2cd   :  { %4458 = vmatprep.subr.bf16.mxu1 %v7303_v62  ;;  %v7382_v62 = vld [vmem:[#allocation8 + $0xde0] ss:$16 sps:$4 sm:$0xff]  }
 0x2ce   :  { %4131 = vmatpush1.bf16.msra.mxu0 %v7298_v19  ;;  %v768_v19 = vmax.f32 %v8188_v1, 0.0  ;;  %v7394_v1 = vld [vmem:[#allocation8 + $0xe20] ss:$16 sps:$4 sm:$0xff]  }
 0x2cf   :  { %4459 = vmatpush1.bf16.msra.mxu1 %v7301_v12  ;;  %4132 = vmatprep.subr.bf16.mxu0 %v7306_v14  ;;  %v7385_v12 = vld [vmem:[#allocation8 + $0xde8] ss:$16 sps:$4 sm:$0xff]   ;;  %v7390_v14 = vld [vmem:[#allocation8 + $0xe04] ss:$16 sps:$4 sm:$0xff]  }
 0x2d0   :  { %4460 = vmatprep.subr.bf16.mxu1 %v7309_v13  ;;  %v7393_v13 = vld [vmem:[#allocation8 + $0xe0c] ss:$16 sps:$4 sm:$0xff]  }
 0x2d2   :  { %4133 = vmatpush1.bf16.msra.mxu0 %v7304_v7  ;;  %v771_v7 = vmax.f32 %v8223_v57, 0.0  ;;  %v7405_v57 = vld [vmem:[#allocation8 + $0xe4c] ss:$16 sps:$4 sm:$0xff]  }
 0x2d3   :  { %4461 = vmatpush1.bf16.msra.mxu1 %v7307_v15  ;;  %4134 = vmatprep.subr.bf16.mxu0 %v7312_v40  ;;  %v7388_v15 = vld [vmem:[#allocation8 + $0xe00] ss:$16 sps:$4 sm:$0xff]   ;;  %v784_v40 = vpack.c.bf16 %v768_v19, %v768_v19 }
 0x2d4   :  { %4462 = vmatprep.subr.bf16.mxu1 %v7315_v37  ;;  %v7391_v37 = vld [vmem:[#allocation8 + $0xe08] ss:$16 sps:$4 sm:$0xff]   ;;  %v7466_v19 = vld [vmem:[#allocation8 + $0xfa0] ss:$16 sps:$4 sm:$0xff]  }
 0x2d6   :  { %4135 = vmatpush1.bf16.msra.mxu0 %v7310_v16  ;;  %v7396_v16 = vld [vmem:[#allocation8 + $0xe24] ss:$16 sps:$4 sm:$0xff]  }
 0x2d7   :  { %4463 = vmatpush1.bf16.msra.mxu1 %v7313_v17  ;;  %4136 = vmatprep.subr.bf16.mxu0 %v7318_v36  ;;  %v787_v17 = vpack.c.bf16 %v771_v7, %v771_v7  ;;  %v7399_v36 = vld [vmem:[#allocation8 + $0xe2c] ss:$16 sps:$4 sm:$0xff]   ;;  %v7472_v7 = vld [vmem:[#allocation8 + $0xfc0] ss:$16 sps:$4 sm:$0xff]  }
 0x2d8   :  { %4464 = vmatprep.subr.bf16.mxu1 %v7321_v18  ;;  %v7397_v18 = vld [vmem:[#allocation8 + $0xe28] ss:$16 sps:$4 sm:$0xff]  }
 0x2da   :  { %4137 = vmatpush1.bf16.msra.mxu0 %v7316_v20  ;;  %v7402_v20 = vld [vmem:[#allocation8 + $0xe44] ss:$16 sps:$4 sm:$0xff]  }
 0x2db   :  { %4465 = vmatpush1.bf16.msra.mxu1 %v7319_v21  ;;  %4138 = vmatprep.subr.bf16.mxu0 %v7324_v54  ;;  %v7400_v21 = vld [vmem:[#allocation8 + $0xe40] ss:$16 sps:$4 sm:$0xff]   ;;  %v7403_v54 = vld [vmem:[#allocation8 + $0xe48] ss:$16 sps:$4 sm:$0xff]  }
 0x2dc   :  { %4466 = vmatprep.subr.bf16.mxu1 %v7327_v22  ;;  %v7408_v22 = vld [vmem:[#allocation8 + $0xe64] ss:$16 sps:$4 sm:$0xff]  }
 0x2de   :  { %4139 = vmatpush1.bf16.msra.mxu0 %v7322_v23  ;;  %v7411_v23 = vld [vmem:[#allocation8 + $0xe6c] ss:$16 sps:$4 sm:$0xff]  }
 0x2df   :  { %4467 = vmatpush1.bf16.msra.mxu1 %v7325_v24  ;;  %4140 = vmatprep.subr.bf16.mxu0 %v7330_v25  ;;  %v7406_v24 = vld [vmem:[#allocation8 + $0xe60] ss:$16 sps:$4 sm:$0xff]   ;;  %v7409_v25 = vld [vmem:[#allocation8 + $0xe68] ss:$16 sps:$4 sm:$0xff]  }
 0x2e0   :  { %4468 = vmatprep.subr.bf16.mxu1 %v7333_v26  ;;  %v7414_v26 = vld [vmem:[#allocation8 + $0xe84] ss:$16 sps:$4 sm:$0xff]  }
 0x2e2   :  { %4141 = vmatpush1.bf16.msra.mxu0 %v7328_v50  ;;  %v7417_v50 = vld [vmem:[#allocation8 + $0xe8c] ss:$16 sps:$4 sm:$0xff]  }
 0x2e3   :  { %4469 = vmatpush1.bf16.msra.mxu1 %v7331_v27  ;;  %4142 = vmatprep.subr.bf16.mxu0 %v7336_v29  ;;  %v7412_v27 = vld [vmem:[#allocation8 + $0xe80] ss:$16 sps:$4 sm:$0xff]   ;;  %v7415_v29 = vld [vmem:[#allocation8 + $0xe88] ss:$16 sps:$4 sm:$0xff]  }
 0x2e4   :  { %4470 = vmatprep.subr.bf16.mxu1 %v7339_v30  ;;  %v7420_v30 = vld [vmem:[#allocation8 + $0xea4] ss:$16 sps:$4 sm:$0xff]  }
 0x2e6   :  { %4143 = vmatpush1.bf16.msra.mxu0 %v7334_v32  ;;  %v7423_v32 = vld [vmem:[#allocation8 + $0xeac] ss:$16 sps:$4 sm:$0xff]  }
 0x2e7   :  { %4471 = vmatpush1.bf16.msra.mxu1 %v7337_v33  ;;  %4144 = vmatprep.subr.bf16.mxu0 %v7342_v34  ;;  %v7418_v33 = vld [vmem:[#allocation8 + $0xea0] ss:$16 sps:$4 sm:$0xff]   ;;  %v7421_v34 = vld [vmem:[#allocation8 + $0xea8] ss:$16 sps:$4 sm:$0xff]  }
 0x2e8   :  { %4472 = vmatprep.subr.bf16.mxu1 %v7345_v38  ;;  %v7426_v38 = vld [vmem:[#allocation8 + $0xec4] ss:$16 sps:$4 sm:$0xff]  }
 0x2ea   :  { %4145 = vmatpush1.bf16.msra.mxu0 %v7340_v39  ;;  %v7429_v39 = vld [vmem:[#allocation8 + $0xecc] ss:$16 sps:$4 sm:$0xff]  }
 0x2eb   :  { %4473 = vmatpush1.bf16.msra.mxu1 %v7343_v43  ;;  %4146 = vmatprep.subr.bf16.mxu0 %v7348_v44  ;;  %v7424_v43 = vld [vmem:[#allocation8 + $0xec0] ss:$16 sps:$4 sm:$0xff]   ;;  %v7427_v44 = vld [vmem:[#allocation8 + $0xec8] ss:$16 sps:$4 sm:$0xff]  }
 0x2ec   :  { %4474 = vmatprep.subr.bf16.mxu1 %v7351_v45  ;;  %v7432_v45 = vld [vmem:[#allocation8 + $0xee4] ss:$16 sps:$4 sm:$0xff]  }
 0x2ee   :  { %4147 = vmatpush1.bf16.msra.mxu0 %v7346_v46  ;;  %v7435_v46 = vld [vmem:[#allocation8 + $0xeec] ss:$16 sps:$4 sm:$0xff]  }
 0x2ef   :  { %4475 = vmatpush1.bf16.msra.mxu1 %v7349_v48  ;;  %4148 = vmatprep.subr.bf16.mxu0 %v7354_v49  ;;  %v7430_v48 = vld [vmem:[#allocation8 + $0xee0] ss:$16 sps:$4 sm:$0xff]   ;;  %v7433_v49 = vld [vmem:[#allocation8 + $0xee8] ss:$16 sps:$4 sm:$0xff]  }
 0x2f0   :  { %4476 = vmatprep.subr.bf16.mxu1 %v7357_v47  ;;  %v7438_v47 = vld [vmem:[#allocation8 + $0xf04] ss:$16 sps:$4 sm:$0xff]  }
 0x2f2   :  { %4149 = vmatpush1.bf16.msra.mxu0 %v7352_v56  ;;  %v7441_v56 = vld [vmem:[#allocation8 + $0xf0c] ss:$16 sps:$4 sm:$0xff]  }
 0x2f3   :  { %4477 = vmatpush1.bf16.msra.mxu1 %v7355_v51  ;;  %4150 = vmatprep.subr.bf16.mxu0 %v7360_v52  ;;  %v7436_v51 = vld [vmem:[#allocation8 + $0xf00] ss:$16 sps:$4 sm:$0xff]   ;;  %v7439_v52 = vld [vmem:[#allocation8 + $0xf08] ss:$16 sps:$4 sm:$0xff]  }
 0x2f4   :  { %4478 = vmatprep.subr.bf16.mxu1 %v7363_v55  ;;  %v7444_v55 = vld [vmem:[#allocation8 + $0xf24] ss:$16 sps:$4 sm:$0xff]  }
 0x2f6   :  { %4151 = vmatpush1.bf16.msra.mxu0 %v7358_v31  ;;  %v7447_v31 = vld [vmem:[#allocation8 + $0xf2c] ss:$16 sps:$4 sm:$0xff]  }
 0x2f7   :  { %4479 = vmatpush1.bf16.msra.mxu1 %v7361_v59  ;;  %4152 = vmatprep.subr.bf16.mxu0 %v7366_v35  ;;  %v7442_v59 = vld [vmem:[#allocation8 + $0xf20] ss:$16 sps:$4 sm:$0xff]   ;;  %v7445_v35 = vld [vmem:[#allocation8 + $0xf28] ss:$16 sps:$4 sm:$0xff]  }
 0x2f8   :  { %4480 = vmatprep.subr.bf16.mxu1 %v7369_v60  ;;  %v7450_v60 = vld [vmem:[#allocation8 + $0xf44] ss:$16 sps:$4 sm:$0xff]  }
 0x2fa   :  { %4153 = vmatpush1.bf16.msra.mxu0 %v7364_v63  ;;  %v7453_v63 = vld [vmem:[#allocation8 + $0xf4c] ss:$16 sps:$4 sm:$0xff]  }
 0x2fb   :  { %4481 = vmatpush1.bf16.msra.mxu1 %v7367_v2  ;;  %4154 = vmatprep.subr.bf16.mxu0 %v7372_v41  ;;  %v7448_v2 = vld [vmem:[#allocation8 + $0xf40] ss:$16 sps:$4 sm:$0xff]   ;;  %v7451_v41 = vld [vmem:[#allocation8 + $0xf48] ss:$16 sps:$4 sm:$0xff]  }
 0x2fc   :  { %4482 = vmatprep.subr.bf16.mxu1 %v7375_v11  ;;  %v7456_v11 = vld [vmem:[#allocation8 + $0xf64] ss:$16 sps:$4 sm:$0xff]  }
 0x2fe   :  { %4155 = vmatpush1.bf16.msra.mxu0 %v7370_v3  ;;  %v7459_v3 = vld [vmem:[#allocation8 + $0xf6c] ss:$16 sps:$4 sm:$0xff]  }
 0x2ff   :  { %4483 = vmatpush1.bf16.msra.mxu1 %v7373_v58  ;;  %4156 = vmatprep.subr.bf16.mxu0 %v7378_v4  ;;  %v7454_v58 = vld [vmem:[#allocation8 + $0xf60] ss:$16 sps:$4 sm:$0xff]   ;;  %v7457_v4 = vld [vmem:[#allocation8 + $0xf68] ss:$16 sps:$4 sm:$0xff]  }
 0x300   :  { %4484 = vmatprep.subr.bf16.mxu1 %v7381_v5  ;;  %v7462_v5 = vld [vmem:[#allocation8 + $0xf84] ss:$16 sps:$4 sm:$0xff]  }
 0x302   :  { %4157 = vmatpush1.bf16.msra.mxu0 %v7376_v28  ;;  %v7465_v28 = vld [vmem:[#allocation8 + $0xf8c] ss:$16 sps:$4 sm:$0xff]  }
 0x303   :  { %4485 = vmatpush1.bf16.msra.mxu1 %v7379_v61  ;;  %4158 = vmatprep.subr.bf16.mxu0 %v7384_v6  ;;  %v7460_v61 = vld [vmem:[#allocation8 + $0xf80] ss:$16 sps:$4 sm:$0xff]   ;;  %v7463_v6 = vld [vmem:[#allocation8 + $0xf88] ss:$16 sps:$4 sm:$0xff]  }
 0x304   :  { %4486 = vmatprep.subr.bf16.mxu1 %v7387_v9  ;;  %v7468_v9 = vld [vmem:[#allocation8 + $0xfa4] ss:$16 sps:$4 sm:$0xff]  }
 0x306   :  { %4159 = vmatpush1.bf16.msra.mxu0 %v7382_v62  ;;  %v7471_v62 = vld [vmem:[#allocation8 + $0xfac] ss:$16 sps:$4 sm:$0xff]  }
 0x307   :  { %4487 = vmatpush1.bf16.msra.mxu1 %v7385_v12  ;;  %4169 = vmatprep.subr.bf16.mxu0 %v7390_v14  ;;  %v7469_v12 = vld [vmem:[#allocation8 + $0xfa8] ss:$16 sps:$4 sm:$0xff]   ;;  %v7474_v14 = vld [vmem:[#allocation8 + $0xfc4] ss:$16 sps:$4 sm:$0xff]  }
 0x308   :  { %4497 = vmatprep.subr.bf16.mxu1 %v7393_v13  ;;  %v7477_v13 = vld [vmem:[#allocation8 + $0xfcc] ss:$16 sps:$4 sm:$0xff]  }
 0x309   :  { %4161 = vmatmul.mubr.bf16.vlgmr.msra.gmra.mrb[16].mxu0 %v784_v40 }
 0x30a   :  { %4489 = vmatmul.mubr.bf16.vlgmr.msra.gmra.mrb[16].mxu1 %v784_v40  ;;  %4170 = vmatpush1.bf16.msra.mxu0 %v7388_v15  ;;  %v7475_v15 = vld [vmem:[#allocation8 + $0xfc8] ss:$16 sps:$4 sm:$0xff]   ;;  %v7480_v40 = vld [vmem:[#allocation8 + $0xfe4] ss:$16 sps:$4 sm:$0xff]  }
 0x30b   :  { %4201 = vmatprep.mubr.bf16.mxu0 %v787_v17  ;;  %4498 = vmatpush1.bf16.msra.mxu1 %v7391_v37  ;;  %v7483_v37 = vld [vmem:[#allocation8 + $0xfec] ss:$16 sps:$4 sm:$0xff]  }
 0x30c   :  { %4529 = vmatprep.mubr.bf16.mxu1 %v787_v17  ;;  %4171 = vmatprep.subr.bf16.mxu0 %v7396_v16  ;;  %v7478_v16 = vld [vmem:[#allocation8 + $0xfe0] ss:$16 sps:$4 sm:$0xff]   ;;  %v770_v17 = vmax.f32 %v8221_v53, 0.0  ;;  %v7493_v53 = vld [vmem:[#allocation11 + $0x28] ss:$16 sps:$4 sm:$0xff]  }
 0x30d   :  { %4499 = vmatprep.subr.bf16.mxu1 %v7399_v36  ;;  %v7481_v36 = vld [vmem:[#allocation8 + $0xfe8] ss:$16 sps:$4 sm:$0xff]  }
 0x30e   :  { %4172 = vmatpush1.bf16.msra.mxu0 %v7394_v1  ;;  %v7486_v1 = vld [vmem:[#allocation11 + $0x4] ss:$16 sps:$4 sm:$0xff]  }
 0x30f   :  { %4500 = vmatpush1.bf16.msra.mxu1 %v7397_v18  ;;  %4173 = vmatprep.subr.bf16.mxu0 %v7402_v20  ;;  %v7489_v18 = vld [vmem:[#allocation11 + $0xc] ss:$16 sps:$4 sm:$0xff]   ;;  %v7484_v20 = vld [vmem:[#allocation11] ss:$16 sps:$4 sm:$0xff]  }
 0x310   :  { %4501 = vmatprep.subr.bf16.mxu1 %v7405_v57  ;;  %v786_v57 = vpack.c.bf16 %v770_v17, %v770_v17  ;;  %v7573_v17 = vld [vmem:[#allocation11 + $0x1cc] ss:$16 sps:$4 sm:$0xff]  }
 0x312   :  { %4174 = vmatpush1.bf16.msra.mxu0 %v7400_v21  ;;  %v7487_v21 = vld [vmem:[#allocation11 + $0x8] ss:$16 sps:$4 sm:$0xff]  }
 0x313   :  { %4502 = vmatpush1.bf16.msra.mxu1 %v7403_v54  ;;  %4175 = vmatprep.subr.bf16.mxu0 %v7408_v22  ;;  %v7492_v54 = vld [vmem:[#allocation11 + $0x24] ss:$16 sps:$4 sm:$0xff]   ;;  %v7495_v22 = vld [vmem:[#allocation11 + $0x2c] ss:$16 sps:$4 sm:$0xff]  }
 0x314   :  { %4503 = vmatprep.subr.bf16.mxu1 %v7411_v23  ;;  %v7490_v23 = vld [vmem:[#allocation11 + $0x20] ss:$16 sps:$4 sm:$0xff]  }
 0x316   :  { %4176 = vmatpush1.bf16.msra.mxu0 %v7406_v24  ;;  %v7498_v24 = vld [vmem:[#allocation11 + $0x44] ss:$16 sps:$4 sm:$0xff]  }
 0x317   :  { %4504 = vmatpush1.bf16.msra.mxu1 %v7409_v25  ;;  %4177 = vmatprep.subr.bf16.mxu0 %v7414_v26  ;;  %v7501_v25 = vld [vmem:[#allocation11 + $0x4c] ss:$16 sps:$4 sm:$0xff]   ;;  %v7496_v26 = vld [vmem:[#allocation11 + $0x40] ss:$16 sps:$4 sm:$0xff]  }
 0x318   :  { %4505 = vmatprep.subr.bf16.mxu1 %v7417_v50  ;;  %v7499_v50 = vld [vmem:[#allocation11 + $0x48] ss:$16 sps:$4 sm:$0xff]  }
 0x31a   :  { %4178 = vmatpush1.bf16.msra.mxu0 %v7412_v27  ;;  %v7504_v27 = vld [vmem:[#allocation11 + $0x64] ss:$16 sps:$4 sm:$0xff]  }
 0x31b   :  { %4506 = vmatpush1.bf16.msra.mxu1 %v7415_v29  ;;  %4179 = vmatprep.subr.bf16.mxu0 %v7420_v30  ;;  %v7507_v29 = vld [vmem:[#allocation11 + $0x6c] ss:$16 sps:$4 sm:$0xff]   ;;  %v7502_v30 = vld [vmem:[#allocation11 + $0x60] ss:$16 sps:$4 sm:$0xff]  }
 0x31c   :  { %4507 = vmatprep.subr.bf16.mxu1 %v7423_v32  ;;  %v7505_v32 = vld [vmem:[#allocation11 + $0x68] ss:$16 sps:$4 sm:$0xff]  }
 0x31e   :  { %4180 = vmatpush1.bf16.msra.mxu0 %v7418_v33  ;;  %v7510_v33 = vld [vmem:[#allocation11 + $0x84] ss:$16 sps:$4 sm:$0xff]  }
 0x31f   :  { %4508 = vmatpush1.bf16.msra.mxu1 %v7421_v34  ;;  %4181 = vmatprep.subr.bf16.mxu0 %v7426_v38  ;;  %v7513_v34 = vld [vmem:[#allocation11 + $0x8c] ss:$16 sps:$4 sm:$0xff]   ;;  %v7508_v38 = vld [vmem:[#allocation11 + $0x80] ss:$16 sps:$4 sm:$0xff]  }
 0x320   :  { %4509 = vmatprep.subr.bf16.mxu1 %v7429_v39  ;;  %v7511_v39 = vld [vmem:[#allocation11 + $0x88] ss:$16 sps:$4 sm:$0xff]  }
 0x322   :  { %4182 = vmatpush1.bf16.msra.mxu0 %v7424_v43  ;;  %v7516_v43 = vld [vmem:[#allocation11 + $0xa4] ss:$16 sps:$4 sm:$0xff]  }
 0x323   :  { %4510 = vmatpush1.bf16.msra.mxu1 %v7427_v44  ;;  %4183 = vmatprep.subr.bf16.mxu0 %v7432_v45  ;;  %v7519_v44 = vld [vmem:[#allocation11 + $0xac] ss:$16 sps:$4 sm:$0xff]   ;;  %v7514_v45 = vld [vmem:[#allocation11 + $0xa0] ss:$16 sps:$4 sm:$0xff]  }
 0x324   :  { %4511 = vmatprep.subr.bf16.mxu1 %v7435_v46  ;;  %v7517_v46 = vld [vmem:[#allocation11 + $0xa8] ss:$16 sps:$4 sm:$0xff]  }
 0x326   :  { %4184 = vmatpush1.bf16.msra.mxu0 %v7430_v48  ;;  %v7522_v48 = vld [vmem:[#allocation11 + $0xc4] ss:$16 sps:$4 sm:$0xff]  }
 0x327   :  { %4512 = vmatpush1.bf16.msra.mxu1 %v7433_v49  ;;  %4185 = vmatprep.subr.bf16.mxu0 %v7438_v47  ;;  %v7525_v49 = vld [vmem:[#allocation11 + $0xcc] ss:$16 sps:$4 sm:$0xff]   ;;  %v7520_v47 = vld [vmem:[#allocation11 + $0xc0] ss:$16 sps:$4 sm:$0xff]  }
 0x328   :  { %4513 = vmatprep.subr.bf16.mxu1 %v7441_v56  ;;  %v7523_v56 = vld [vmem:[#allocation11 + $0xc8] ss:$16 sps:$4 sm:$0xff]  }
 0x32a   :  { %4186 = vmatpush1.bf16.msra.mxu0 %v7436_v51  ;;  %v7528_v51 = vld [vmem:[#allocation11 + $0xe4] ss:$16 sps:$4 sm:$0xff]  }
 0x32b   :  { %4514 = vmatpush1.bf16.msra.mxu1 %v7439_v52  ;;  %4187 = vmatprep.subr.bf16.mxu0 %v7444_v55  ;;  %v7531_v52 = vld [vmem:[#allocation11 + $0xec] ss:$16 sps:$4 sm:$0xff]   ;;  %v7526_v55 = vld [vmem:[#allocation11 + $0xe0] ss:$16 sps:$4 sm:$0xff]  }
 0x32c   :  { %4515 = vmatprep.subr.bf16.mxu1 %v7447_v31  ;;  %v7529_v31 = vld [vmem:[#allocation11 + $0xe8] ss:$16 sps:$4 sm:$0xff]  }
 0x32e   :  { %4188 = vmatpush1.bf16.msra.mxu0 %v7442_v59  ;;  %v7534_v59 = vld [vmem:[#allocation11 + $0x104] ss:$16 sps:$4 sm:$0xff]  }
 0x32f   :  { %4516 = vmatpush1.bf16.msra.mxu1 %v7445_v35  ;;  %4189 = vmatprep.subr.bf16.mxu0 %v7450_v60  ;;  %v7537_v35 = vld [vmem:[#allocation11 + $0x10c] ss:$16 sps:$4 sm:$0xff]   ;;  %v7532_v60 = vld [vmem:[#allocation11 + $0x100] ss:$16 sps:$4 sm:$0xff]  }
 0x330   :  { %4517 = vmatprep.subr.bf16.mxu1 %v7453_v63  ;;  %v7535_v63 = vld [vmem:[#allocation11 + $0x108] ss:$16 sps:$4 sm:$0xff]  }
 0x332   :  { %4190 = vmatpush1.bf16.msra.mxu0 %v7448_v2  ;;  %v7540_v2 = vld [vmem:[#allocation11 + $0x124] ss:$16 sps:$4 sm:$0xff]  }
 0x333   :  { %4518 = vmatpush1.bf16.msra.mxu1 %v7451_v41  ;;  %4191 = vmatprep.subr.bf16.mxu0 %v7456_v11  ;;  %v7543_v41 = vld [vmem:[#allocation11 + $0x12c] ss:$16 sps:$4 sm:$0xff]   ;;  %v7538_v11 = vld [vmem:[#allocation11 + $0x120] ss:$16 sps:$4 sm:$0xff]  }
 0x334   :  { %4519 = vmatprep.subr.bf16.mxu1 %v7459_v3  ;;  %v7541_v3 = vld [vmem:[#allocation11 + $0x128] ss:$16 sps:$4 sm:$0xff]  }
 0x336   :  { %4192 = vmatpush1.bf16.msra.mxu0 %v7454_v58  ;;  %v7546_v58 = vld [vmem:[#allocation11 + $0x144] ss:$16 sps:$4 sm:$0xff]  }
 0x337   :  { %4520 = vmatpush1.bf16.msra.mxu1 %v7457_v4  ;;  %4193 = vmatprep.subr.bf16.mxu0 %v7462_v5  ;;  %v7549_v4 = vld [vmem:[#allocation11 + $0x14c] ss:$16 sps:$4 sm:$0xff]   ;;  %v7544_v5 = vld [vmem:[#allocation11 + $0x140] ss:$16 sps:$4 sm:$0xff]  }
 0x338   :  { %4521 = vmatprep.subr.bf16.mxu1 %v7465_v28  ;;  %v7547_v28 = vld [vmem:[#allocation11 + $0x148] ss:$16 sps:$4 sm:$0xff]  }
 0x33a   :  { %4194 = vmatpush1.bf16.msra.mxu0 %v7460_v61  ;;  %v7552_v61 = vld [vmem:[#allocation11 + $0x164] ss:$16 sps:$4 sm:$0xff]  }
 0x33b   :  { %4522 = vmatpush1.bf16.msra.mxu1 %v7463_v6  ;;  %4195 = vmatprep.subr.bf16.mxu0 %v7468_v9  ;;  %v7555_v6 = vld [vmem:[#allocation11 + $0x16c] ss:$16 sps:$4 sm:$0xff]   ;;  %v7550_v9 = vld [vmem:[#allocation11 + $0x160] ss:$16 sps:$4 sm:$0xff]  }
 0x33c   :  { %4523 = vmatprep.subr.bf16.mxu1 %v7471_v62  ;;  %v7553_v62 = vld [vmem:[#allocation11 + $0x168] ss:$16 sps:$4 sm:$0xff]  }
 0x33e   :  { %4196 = vmatpush1.bf16.msra.mxu0 %v7466_v19  ;;  %v7558_v19 = vld [vmem:[#allocation11 + $0x184] ss:$16 sps:$4 sm:$0xff]  }
 0x33f   :  { %4524 = vmatpush1.bf16.msra.mxu1 %v7469_v12  ;;  %4197 = vmatprep.subr.bf16.mxu0 %v7474_v14  ;;  %v7561_v12 = vld [vmem:[#allocation11 + $0x18c] ss:$16 sps:$4 sm:$0xff]   ;;  %v7556_v14 = vld [vmem:[#allocation11 + $0x180] ss:$16 sps:$4 sm:$0xff]  }
 0x340   :  { %4525 = vmatprep.subr.bf16.mxu1 %v7477_v13  ;;  %v7559_v13 = vld [vmem:[#allocation11 + $0x188] ss:$16 sps:$4 sm:$0xff]  }
 0x342   :  { %4198 = vmatpush1.bf16.msra.mxu0 %v7472_v7  ;;  %v7564_v7 = vld [vmem:[#allocation11 + $0x1a4] ss:$16 sps:$4 sm:$0xff]  }
 0x343   :  { %4526 = vmatpush1.bf16.msra.mxu1 %v7475_v15  ;;  %4199 = vmatprep.subr.bf16.mxu0 %v7480_v40  ;;  %v7567_v15 = vld [vmem:[#allocation11 + $0x1ac] ss:$16 sps:$4 sm:$0xff]   ;;  %v7562_v40 = vld [vmem:[#allocation11 + $0x1a0] ss:$16 sps:$4 sm:$0xff]  }
 0x344   :  { %4527 = vmatprep.subr.bf16.mxu1 %v7483_v37  ;;  %v7565_v37 = vld [vmem:[#allocation11 + $0x1a8] ss:$16 sps:$4 sm:$0xff]  }
 0x346   :  { %4200 = vmatpush1.bf16.msra.mxu0 %v7478_v16  ;;  %v7570_v16 = vld [vmem:[#allocation11 + $0x1c4] ss:$16 sps:$4 sm:$0xff]  }
 0x347   :  { %4528 = vmatpush1.bf16.msra.mxu1 %v7481_v36  ;;  %5336 = vmatprep.subr.bf16.mxu0 %v7486_v1  ;;  %v7568_v36 = vld [vmem:[#allocation11 + $0x1c0] ss:$16 sps:$4 sm:$0xff]   ;;  %v7571_v1 = vld [vmem:[#allocation11 + $0x1c8] ss:$16 sps:$4 sm:$0xff]  }
 0x348   :  { %5418 = vmatprep.subr.bf16.mxu1 %v7489_v18  ;;  %v7576_v18 = vld [vmem:[#allocation11 + $0x1e4] ss:$16 sps:$4 sm:$0xff]  }
 0x349   :  { %4202 = vmatmul.mubr.bf16.vlgmr.msra.gmra.mrb[16].mxu0 %v786_v57 }
 0x34a   :  { %4530 = vmatmul.mubr.bf16.vlgmr.msra.gmra.mrb[16].mxu1 %v786_v57  ;;  %5337 = vmatpush1.bf16.msra.mxu0 %v7484_v20  ;;  %v7579_v20 = vld [vmem:[#allocation11 + $0x1ec] ss:$16 sps:$4 sm:$0xff]   ;;  %v7574_v57 = vld [vmem:[#allocation11 + $0x1e0] ss:$16 sps:$4 sm:$0xff]  }
 0x34b   :  { %5419 = vmatpush1.bf16.msra.mxu1 %v7487_v21  ;;  %5338 = vmatprep.subr.bf16.mxu0 %v7492_v54  ;;  %v7577_v21 = vld [vmem:[#allocation11 + $0x1e8] ss:$16 sps:$4 sm:$0xff]   ;;  %v7582_v54 = vld [vmem:[#allocation11 + $0x204] ss:$16 sps:$4 sm:$0xff]  }
 0x34c   :  { %5420 = vmatprep.subr.bf16.mxu1 %v7495_v22  ;;  %v7585_v22 = vld [vmem:[#allocation11 + $0x20c] ss:$16 sps:$4 sm:$0xff]  }
 0x34e   :  { %5339 = vmatpush1.bf16.msra.mxu0 %v7490_v23  ;;  %v8257_v23 = vld [vmem:[#allocation10] sm:$0xf] }
 0x34f   :  { %5421 = vmatpush1.bf16.msra.mxu1 %v7493_v53  ;;  %5340 = vmatprep.subr.bf16.mxu0 %v7498_v24  ;;  %v1305_v53 = vrot.slane %v8257_v23, %v8155_v8  ;;  %v1309_v24 = vrot.slane %v8257_v23, %v8160_v10 }
 0x350   :  { %5422 = vmatprep.subr.bf16.mxu1 %v7501_v25  ;;  %v1317_v25 = vrot.slane %v8257_v23, %v8163_v0 }
 0x352   :  { %5341 = vmatpush1.bf16.msra.mxu0 %v7496_v26 }
 0x353   :  { %5423 = vmatpush1.bf16.msra.mxu1 %v7499_v50  ;;  %5342 = vmatprep.subr.bf16.mxu0 %v7504_v27 }
 0x354   :  { %5424 = vmatprep.subr.bf16.mxu1 %v7507_v29 }
 0x356   :  { %5343 = vmatpush1.bf16.msra.mxu0 %v7502_v30 }
 0x357   :  { %5425 = vmatpush1.bf16.msra.mxu1 %v7505_v32  ;;  %5344 = vmatprep.subr.bf16.mxu0 %v7510_v33 }
 0x358   :  { %5426 = vmatprep.subr.bf16.mxu1 %v7513_v34 }
 0x35a   :  { %5345 = vmatpush1.bf16.msra.mxu0 %v7508_v38 }
 0x35b   :  { %5427 = vmatpush1.bf16.msra.mxu1 %v7511_v39  ;;  %5346 = vmatprep.subr.bf16.mxu0 %v7516_v43 }
 0x35c   :  { %5428 = vmatprep.subr.bf16.mxu1 %v7519_v44 }
 0x35e   :  { %5347 = vmatpush1.bf16.msra.mxu0 %v7514_v45 }
 0x35f   :  { %5429 = vmatpush1.bf16.msra.mxu1 %v7517_v46  ;;  %5348 = vmatprep.subr.bf16.mxu0 %v7522_v48 }
 0x360   :  { %5430 = vmatprep.subr.bf16.mxu1 %v7525_v49  ;;  %v7580_v49 = vld [vmem:[#allocation11 + $0x200] ss:$16 sps:$4 sm:$0xff]  }
 0x362   :  { %5349 = vmatpush1.bf16.msra.mxu0 %v7520_v47  ;;  %v7583_v47 = vld [vmem:[#allocation11 + $0x208] ss:$16 sps:$4 sm:$0xff]  }
 0x363   :  { %5431 = vmatpush1.bf16.msra.mxu1 %v7523_v56  ;;  %5350 = vmatprep.subr.bf16.mxu0 %v7528_v51  ;;  %v7588_v51 = vld [vmem:[#allocation11 + $0x224] ss:$16 sps:$4 sm:$0xff]  }
 0x364   :  { %5432 = vmatprep.subr.bf16.mxu1 %v7531_v52  ;;  %v7591_v52 = vld [vmem:[#allocation11 + $0x22c] ss:$16 sps:$4 sm:$0xff]  }
 0x366   :  { %5351 = vmatpush1.bf16.msra.mxu0 %v7526_v55 }
 0x367   :  { %5433 = vmatpush1.bf16.msra.mxu1 %v7529_v31  ;;  %5352 = vmatprep.subr.bf16.mxu0 %v7534_v59  ;;  %v7586_v31 = vld [vmem:[#allocation11 + $0x220] ss:$16 sps:$4 sm:$0xff]   ;;  %v7589_v59 = vld [vmem:[#allocation11 + $0x228] ss:$16 sps:$4 sm:$0xff]  }
 0x368   :  { %5434 = vmatprep.subr.bf16.mxu1 %v7537_v35  ;;  %v7594_v35 = vld [vmem:[#allocation11 + $0x244] ss:$16 sps:$4 sm:$0xff]  }
 0x36a   :  { %5353 = vmatpush1.bf16.msra.mxu0 %v7532_v60  ;;  %v7597_v60 = vld [vmem:[#allocation11 + $0x24c] ss:$16 sps:$4 sm:$0xff]  }
 0x36b   :  { %5435 = vmatpush1.bf16.msra.mxu1 %v7535_v63  ;;  %5354 = vmatprep.subr.bf16.mxu0 %v7540_v2  ;;  %v7592_v63 = vld [vmem:[#allocation11 + $0x240] ss:$16 sps:$4 sm:$0xff]   ;;  %v7595_v2 = vld [vmem:[#allocation11 + $0x248] ss:$16 sps:$4 sm:$0xff]  }
 0x36c   :  { %5436 = vmatprep.subr.bf16.mxu1 %v7543_v41  ;;  %v7600_v41 = vld [vmem:[#allocation11 + $0x264] ss:$16 sps:$4 sm:$0xff]  }
 0x36e   :  { %5355 = vmatpush1.bf16.msra.mxu0 %v7538_v11  ;;  %v7603_v11 = vld [vmem:[#allocation11 + $0x26c] ss:$16 sps:$4 sm:$0xff]  }
 0x36f   :  { %5437 = vmatpush1.bf16.msra.mxu1 %v7541_v3  ;;  %5356 = vmatprep.subr.bf16.mxu0 %v7546_v58  ;;  %v7598_v3 = vld [vmem:[#allocation11 + $0x260] ss:$16 sps:$4 sm:$0xff]   ;;  %v7601_v58 = vld [vmem:[#allocation11 + $0x268] ss:$16 sps:$4 sm:$0xff]  }
 0x370   :  { %5438 = vmatprep.subr.bf16.mxu1 %v7549_v4  ;;  %v7606_v4 = vld [vmem:[#allocation11 + $0x284] ss:$16 sps:$4 sm:$0xff]  }
 0x372   :  { %5357 = vmatpush1.bf16.msra.mxu0 %v7544_v5  ;;  %v7609_v5 = vld [vmem:[#allocation11 + $0x28c] ss:$16 sps:$4 sm:$0xff]  }
 0x373   :  { %5439 = vmatpush1.bf16.msra.mxu1 %v7547_v28  ;;  %5358 = vmatprep.subr.bf16.mxu0 %v7552_v61  ;;  %v7604_v28 = vld [vmem:[#allocation11 + $0x280] ss:$16 sps:$4 sm:$0xff]   ;;  %v7607_v61 = vld [vmem:[#allocation11 + $0x288] ss:$16 sps:$4 sm:$0xff]  }
 0x374   :  { %5440 = vmatprep.subr.bf16.mxu1 %v7555_v6  ;;  %v7612_v6 = vld [vmem:[#allocation11 + $0x2a4] ss:$16 sps:$4 sm:$0xff]  }
 0x376   :  { %5359 = vmatpush1.bf16.msra.mxu0 %v7550_v9  ;;  %v7615_v9 = vld [vmem:[#allocation11 + $0x2ac] ss:$16 sps:$4 sm:$0xff]  }
 0x377   :  { %5441 = vmatpush1.bf16.msra.mxu1 %v7553_v62  ;;  %5360 = vmatprep.subr.bf16.mxu0 %v7558_v19  ;;  %v7610_v62 = vld [vmem:[#allocation11 + $0x2a0] ss:$16 sps:$4 sm:$0xff]   ;;  %v7613_v19 = vld [vmem:[#allocation11 + $0x2a8] ss:$16 sps:$4 sm:$0xff]  }
 0x378   :  { %5442 = vmatprep.subr.bf16.mxu1 %v7561_v12  ;;  %v7618_v12 = vld [vmem:[#allocation11 + $0x2c4] ss:$16 sps:$4 sm:$0xff]  }
 0x37a   :  { %5361 = vmatpush1.bf16.msra.mxu0 %v7556_v14  ;;  %v7621_v14 = vld [vmem:[#allocation11 + $0x2cc] ss:$16 sps:$4 sm:$0xff]  }
 0x37b   :  { %5443 = vmatpush1.bf16.msra.mxu1 %v7559_v13  ;;  %5362 = vmatprep.subr.bf16.mxu0 %v7564_v7  ;;  %v7616_v13 = vld [vmem:[#allocation11 + $0x2c0] ss:$16 sps:$4 sm:$0xff]   ;;  %v7619_v7 = vld [vmem:[#allocation11 + $0x2c8] ss:$16 sps:$4 sm:$0xff]  }
 0x37c   :  { %5444 = vmatprep.subr.bf16.mxu1 %v7567_v15  ;;  %v7624_v15 = vld [vmem:[#allocation11 + $0x2e4] ss:$16 sps:$4 sm:$0xff]  }
 0x37e   :  { %5363 = vmatpush1.bf16.msra.mxu0 %v7562_v40  ;;  %v7627_v40 = vld [vmem:[#allocation11 + $0x2ec] ss:$16 sps:$4 sm:$0xff]  }
 0x37f   :  { %5445 = vmatpush1.bf16.msra.mxu1 %v7565_v37  ;;  %5364 = vmatprep.subr.bf16.mxu0 %v7570_v16  ;;  %v7622_v37 = vld [vmem:[#allocation11 + $0x2e0] ss:$16 sps:$4 sm:$0xff]   ;;  %v7625_v16 = vld [vmem:[#allocation11 + $0x2e8] ss:$16 sps:$4 sm:$0xff]  }
 0x380   :  { %5446 = vmatprep.subr.bf16.mxu1 %v7573_v17  ;;  %v7630_v17 = vld [vmem:[#allocation11 + $0x304] ss:$16 sps:$4 sm:$0xff]  }
 0x382   :  { %5365 = vmatpush1.bf16.msra.mxu0 %v7568_v36  ;;  %v7633_v36 = vld [vmem:[#allocation11 + $0x30c] ss:$16 sps:$4 sm:$0xff]  }
 0x383   :  { %5447 = vmatpush1.bf16.msra.mxu1 %v7571_v1  ;;  %5366 = vmatprep.subr.bf16.mxu0 %v7576_v18  ;;  %v7628_v1 = vld [vmem:[#allocation11 + $0x300] ss:$16 sps:$4 sm:$0xff]   ;;  %v7631_v18 = vld [vmem:[#allocation11 + $0x308] ss:$16 sps:$4 sm:$0xff]  }
 0x384   :  { %5448 = vmatprep.subr.bf16.mxu1 %v7579_v20  ;;  %v7636_v20 = vld [vmem:[#allocation11 + $0x324] ss:$16 sps:$4 sm:$0xff]  }
 0x386   :  { %5367 = vmatpush1.bf16.msra.mxu0 %v7574_v57  ;;  %v7639_v57 = vld [vmem:[#allocation11 + $0x32c] ss:$16 sps:$4 sm:$0xff]  }
 0x387   :  { %5449 = vmatpush1.bf16.msra.mxu1 %v7577_v21  ;;  %5377 = vmatprep.subr.bf16.mxu0 %v7582_v54  ;;  %v7634_v21 = vld [vmem:[#allocation11 + $0x320] ss:$16 sps:$4 sm:$0xff]   ;;  %v7637_v54 = vld [vmem:[#allocation11 + $0x328] ss:$16 sps:$4 sm:$0xff]  }
 0x388   :  { %5459 = vmatprep.subr.bf16.mxu1 %v7585_v22  ;;  %v7642_v22 = vld [vmem:[#allocation11 + $0x344] ss:$16 sps:$4 sm:$0xff]  }
 0x41c   :  { %v4203_v26 = vpop.f32.mrb[16].mxu0 }
 0x41d   :  { %v6628_v50 = vadd.f32 %v4203_v26, %v1305_v53  ;;  %v8265_v27 = vpop.f32.mrb[16].mxu1  ;;  %v4205_v29 = vpop.f32.mrb[17].mxu0  ;;  %v7645_v53 = vld [vmem:[#allocation11 + $0x34c] ss:$16 sps:$4 sm:$0xff]   ;;  %v7648_v26 = vld [vmem:[#allocation11 + $0x364] ss:$16 sps:$4 sm:$0xff]  }
 0x41e   :  { %v6629_v30 = vadd.f32 %v4205_v29, %v1309_v24  ;;  %v4533_v32 = vpop.f32.mrb[17].mxu1  ;;  %v4207_v33 = vpop.f32.mrb[18].mxu0  ;;  %v7640_v24 = vld [vmem:[#allocation11 + $0x340] ss:$16 sps:$4 sm:$0xff]  }
 0x41f   :  { %v4538_v34 = vmax.f32 %v6628_v50, 0.0  ;;  %v6631_v38 = vadd.f32 %v4533_v32, %v1317_v25  ;;  %v4535_v39 = vpop.f32.mrb[18].mxu1  ;;  %v4208_v43 = vpop.f32.mrb[19].mxu0  ;;  %v7643_v25 = vld [vmem:[#allocation11 + $0x348] ss:$16 sps:$4 sm:$0xff]  }
 0x420   :  { %v4539_v44 = vmax.f32 %v6629_v30, 0.0  ;;  %v4536_v45 = vpop.f32.mrb[19].mxu1  ;;  %v7651_v50 = vld [vmem:[#allocation11 + $0x36c] ss:$16 sps:$4 sm:$0xff]   ;;  %v7646_v29 = vld [vmem:[#allocation11 + $0x360] ss:$16 sps:$4 sm:$0xff]  }
 0x421   :  { %v4541_v46 = vmax.f32 %v6631_v38, 0.0  ;;  %v4542_v56 = vpack.c.bf16 %v4538_v34, %v4538_v34  ;;  %v7649_v30 = vld [vmem:[#allocation11 + $0x368] ss:$16 sps:$4 sm:$0xff]   ;;  %v7654_v32 = vld [vmem:[#allocation11 + $0x384] ss:$16 sps:$4 sm:$0xff]  }
 0x422   :  { %v4543_v48 = vpack.c.bf16 %v4539_v44, %v4539_v44  ;;  %v7657_v33 = vld [vmem:[#allocation11 + $0x38c] ss:$16 sps:$4 sm:$0xff]   ;;  %v7652_v34 = vld [vmem:[#allocation11 + $0x380] ss:$16 sps:$4 sm:$0xff]   ;;  %v7655_v38 = vld [vmem:[#allocation11 + $0x388] ss:$16 sps:$4 sm:$0xff]  }
 0x423   :  { %v4545_v55 = vpack.c.bf16 %v4541_v46, %v4541_v46  ;;  %v7660_v39 = vld [vmem:[#allocation11 + $0x3a4] ss:$16 sps:$4 sm:$0xff]   ;;  %v7663_v43 = vld [vmem:[#allocation11 + $0x3ac] ss:$16 sps:$4 sm:$0xff]   ;;  %v7658_v44 = vld [vmem:[#allocation11 + $0x3a0] ss:$16 sps:$4 sm:$0xff]   ;;  %v1313_v46 = vrot.slane %v8257_v23, %v8196_v42 }
 0x424   :  { %5368 = vmatprep.mubr.bf16.mxu0 %v4543_v48  ;;  %5450 = vmatprep.mubr.bf16.mxu1 %v4543_v48  ;;  %v7661_v45 = vld [vmem:[#allocation11 + $0x3a8] ss:$16 sps:$4 sm:$0xff]   ;;  %v7666_v48 = vld [vmem:[#allocation11 + $0x3c4] ss:$16 sps:$4 sm:$0xff]  }
 0x425   :  { %5369 = vmatmul.mubr.bf16.vlgmr.msra.gmra.mrb[20].mxu0 %v4542_v56  ;;  %5451 = vmatmul.mubr.bf16.vlgmr.msra.gmra.mrb[20].mxu1 %v4542_v56  ;;  %v7667_v56 = vld [vmem:[#allocation11 + $0x3c8] ss:$16 sps:$4 sm:$0xff]  }
 0x426   :  { %5378 = vmatpush1.bf16.msra.mxu0 %v7580_v49  ;;  %5460 = vmatpush1.bf16.msra.mxu1 %v7583_v47  ;;  %v7669_v49 = vld [vmem:[#allocation11 + $0x3cc] ss:$16 sps:$4 sm:$0xff]   ;;  %v7664_v47 = vld [vmem:[#allocation11 + $0x3c0] ss:$16 sps:$4 sm:$0xff]   ;;  %v7676_v23 = vld [vmem:[#allocation14 + $0x40] sm:$0xff]  }
 0x427   :  { %5409 = vmatprep.mubr.bf16.mxu0 %v4545_v55  ;;  %5491 = vmatprep.mubr.bf16.mxu1 %v4545_v55  ;;  %v7675_v55 = vld [vmem:[#allocation11 + $0x3ec] ss:$16 sps:$4 sm:$0xff]  }
 0x428   :  { %5379 = vmatprep.subr.bf16.mxu0 %v7588_v51  ;;  %5461 = vmatprep.subr.bf16.mxu1 %v7591_v52  ;;  %v6630_v51 = vadd.f32 %v8265_v27, %v1313_v46  ;;  %v7672_v52 = vld [vmem:[#allocation11 + $0x3e4] ss:$16 sps:$4 sm:$0xff]   ;;  %v7680_v27 = vld [vmem:[#allocation14 + $0x48] sm:$0xff]  }
 0x42a   :  { %5380 = vmatpush1.bf16.msra.mxu0 %v7586_v31  ;;  %5462 = vmatpush1.bf16.msra.mxu1 %v7589_v59  ;;  %v7670_v31 = vld [vmem:[#allocation11 + $0x3e0] ss:$16 sps:$4 sm:$0xff]   ;;  %v7673_v59 = vld [vmem:[#allocation11 + $0x3e8] ss:$16 sps:$4 sm:$0xff]  }
 0x42b   :  { %5381 = vmatprep.subr.bf16.mxu0 %v7594_v35  ;;  %5463 = vmatprep.subr.bf16.mxu1 %v7597_v60  ;;  %v4540_v35 = vmax.f32 %v6630_v51, 0.0  ;;  %v7677_v60 = vld [vmem:[#allocation14 + $0xc0] sm:$0xff]  }
 0x42e   :  { %5382 = vmatpush1.bf16.msra.mxu0 %v7592_v63  ;;  %5464 = vmatpush1.bf16.msra.mxu1 %v7595_v2  ;;  %v7678_v63 = vld [vmem:[#allocation14] sm:$0xff]  }
 0x42f   :  { %5383 = vmatprep.subr.bf16.mxu0 %v7600_v41  ;;  %5465 = vmatprep.subr.bf16.mxu1 %v7603_v11  ;;  %v7679_v2 = vld [vmem:[#allocation14 + $0x80] sm:$0xff]   ;;  %v4544_v41 = vpack.c.bf16 %v4540_v35, %v4540_v35  ;;  %v7681_v11 = vld [vmem:[#allocation14 + $0xc8] sm:$0xff]  }
 0x432   :  { %5384 = vmatpush1.bf16.msra.mxu0 %v7598_v3  ;;  %5466 = vmatpush1.bf16.msra.mxu1 %v7601_v58  ;;  %v7682_v3 = vld [vmem:[#allocation14 + $0x8] sm:$0xff]  }
 0x433   :  { %5385 = vmatprep.subr.bf16.mxu0 %v7606_v4  ;;  %5467 = vmatprep.subr.bf16.mxu1 %v7609_v5  ;;  %v7683_v58 = vld [vmem:[#allocation14 + $0x88] sm:$0xff]   ;;  %v7684_v4 = vld [vmem:[#allocation14 + $0x50] sm:$0xff]  }
 0x434   :  { %v7685_v5 = vld [vmem:[#allocation14 + $0xd0] sm:$0xff]  }
 0x436   :  { %5386 = vmatpush1.bf16.msra.mxu0 %v7604_v28  ;;  %5468 = vmatpush1.bf16.msra.mxu1 %v7607_v61  ;;  %v7686_v28 = vld [vmem:[#allocation14 + $0x10] sm:$0xff]  }
 0x437   :  { %5387 = vmatprep.subr.bf16.mxu0 %v7612_v6  ;;  %5469 = vmatprep.subr.bf16.mxu1 %v7615_v9  ;;  %v7687_v61 = vld [vmem:[#allocation14 + $0x90] sm:$0xff]   ;;  %v7688_v6 = vld [vmem:[#allocation14 + $0x58] sm:$0xff]  }
 0x438   :  { %v7689_v9 = vld [vmem:[#allocation14 + $0xd8] sm:$0xff]  }
 0x43a   :  { %5388 = vmatpush1.bf16.msra.mxu0 %v7610_v62  ;;  %5470 = vmatpush1.bf16.msra.mxu1 %v7613_v19  ;;  %v7690_v62 = vld [vmem:[#allocation14 + $0x18] sm:$0xff]  }
 0x43b   :  { %5389 = vmatprep.subr.bf16.mxu0 %v7618_v12  ;;  %5471 = vmatprep.subr.bf16.mxu1 %v7621_v14  ;;  %v7691_v19 = vld [vmem:[#allocation14 + $0x98] sm:$0xff]   ;;  %v7692_v12 = vld [vmem:[#allocation14 + $0x60] sm:$0xff]  }
 0x43c   :  { %v7693_v14 = vld [vmem:[#allocation14 + $0xe0] sm:$0xff]  }
 0x43e   :  { %5390 = vmatpush1.bf16.msra.mxu0 %v7616_v13  ;;  %5472 = vmatpush1.bf16.msra.mxu1 %v7619_v7  ;;  %v7694_v13 = vld [vmem:[#allocation14 + $0x20] sm:$0xff]  }
 0x43f   :  { %5391 = vmatprep.subr.bf16.mxu0 %v7624_v15  ;;  %5473 = vmatprep.subr.bf16.mxu1 %v7627_v40  ;;  %v7695_v7 = vld [vmem:[#allocation14 + $0xa0] sm:$0xff]   ;;  %v7696_v15 = vld [vmem:[#allocation14 + $0x68] sm:$0xff]  }
 0x440   :  { %v7697_v40 = vld [vmem:[#allocation14 + $0xe8] sm:$0xff]  }
 0x442   :  { %5392 = vmatpush1.bf16.msra.mxu0 %v7622_v37  ;;  %5474 = vmatpush1.bf16.msra.mxu1 %v7625_v16  ;;  %v7698_v37 = vld [vmem:[#allocation14 + $0x28] sm:$0xff]  }
 0x443   :  { %5393 = vmatprep.subr.bf16.mxu0 %v7630_v17  ;;  %5475 = vmatprep.subr.bf16.mxu1 %v7633_v36  ;;  %v7699_v16 = vld [vmem:[#allocation14 + $0xa8] sm:$0xff]   ;;  %v7700_v17 = vld [vmem:[#allocation14 + $0x70] sm:$0xff]  }
 0x444   :  { %v7701_v36 = vld [vmem:[#allocation14 + $0xf0] sm:$0xff]  }
 0x446   :  { %5394 = vmatpush1.bf16.msra.mxu0 %v7628_v1  ;;  %5476 = vmatpush1.bf16.msra.mxu1 %v7631_v18  ;;  %v7702_v1 = vld [vmem:[#allocation14 + $0x30] sm:$0xff]  }
 0x447   :  { %5395 = vmatprep.subr.bf16.mxu0 %v7636_v20  ;;  %5477 = vmatprep.subr.bf16.mxu1 %v7639_v57  ;;  %v7703_v18 = vld [vmem:[#allocation14 + $0xb0] sm:$0xff]   ;;  %v7704_v20 = vld [vmem:[#allocation14 + $0x78] sm:$0xff]  }
 0x448   :  { %v7705_v57 = vld [vmem:[#allocation14 + $0xf8] sm:$0xff]  }
 0x44a   :  { %5396 = vmatpush1.bf16.msra.mxu0 %v7634_v21  ;;  %5478 = vmatpush1.bf16.msra.mxu1 %v7637_v54  ;;  %v7706_v21 = vld [vmem:[#allocation14 + $0x38] sm:$0xff]  }
 0x44b   :  { %5397 = vmatprep.subr.bf16.mxu0 %v7642_v22  ;;  %5479 = vmatprep.subr.bf16.mxu1 %v7645_v53  ;;  %v7707_v54 = vld [vmem:[#allocation14 + $0xb8] sm:$0xff]  }
 0x44c   :  { %v4674_v22 = vld [vmem:[#allocation13] sm:$0xf] }
 0x44d   :  { %v4679_v53 = vrot.slane %v4674_v22, %v8155_v8 }
 0x44e   :  { %5398 = vmatpush1.bf16.msra.mxu0 %v7640_v24  ;;  %5480 = vmatpush1.bf16.msra.mxu1 %v7643_v25  ;;  %v4687_v24 = vrot.slane %v4674_v22, %v8196_v42  ;;  %v4683_v25 = vrot.slane %v4674_v22, %v8160_v10 }
 0x44f   :  { %5399 = vmatprep.subr.bf16.mxu0 %v7648_v26  ;;  %5481 = vmatprep.subr.bf16.mxu1 %v7651_v50  ;;  %v4691_v26 = vrot.slane %v4674_v22, %v8163_v0 }
 0x452   :  { %5400 = vmatpush1.bf16.msra.mxu0 %v7646_v29  ;;  %5482 = vmatpush1.bf16.msra.mxu1 %v7649_v30 }
 0x453   :  { %5401 = vmatprep.subr.bf16.mxu0 %v7654_v32  ;;  %5483 = vmatprep.subr.bf16.mxu1 %v7657_v33 }
 0x456   :  { %5402 = vmatpush1.bf16.msra.mxu0 %v7652_v34  ;;  %5484 = vmatpush1.bf16.msra.mxu1 %v7655_v38 }
 0x457   :  { %5403 = vmatprep.subr.bf16.mxu0 %v7660_v39  ;;  %5485 = vmatprep.subr.bf16.mxu1 %v7663_v43 }
 0x45a   :  { %5404 = vmatpush1.bf16.msra.mxu0 %v7658_v44  ;;  %5486 = vmatpush1.bf16.msra.mxu1 %v7661_v45 }
 0x45b   :  { %5405 = vmatprep.subr.bf16.mxu0 %v7666_v48  ;;  %5487 = vmatprep.subr.bf16.mxu1 %v7669_v49 }
 0x45e   :  { %5406 = vmatpush1.bf16.msra.mxu0 %v7664_v47  ;;  %5488 = vmatpush1.bf16.msra.mxu1 %v7667_v56 }
 0x45f   :  { %5407 = vmatprep.subr.bf16.mxu0 %v7672_v52  ;;  %5489 = vmatprep.subr.bf16.mxu1 %v7675_v55  ;;  %v6551_v55 = vld [vmem:[#allocation16] ss:$0 sm:$0xff] }
 0x462   :  { %5408 = vmatpush1.bf16.msra.mxu0 %v7670_v31  ;;  %5490 = vmatpush1.bf16.msra.mxu1 %v7673_v59 }
 0x463   :  { %6584 = vmatprep.subr.bf16.mxu0 %v7676_v23  ;;  %6606 = vmatprep.subr.bf16.mxu1 %v7677_v60 }
 0x465   :  { %5410 = vmatmul.mubr.bf16.vlgmr.msra.gmra.mrb[20].mxu0 %v4544_v41  ;;  %5492 = vmatmul.mubr.bf16.vlgmr.msra.gmra.mrb[20].mxu1 %v4544_v41 }
 0x466   :  { %6585 = vmatpush3.bf16.msra.mxu0 %v7678_v63  ;;  %6607 = vmatpush3.bf16.msra.mxu1 %v7679_v2 }
 0x467   :  { %6586 = vmatprep.subr.bf16.mxu0 %v7680_v27  ;;  %6608 = vmatprep.subr.bf16.mxu1 %v7681_v11 }
 0x46a   :  { %6587 = vmatpush3.bf16.msra.mxu0 %v7682_v3  ;;  %6609 = vmatpush3.bf16.msra.mxu1 %v7683_v58 }
 0x46b   :  { %6588 = vmatprep.subr.bf16.mxu0 %v7684_v4  ;;  %6610 = vmatprep.subr.bf16.mxu1 %v7685_v5 }
 0x46e   :  { %6589 = vmatpush3.bf16.msra.mxu0 %v7686_v28  ;;  %6611 = vmatpush3.bf16.msra.mxu1 %v7687_v61 }
 0x46f   :  { %6590 = vmatprep.subr.bf16.mxu0 %v7688_v6  ;;  %6612 = vmatprep.subr.bf16.mxu1 %v7689_v9 }
 0x472   :  { %6591 = vmatpush3.bf16.msra.mxu0 %v7690_v62  ;;  %6613 = vmatpush3.bf16.msra.mxu1 %v7691_v19 }
 0x473   :  { %6592 = vmatprep.subr.bf16.mxu0 %v7692_v12  ;;  %6614 = vmatprep.subr.bf16.mxu1 %v7693_v14 }
 0x476   :  { %6593 = vmatpush3.bf16.msra.mxu0 %v7694_v13  ;;  %6615 = vmatpush3.bf16.msra.mxu1 %v7695_v7 }
 0x477   :  { %6594 = vmatprep.subr.bf16.mxu0 %v7696_v15  ;;  %6616 = vmatprep.subr.bf16.mxu1 %v7697_v40 }
 0x47a   :  { %6595 = vmatpush3.bf16.msra.mxu0 %v7698_v37  ;;  %6617 = vmatpush3.bf16.msra.mxu1 %v7699_v16 }
 0x47b   :  { %6596 = vmatprep.subr.bf16.mxu0 %v7700_v17  ;;  %6618 = vmatprep.subr.bf16.mxu1 %v7701_v36 }
 0x47e   :  { %6597 = vmatpush3.bf16.msra.mxu0 %v7702_v1  ;;  %6619 = vmatpush3.bf16.msra.mxu1 %v7703_v18 }
 0x47f   :  { %6598 = vmatprep.subr.bf16.mxu0 %v7704_v20  ;;  %6620 = vmatprep.subr.bf16.mxu1 %v7705_v57 }
 0x482   :  { %6599 = vmatpush3.bf16.msra.mxu0 %v7706_v21  ;;  %6621 = vmatpush3.bf16.msra.mxu1 %v7707_v54 }
 0x538   :  { %v5411_v50 = vpop.f32.mrb[20].mxu0  ;;  %v5493_v29 = vpop.f32.mrb[20].mxu1 }
 0x539   :  { %v6632_v30 = vadd.f32 %v5411_v50, %v4679_v53  ;;  %v6634_v32 = vadd.f32 %v5493_v29, %v4687_v24  ;;  %v5413_v33 = vpop.f32.mrb[21].mxu0  ;;  %v5495_v34 = vpop.f32.mrb[21].mxu1 }
 0x53a   :  { %v6633_v38 = vadd.f32 %v5413_v33, %v4683_v25  ;;  %v6635_v39 = vadd.f32 %v5495_v34, %v4691_v26  ;;  %v5415_v43 = vpop.f32.mrb[22].mxu0  ;;  %v5497_v44 = vpop.f32.mrb[22].mxu1 }
 0x53b   :  { %v5500_v45 = vmax.f32 %v6632_v30, 0.0  ;;  %v5502_v46 = vmax.f32 %v6634_v32, 0.0  ;;  %v5416_v48 = vpop.f32.mrb[23].mxu0  ;;  %v5498_v8 = vpop.f32.mrb[23].mxu1 }
 0x53c   :  { %v5501_v49 = vmax.f32 %v6633_v38, 0.0  ;;  %v5503_v42 = vmax.f32 %v6635_v39, 0.0 }
 0x53d   :  { %v5504_v56 = vpack.c.bf16 %v5500_v45, %v5500_v45  ;;  %v5506_v0 = vpack.c.bf16 %v5502_v46, %v5502_v46 }
 0x53e   :  { %v5505_v47 = vpack.c.bf16 %v5501_v49, %v5501_v49  ;;  %v5507_v10 = vpack.c.bf16 %v5503_v42, %v5503_v42 }
 0x540   :  { %5803 = vmatprep.mubr.bf16.mxu0 %v5505_v47  ;;  %5843 = vmatprep.mubr.bf16.mxu1 %v5507_v10 }
 0x541   :  { %5804 = vmatmul.mubr.bf16.vlgmr.msra.gmra.mrb[24].mxu0 %v5504_v56  ;;  %5844 = vmatmul.mubr.bf16.vlgmr.msra.gmra.mrb[24].mxu1 %v5506_v0 }
 0x614   :  { %v6600_v51 = vpop.f32.mrb[24].mxu0  ;;  %v6622_v52 = vpop.f32.mrb[24].mxu1 }
 0x615   :  { %v6601_v31 = vpop.f32.mrb[25].mxu0  ;;  %v6623_v59 = vpop.f32.mrb[25].mxu1 }
 0x616   :  { %v6602_v35 = vadd.f32 %v6601_v31, %v6600_v51  ;;  %v6624_v23 = vadd.f32 %v6623_v59, %v6622_v52  ;;  %v6603_v60 = vpop.f32.mrb[26].mxu0  ;;  %v6625_v63 = vpop.f32.mrb[26].mxu1 }
 0x617   :  { %v6604_v2 = vpop.f32.mrb[27].mxu0  ;;  %v6626_v41 = vpop.f32.mrb[27].mxu1 }
 0x618   :  { %v5806_v27 = vadd.f32 %v6602_v35, %v6551_v55 }
 0x61a   :  { %v5846_v11 = vadd.f32 %v6624_v23, %v5806_v27 }
 0x61c   :  { %5851 = vst [vmem:[#allocation17] sm:$0xff] %v5846_v11 }
 0x61d   :  { %7919 = shalt.err (!%p7916_p6)
}
 0x61e   :  { %s7920_s22 = scalar_lea.hbm %s8295_s9, 128 }
 0x61f   :  { %p7921_p7 = scmp.ne.s32.totalorder %s8295_s9, %s7920_s22  ;;  %p7924_p8 = scmp.lt.u32.totalorder %s7920_s22, %s8295_s9 }
 0x621   :  { %p7926_p9 = pnand %p7924_p8, %p7921_p7 }
 0x623   :  { %7929 = shalt.err (!%p7926_p9)
}
 0x624   :  { %5861 = dma.vmem_to_hbm [thread:$0]  %s5859_s27, 128, %s8295_s9, [#allocation4]  }
 0x625   :  { %7940 = dma.done.wait [#allocation4], 128  }
 0x626   :  { %7941 = vsyncadd [#allocation4], 4294967168 }
 0x627   :  { %5865 = vsyncpa [#allocation3], 1 }
 0x628   :  { %5866 = vsyncpa [#allocation6], 1 }
 0x629   :  { %5867 = vsyncpa [#allocation9], 1 }
 0x62a   :  { %5868 = vsyncpa [#allocation12], 1 }
 0x62b   :  { %5869 = vsyncpa [#allocation15], 1 }
 0x62c   :  { %5870 = vsyncpa [#allocation4], 1 }

</bundles_post_ra>
